<compile_context>
chip_gen: v7x
topology: tpu7x:2x2x1
jax: 0.10.0
libtpu: 0.0.40
codegen_flags: <defaults>
</compile_context>

<pallas_src>
import functools
import math

import jax
import jax.numpy as jnp
import numpy as np
from jax.experimental import pallas as pl
from jax.experimental.pallas import tpu as pltpu


def _SplitChannels(channels, num_groups):
    split_channels = [channels // num_groups for _ in range(num_groups)]
    split_channels[0] += channels - sum(split_channels)
    return split_channels


def _fused_dwconv_kernel(x_ref, w_ref, o_ref, *, k, ho, wo, stride):
    """Fused depthwise conv for one (channel-tile, batch) block.

    x_ref: (1, Hp, Wp, TC)  padded input block (VMEM)
    w_ref: (k, k, TC)       fused per-channel filter (zero taps for smaller
                            kernel-size groups and for padded lanes)
    o_ref: (1, Ho, Wo, TC)
    """
    tc = o_ref.shape[-1]
    # Hoist the filter load + cast out of the tap loops (k*k reuse).
    w = w_ref[...].astype(jnp.float32)                      # (k, k, TC)
    acc = jnp.zeros((ho, wo, tc), jnp.float32)
    for kh in range(k):
        for kw in range(k):
            if stride == 1:
                # Per-tap ref slice: plain offset loads the scheduler can
                # pipeline; the full padded block is never held live.
                patch = x_ref[0, kh:kh + ho, kw:kw + wo, :]
            else:
                # Stride folded into the accumulation: only strided rows/cols
                # are read, no stride^2 over-compute and no stride-1 HBM
                # writeback + re-read.
                patch = x_ref[0,
                              pl.ds(kh, ho, stride=stride),
                              pl.ds(kw, wo, stride=stride), :]
            acc = acc + patch.astype(jnp.float32) * w[kh, kw]
    o_ref[0] = acc.astype(o_ref.dtype)


def _fused_mdconv_pallas(x_p, w_full, *, k, ho, wo, stride, tc=128):
    """x_p: (N, Hp, Wp, C_pad) pre-padded NHWC input; w_full: (k, k, C_pad)."""
    n, hp, wp, cpad = x_p.shape
    assert cpad % tc == 0
    num_ct = cpad // tc
    kernel = functools.partial(_fused_dwconv_kernel,
                               k=k, ho=ho, wo=wo, stride=stride)
    return pl.pallas_call(
        kernel,
        out_shape=jax.ShapeDtypeStruct((n, ho, wo, cpad), x_p.dtype),
        grid=(num_ct, n),                      # batch innermost -> filter block
        in_specs=[                             # unchanged across inner steps
            pl.BlockSpec((1, hp, wp, tc), lambda c, b: (b, 0, 0, c)),
            pl.BlockSpec((k, k, tc), lambda c, b: (0, 0, c)),
        ],
        out_specs=pl.BlockSpec((1, ho, wo, tc), lambda c, b: (b, 0, 0, c)),
        compiler_params=pltpu.CompilerParams(
            dimension_semantics=("parallel", "parallel")),
    )(x_p, w_full)


class MDConvPallas:
    """JAX/Pallas port of MDConv (deterministic parameter init)."""

    def __init__(self, channels, kernel_size, stride, key):
        self.channels = channels
        self.num_groups = len(kernel_size)
        self.kernel_size = list(kernel_size)
        self.split_channels = _SplitChannels(channels, self.num_groups)
        self.stride = stride
        self.k_max = max(self.kernel_size)
        # All groups must produce the same spatial output size for the channel
        # concatenation to be well defined (as in the PyTorch module); equal
        # kernel-size parity guarantees that for every input size.
        assert all((k % 2) == (self.k_max % 2) for k in self.kernel_size), (
            "MDConv kernel sizes must share parity")
        # Lane-dense channel padding (multiple of 128).
        self.cpad = max(128, ((channels + 127) // 128) * 128)

        keys = jax.random.split(key, self.num_groups)
        self.weights = []  # per-group (k, k, Cg) filters, kept for the reference
        for i in range(self.num_groups):
            k = self.kernel_size[i]
            cg = self.split_channels[i]
            bound = 1.0 / math.sqrt(k * k)   # fan_in = k*k for depthwise
            w = jax.random.uniform(keys[i], (k, k, cg), jnp.float32,
                                   minval=-bound, maxval=bound)
            self.weights.append(w)

        # Embed each group's filter, centered, into one fused depthwise filter.
        # Padding with p_max = k_max//2 plus a center offset of
        # (k_max//2 - k//2) reproduces each group's padding = k//2 exactly.
        w_full = np.zeros((self.k_max, self.k_max, self.cpad), np.float32)
        c0 = 0
        for i in range(self.num_groups):
            k = self.kernel_size[i]
            cg = self.split_channels[i]
            d = self.k_max // 2 - k // 2
            w_full[d:d + k, d:d + k, c0:c0 + cg] = np.asarray(self.weights[i])
            c0 += cg
        self.w_full = jnp.asarray(w_full)

    def apply_nhwc(self, x_nhwc):
        n, h, w, c = x_nhwc.shape
        assert c == self.channels
        s = self.stride
        pad = self.k_max // 2
        ho = (h + 2 * pad - self.k_max) // s + 1
        wo = (w + 2 * pad - self.k_max) // s + 1
        # Single fused pad: spatial halo + lane-dense channel padding, one pass.
        x_p = jnp.pad(x_nhwc,
                      ((0, 0), (pad, pad), (pad, pad), (0, self.cpad - c)))
        y = _fused_mdconv_pallas(x_p, self.w_full, k=self.k_max,
                                 ho=ho, wo=wo, stride=s)
        return y[..., :c]   # drop zero-padded lanes

    def __call__(self, x_nchw):
        # PyTorch-compatible NCHW interface. If the surrounding network is
        # NHWC, call apply_nhwc directly and both transposes disappear.
        x_nhwc = jnp.transpose(x_nchw, (0, 2, 3, 1))
        y_nhwc = self.apply_nhwc(x_nhwc)
        return jnp.transpose(y_nhwc, (0, 3, 1, 2))


def _reference_mdconv(x_nchw, mod: MDConvPallas):
    """Pure-JAX (lax.conv) per-group reference for correctness checking."""
    outs = []
    c0 = 0
    for i in range(mod.num_groups):
        cg = mod.split_channels[i]
        k = mod.kernel_size[i]
        pad = k // 2
        xg = x_nchw[:, c0:c0 + cg]
        c0 += cg
        w_oihw = jnp.transpose(mod.weights[i], (2, 0, 1))[:, None, :, :]
        y = jax.lax.conv_general_dilated(
            xg, w_oihw,
            window_strides=(mod.stride, mod.stride),
            padding=((pad, pad), (pad, pad)),
            feature_group_count=cg,
            dimension_numbers=("NCHW", "OIHW", "NCHW"),
            precision=jax.lax.Precision.HIGHEST)
        outs.append(y)
    return jnp.concatenate(outs, axis=1)


if __name__ == "__main__":
    key = jax.random.PRNGKey(0)
    k_x, k_w = jax.random.split(key)

    # Small shapes consistent with the module: batch=2, channels=4, spatial=16.
    N, C, H, W = 2, 4, 16, 16
    kernel_size = [3, 5]
    stride = 1

    x = jax.random.normal(k_x, (N, C, H, W), dtype=jnp.float32)

    mdconv = MDConvPallas(C, kernel_size, stride, k_w)
    y = jax.block_until_ready(mdconv(x))

    y_ref = jax.block_until_ready(_reference_mdconv(x, mdconv))
    np.testing.assert_allclose(np.asarray(y), np.asarray(y_ref),
                               rtol=1e-5, atol=1e-5)
    assert y.shape == (N, C, H, W)

    print("KERNEL_OK")
</pallas_src>

<mosaic_0001>
module attributes {stable_mosaic.version = 11 : i64} {
  func.func @_fused_dwconv_kernel(%arg0: i32, %arg1: i32, %arg2: memref<1x20x20x128xf32, #tpu.memory_space<vmem>>, %arg3: memref<5x5x128xf32, #tpu.memory_space<vmem>>, %arg4: memref<1x16x16x128xf32, #tpu.memory_space<vmem>>) attributes {dimension_semantics = [#tpu.dimension_semantics<parallel>, #tpu.dimension_semantics<parallel>], iteration_bounds = array<i64: 1, 2>, scalar_prefetch = 0 : i64, scratch_operands = 0 : i64, tpu.core_type = #tpu.core_type<tc>, window_params = [{transform_indices = @transform_0, window_bounds = array<i64: 1, 20, 20, 128>}, {transform_indices = @transform_1, window_bounds = array<i64: 5, 5, 128>}, {transform_indices = @transform_2, window_bounds = array<i64: 1, 16, 16, 128>}]} {
    %c0 = arith.constant 0 : index
    %c0_0 = arith.constant 0 : index
    %c0_1 = arith.constant 0 : index
    %0 = vector.load %arg3[%c0, %c0_0, %c0_1] : memref<5x5x128xf32, #tpu.memory_space<vmem>>, vector<5x5x128xf32>
    %cst = arith.constant 0.000000e+00 : f32
    %1 = vector.broadcast %cst : f32 to vector<16x16x128xf32>
    %c0_2 = arith.constant 0 : index
    %c0_3 = arith.constant 0 : index
    %c0_4 = arith.constant 0 : index
    %c0_5 = arith.constant 0 : index
    %2 = vector.load %arg2[%c0_2, %c0_3, %c0_4, %c0_5] : memref<1x20x20x128xf32, #tpu.memory_space<vmem>>, vector<1x16x16x128xf32>
    %3 = vector.shape_cast %2 : vector<1x16x16x128xf32> to vector<16x16x128xf32>
    %4 = vector.extract_strided_slice %0 {offsets = [0, 0, 0], sizes = [1, 1, 128], strides = [1, 1, 1]} : vector<5x5x128xf32> to vector<1x1x128xf32>
    %5 = vector.shape_cast %4 : vector<1x1x128xf32> to vector<128xf32>
    %6 = vector.shape_cast %5 : vector<128xf32> to vector<1x1x128xf32>
    %7 = vector.broadcast %6 : vector<1x1x128xf32> to vector<16x16x128xf32>
    %8 = arith.mulf %3, %7 : vector<16x16x128xf32>
    %9 = arith.addf %1, %8 : vector<16x16x128xf32>
    %c0_6 = arith.constant 0 : index
    %c0_7 = arith.constant 0 : index
    %c1 = arith.constant 1 : index
    %c0_8 = arith.constant 0 : index
    %10 = vector.load %arg2[%c0_6, %c0_7, %c1, %c0_8] : memref<1x20x20x128xf32, #tpu.memory_space<vmem>>, vector<1x16x16x128xf32>
    %11 = vector.shape_cast %10 : vector<1x16x16x128xf32> to vector<16x16x128xf32>
    %12 = vector.extract_strided_slice %0 {offsets = [0, 1, 0], sizes = [1, 1, 128], strides = [1, 1, 1]} : vector<5x5x128xf32> to vector<1x1x128xf32>
    %13 = vector.shape_cast %12 : vector<1x1x128xf32> to vector<128xf32>
    %14 = vector.shape_cast %13 : vector<128xf32> to vector<1x1x128xf32>
    %15 = vector.broadcast %14 : vector<1x1x128xf32> to vector<16x16x128xf32>
    %16 = arith.mulf %11, %15 : vector<16x16x128xf32>
    %17 = arith.addf %9, %16 : vector<16x16x128xf32>
    %c0_9 = arith.constant 0 : index
    %c0_10 = arith.constant 0 : index
    %c2 = arith.constant 2 : index
    %c0_11 = arith.constant 0 : index
    %18 = vector.load %arg2[%c0_9, %c0_10, %c2, %c0_11] : memref<1x20x20x128xf32, #tpu.memory_space<vmem>>, vector<1x16x16x128xf32>
    %19 = vector.shape_cast %18 : vector<1x16x16x128xf32> to vector<16x16x128xf32>
    %20 = vector.extract_strided_slice %0 {offsets = [0, 2, 0], sizes = [1, 1, 128], strides = [1, 1, 1]} : vector<5x5x128xf32> to vector<1x1x128xf32>
    %21 = vector.shape_cast %20 : vector<1x1x128xf32> to vector<128xf32>
    %22 = vector.shape_cast %21 : vector<128xf32> to vector<1x1x128xf32>
    %23 = vector.broadcast %22 : vector<1x1x128xf32> to vector<16x16x128xf32>
    %24 = arith.mulf %19, %23 : vector<16x16x128xf32>
    %25 = arith.addf %17, %24 : vector<16x16x128xf32>
    %c0_12 = arith.constant 0 : index
    %c0_13 = arith.constant 0 : index
    %c3 = arith.constant 3 : index
    %c0_14 = arith.constant 0 : index
    %26 = vector.load %arg2[%c0_12, %c0_13, %c3, %c0_14] : memref<1x20x20x128xf32, #tpu.memory_space<vmem>>, vector<1x16x16x128xf32>
    %27 = vector.shape_cast %26 : vector<1x16x16x128xf32> to vector<16x16x128xf32>
    %28 = vector.extract_strided_slice %0 {offsets = [0, 3, 0], sizes = [1, 1, 128], strides = [1, 1, 1]} : vector<5x5x128xf32> to vector<1x1x128xf32>
    %29 = vector.shape_cast %28 : vector<1x1x128xf32> to vector<128xf32>
    %30 = vector.shape_cast %29 : vector<128xf32> to vector<1x1x128xf32>
    %31 = vector.broadcast %30 : vector<1x1x128xf32> to vector<16x16x128xf32>
    %32 = arith.mulf %27, %31 : vector<16x16x128xf32>
    %33 = arith.addf %25, %32 : vector<16x16x128xf32>
    %c0_15 = arith.constant 0 : index
    %c0_16 = arith.constant 0 : index
    %c4 = arith.constant 4 : index
    %c0_17 = arith.constant 0 : index
    %34 = vector.load %arg2[%c0_15, %c0_16, %c4, %c0_17] : memref<1x20x20x128xf32, #tpu.memory_space<vmem>>, vector<1x16x16x128xf32>
    %35 = vector.shape_cast %34 : vector<1x16x16x128xf32> to vector<16x16x128xf32>
    %36 = vector.extract_strided_slice %0 {offsets = [0, 4, 0], sizes = [1, 1, 128], strides = [1, 1, 1]} : vector<5x5x128xf32> to vector<1x1x128xf32>
    %37 = vector.shape_cast %36 : vector<1x1x128xf32> to vector<128xf32>
    %38 = vector.shape_cast %37 : vector<128xf32> to vector<1x1x128xf32>
    %39 = vector.broadcast %38 : vector<1x1x128xf32> to vector<16x16x128xf32>
    %40 = arith.mulf %35, %39 : vector<16x16x128xf32>
    %41 = arith.addf %33, %40 : vector<16x16x128xf32>
    %c0_18 = arith.constant 0 : index
    %c1_19 = arith.constant 1 : index
    %c0_20 = arith.constant 0 : index
    %c0_21 = arith.constant 0 : index
    %42 = vector.load %arg2[%c0_18, %c1_19, %c0_20, %c0_21] : memref<1x20x20x128xf32, #tpu.memory_space<vmem>>, vector<1x16x16x128xf32>
    %43 = vector.shape_cast %42 : vector<1x16x16x128xf32> to vector<16x16x128xf32>
    %44 = vector.extract_strided_slice %0 {offsets = [1, 0, 0], sizes = [1, 1, 128], strides = [1, 1, 1]} : vector<5x5x128xf32> to vector<1x1x128xf32>
    %45 = vector.shape_cast %44 : vector<1x1x128xf32> to vector<128xf32>
    %46 = vector.shape_cast %45 : vector<128xf32> to vector<1x1x128xf32>
    %47 = vector.broadcast %46 : vector<1x1x128xf32> to vector<16x16x128xf32>
    %48 = arith.mulf %43, %47 : vector<16x16x128xf32>
    %49 = arith.addf %41, %48 : vector<16x16x128xf32>
    %c0_22 = arith.constant 0 : index
    %c1_23 = arith.constant 1 : index
    %c1_24 = arith.constant 1 : index
    %c0_25 = arith.constant 0 : index
    %50 = vector.load %arg2[%c0_22, %c1_23, %c1_24, %c0_25] : memref<1x20x20x128xf32, #tpu.memory_space<vmem>>, vector<1x16x16x128xf32>
    %51 = vector.shape_cast %50 : vector<1x16x16x128xf32> to vector<16x16x128xf32>
    %52 = vector.extract_strided_slice %0 {offsets = [1, 1, 0], sizes = [1, 1, 128], strides = [1, 1, 1]} : vector<5x5x128xf32> to vector<1x1x128xf32>
    %53 = vector.shape_cast %52 : vector<1x1x128xf32> to vector<128xf32>
    %54 = vector.shape_cast %53 : vector<128xf32> to vector<1x1x128xf32>
    %55 = vector.broadcast %54 : vector<1x1x128xf32> to vector<16x16x128xf32>
    %56 = arith.mulf %51, %55 : vector<16x16x128xf32>
    %57 = arith.addf %49, %56 : vector<16x16x128xf32>
    %c0_26 = arith.constant 0 : index
    %c1_27 = arith.constant 1 : index
    %c2_28 = arith.constant 2 : index
    %c0_29 = arith.constant 0 : index
    %58 = vector.load %arg2[%c0_26, %c1_27, %c2_28, %c0_29] : memref<1x20x20x128xf32, #tpu.memory_space<vmem>>, vector<1x16x16x128xf32>
    %59 = vector.shape_cast %58 : vector<1x16x16x128xf32> to vector<16x16x128xf32>
    %60 = vector.extract_strided_slice %0 {offsets = [1, 2, 0], sizes = [1, 1, 128], strides = [1, 1, 1]} : vector<5x5x128xf32> to vector<1x1x128xf32>
    %61 = vector.shape_cast %60 : vector<1x1x128xf32> to vector<128xf32>
    %62 = vector.shape_cast %61 : vector<128xf32> to vector<1x1x128xf32>
    %63 = vector.broadcast %62 : vector<1x1x128xf32> to vector<16x16x128xf32>
    %64 = arith.mulf %59, %63 : vector<16x16x128xf32>
    %65 = arith.addf %57, %64 : vector<16x16x128xf32>
    %c0_30 = arith.constant 0 : index
    %c1_31 = arith.constant 1 : index
    %c3_32 = arith.constant 3 : index
    %c0_33 = arith.constant 0 : index
    %66 = vector.load %arg2[%c0_30, %c1_31, %c3_32, %c0_33] : memref<1x20x20x128xf32, #tpu.memory_space<vmem>>, vector<1x16x16x128xf32>
    %67 = vector.shape_cast %66 : vector<1x16x16x128xf32> to vector<16x16x128xf32>
    %68 = vector.extract_strided_slice %0 {offsets = [1, 3, 0], sizes = [1, 1, 128], strides = [1, 1, 1]} : vector<5x5x128xf32> to vector<1x1x128xf32>
    %69 = vector.shape_cast %68 : vector<1x1x128xf32> to vector<128xf32>
    %70 = vector.shape_cast %69 : vector<128xf32> to vector<1x1x128xf32>
    %71 = vector.broadcast %70 : vector<1x1x128xf32> to vector<16x16x128xf32>
    %72 = arith.mulf %67, %71 : vector<16x16x128xf32>
    %73 = arith.addf %65, %72 : vector<16x16x128xf32>
    %c0_34 = arith.constant 0 : index
    %c1_35 = arith.constant 1 : index
    %c4_36 = arith.constant 4 : index
    %c0_37 = arith.constant 0 : index
    %74 = vector.load %arg2[%c0_34, %c1_35, %c4_36, %c0_37] : memref<1x20x20x128xf32, #tpu.memory_space<vmem>>, vector<1x16x16x128xf32>
    %75 = vector.shape_cast %74 : vector<1x16x16x128xf32> to vector<16x16x128xf32>
    %76 = vector.extract_strided_slice %0 {offsets = [1, 4, 0], sizes = [1, 1, 128], strides = [1, 1, 1]} : vector<5x5x128xf32> to vector<1x1x128xf32>
    %77 = vector.shape_cast %76 : vector<1x1x128xf32> to vector<128xf32>
    %78 = vector.shape_cast %77 : vector<128xf32> to vector<1x1x128xf32>
    %79 = vector.broadcast %78 : vector<1x1x128xf32> to vector<16x16x128xf32>
    %80 = arith.mulf %75, %79 : vector<16x16x128xf32>
    %81 = arith.addf %73, %80 : vector<16x16x128xf32>
    %c0_38 = arith.constant 0 : index
    %c2_39 = arith.constant 2 : index
    %c0_40 = arith.constant 0 : index
    %c0_41 = arith.constant 0 : index
    %82 = vector.load %arg2[%c0_38, %c2_39, %c0_40, %c0_41] : memref<1x20x20x128xf32, #tpu.memory_space<vmem>>, vector<1x16x16x128xf32>
    %83 = vector.shape_cast %82 : vector<1x16x16x128xf32> to vector<16x16x128xf32>
    %84 = vector.extract_strided_slice %0 {offsets = [2, 0, 0], sizes = [1, 1, 128], strides = [1, 1, 1]} : vector<5x5x128xf32> to vector<1x1x128xf32>
    %85 = vector.shape_cast %84 : vector<1x1x128xf32> to vector<128xf32>
    %86 = vector.shape_cast %85 : vector<128xf32> to vector<1x1x128xf32>
    %87 = vector.broadcast %86 : vector<1x1x128xf32> to vector<16x16x128xf32>
    %88 = arith.mulf %83, %87 : vector<16x16x128xf32>
    %89 = arith.addf %81, %88 : vector<16x16x128xf32>
    %c0_42 = arith.constant 0 : index
    %c2_43 = arith.constant 2 : index
    %c1_44 = arith.constant 1 : index
    %c0_45 = arith.constant 0 : index
    %90 = vector.load %arg2[%c0_42, %c2_43, %c1_44, %c0_45] : memref<1x20x20x128xf32, #tpu.memory_space<vmem>>, vector<1x16x16x128xf32>
    %91 = vector.shape_cast %90 : vector<1x16x16x128xf32> to vector<16x16x128xf32>
    %92 = vector.extract_strided_slice %0 {offsets = [2, 1, 0], sizes = [1, 1, 128], strides = [1, 1, 1]} : vector<5x5x128xf32> to vector<1x1x128xf32>
    %93 = vector.shape_cast %92 : vector<1x1x128xf32> to vector<128xf32>
    %94 = vector.shape_cast %93 : vector<128xf32> to vector<1x1x128xf32>
    %95 = vector.broadcast %94 : vector<1x1x128xf32> to vector<16x16x128xf32>
    %96 = arith.mulf %91, %95 : vector<16x16x128xf32>
    %97 = arith.addf %89, %96 : vector<16x16x128xf32>
    %c0_46 = arith.constant 0 : index
    %c2_47 = arith.constant 2 : index
    %c2_48 = arith.constant 2 : index
    %c0_49 = arith.constant 0 : index
    %98 = vector.load %arg2[%c0_46, %c2_47, %c2_48, %c0_49] : memref<1x20x20x128xf32, #tpu.memory_space<vmem>>, vector<1x16x16x128xf32>
    %99 = vector.shape_cast %98 : vector<1x16x16x128xf32> to vector<16x16x128xf32>
    %100 = vector.extract_strided_slice %0 {offsets = [2, 2, 0], sizes = [1, 1, 128], strides = [1, 1, 1]} : vector<5x5x128xf32> to vector<1x1x128xf32>
    %101 = vector.shape_cast %100 : vector<1x1x128xf32> to vector<128xf32>
    %102 = vector.shape_cast %101 : vector<128xf32> to vector<1x1x128xf32>
    %103 = vector.broadcast %102 : vector<1x1x128xf32> to vector<16x16x128xf32>
    %104 = arith.mulf %99, %103 : vector<16x16x128xf32>
    %105 = arith.addf %97, %104 : vector<16x16x128xf32>
    %c0_50 = arith.constant 0 : index
    %c2_51 = arith.constant 2 : index
    %c3_52 = arith.constant 3 : index
    %c0_53 = arith.constant 0 : index
    %106 = vector.load %arg2[%c0_50, %c2_51, %c3_52, %c0_53] : memref<1x20x20x128xf32, #tpu.memory_space<vmem>>, vector<1x16x16x128xf32>
    %107 = vector.shape_cast %106 : vector<1x16x16x128xf32> to vector<16x16x128xf32>
    %108 = vector.extract_strided_slice %0 {offsets = [2, 3, 0], sizes = [1, 1, 128], strides = [1, 1, 1]} : vector<5x5x128xf32> to vector<1x1x128xf32>
    %109 = vector.shape_cast %108 : vector<1x1x128xf32> to vector<128xf32>
    %110 = vector.shape_cast %109 : vector<128xf32> to vector<1x1x128xf32>
    %111 = vector.broadcast %110 : vector<1x1x128xf32> to vector<16x16x128xf32>
    %112 = arith.mulf %107, %111 : vector<16x16x128xf32>
    %113 = arith.addf %105, %112 : vector<16x16x128xf32>
    %c0_54 = arith.constant 0 : index
    %c2_55 = arith.constant 2 : index
    %c4_56 = arith.constant 4 : index
    %c0_57 = arith.constant 0 : index
    %114 = vector.load %arg2[%c0_54, %c2_55, %c4_56, %c0_57] : memref<1x20x20x128xf32, #tpu.memory_space<vmem>>, vector<1x16x16x128xf32>
    %115 = vector.shape_cast %114 : vector<1x16x16x128xf32> to vector<16x16x128xf32>
    %116 = vector.extract_strided_slice %0 {offsets = [2, 4, 0], sizes = [1, 1, 128], strides = [1, 1, 1]} : vector<5x5x128xf32> to vector<1x1x128xf32>
    %117 = vector.shape_cast %116 : vector<1x1x128xf32> to vector<128xf32>
    %118 = vector.shape_cast %117 : vector<128xf32> to vector<1x1x128xf32>
    %119 = vector.broadcast %118 : vector<1x1x128xf32> to vector<16x16x128xf32>
    %120 = arith.mulf %115, %119 : vector<16x16x128xf32>
    %121 = arith.addf %113, %120 : vector<16x16x128xf32>
    %c0_58 = arith.constant 0 : index
    %c3_59 = arith.constant 3 : index
    %c0_60 = arith.constant 0 : index
    %c0_61 = arith.constant 0 : index
    %122 = vector.load %arg2[%c0_58, %c3_59, %c0_60, %c0_61] : memref<1x20x20x128xf32, #tpu.memory_space<vmem>>, vector<1x16x16x128xf32>
    %123 = vector.shape_cast %122 : vector<1x16x16x128xf32> to vector<16x16x128xf32>
    %124 = vector.extract_strided_slice %0 {offsets = [3, 0, 0], sizes = [1, 1, 128], strides = [1, 1, 1]} : vector<5x5x128xf32> to vector<1x1x128xf32>
    %125 = vector.shape_cast %124 : vector<1x1x128xf32> to vector<128xf32>
    %126 = vector.shape_cast %125 : vector<128xf32> to vector<1x1x128xf32>
    %127 = vector.broadcast %126 : vector<1x1x128xf32> to vector<16x16x128xf32>
    %128 = arith.mulf %123, %127 : vector<16x16x128xf32>
    %129 = arith.addf %121, %128 : vector<16x16x128xf32>
    %c0_62 = arith.constant 0 : index
    %c3_63 = arith.constant 3 : index
    %c1_64 = arith.constant 1 : index
    %c0_65 = arith.constant 0 : index
    %130 = vector.load %arg2[%c0_62, %c3_63, %c1_64, %c0_65] : memref<1x20x20x128xf32, #tpu.memory_space<vmem>>, vector<1x16x16x128xf32>
    %131 = vector.shape_cast %130 : vector<1x16x16x128xf32> to vector<16x16x128xf32>
    %132 = vector.extract_strided_slice %0 {offsets = [3, 1, 0], sizes = [1, 1, 128], strides = [1, 1, 1]} : vector<5x5x128xf32> to vector<1x1x128xf32>
    %133 = vector.shape_cast %132 : vector<1x1x128xf32> to vector<128xf32>
    %134 = vector.shape_cast %133 : vector<128xf32> to vector<1x1x128xf32>
    %135 = vector.broadcast %134 : vector<1x1x128xf32> to vector<16x16x128xf32>
    %136 = arith.mulf %131, %135 : vector<16x16x128xf32>
    %137 = arith.addf %129, %136 : vector<16x16x128xf32>
    %c0_66 = arith.constant 0 : index
    %c3_67 = arith.constant 3 : index
    %c2_68 = arith.constant 2 : index
    %c0_69 = arith.constant 0 : index
    %138 = vector.load %arg2[%c0_66, %c3_67, %c2_68, %c0_69] : memref<1x20x20x128xf32, #tpu.memory_space<vmem>>, vector<1x16x16x128xf32>
    %139 = vector.shape_cast %138 : vector<1x16x16x128xf32> to vector<16x16x128xf32>
    %140 = vector.extract_strided_slice %0 {offsets = [3, 2, 0], sizes = [1, 1, 128], strides = [1, 1, 1]} : vector<5x5x128xf32> to vector<1x1x128xf32>
    %141 = vector.shape_cast %140 : vector<1x1x128xf32> to vector<128xf32>
    %142 = vector.shape_cast %141 : vector<128xf32> to vector<1x1x128xf32>
    %143 = vector.broadcast %142 : vector<1x1x128xf32> to vector<16x16x128xf32>
    %144 = arith.mulf %139, %143 : vector<16x16x128xf32>
    %145 = arith.addf %137, %144 : vector<16x16x128xf32>
    %c0_70 = arith.constant 0 : index
    %c3_71 = arith.constant 3 : index
    %c3_72 = arith.constant 3 : index
    %c0_73 = arith.constant 0 : index
    %146 = vector.load %arg2[%c0_70, %c3_71, %c3_72, %c0_73] : memref<1x20x20x128xf32, #tpu.memory_space<vmem>>, vector<1x16x16x128xf32>
    %147 = vector.shape_cast %146 : vector<1x16x16x128xf32> to vector<16x16x128xf32>
    %148 = vector.extract_strided_slice %0 {offsets = [3, 3, 0], sizes = [1, 1, 128], strides = [1, 1, 1]} : vector<5x5x128xf32> to vector<1x1x128xf32>
    %149 = vector.shape_cast %148 : vector<1x1x128xf32> to vector<128xf32>
    %150 = vector.shape_cast %149 : vector<128xf32> to vector<1x1x128xf32>
    %151 = vector.broadcast %150 : vector<1x1x128xf32> to vector<16x16x128xf32>
    %152 = arith.mulf %147, %151 : vector<16x16x128xf32>
    %153 = arith.addf %145, %152 : vector<16x16x128xf32>
    %c0_74 = arith.constant 0 : index
    %c3_75 = arith.constant 3 : index
    %c4_76 = arith.constant 4 : index
    %c0_77 = arith.constant 0 : index
    %154 = vector.load %arg2[%c0_74, %c3_75, %c4_76, %c0_77] : memref<1x20x20x128xf32, #tpu.memory_space<vmem>>, vector<1x16x16x128xf32>
    %155 = vector.shape_cast %154 : vector<1x16x16x128xf32> to vector<16x16x128xf32>
    %156 = vector.extract_strided_slice %0 {offsets = [3, 4, 0], sizes = [1, 1, 128], strides = [1, 1, 1]} : vector<5x5x128xf32> to vector<1x1x128xf32>
    %157 = vector.shape_cast %156 : vector<1x1x128xf32> to vector<128xf32>
    %158 = vector.shape_cast %157 : vector<128xf32> to vector<1x1x128xf32>
    %159 = vector.broadcast %158 : vector<1x1x128xf32> to vector<16x16x128xf32>
    %160 = arith.mulf %155, %159 : vector<16x16x128xf32>
    %161 = arith.addf %153, %160 : vector<16x16x128xf32>
    %c0_78 = arith.constant 0 : index
    %c4_79 = arith.constant 4 : index
    %c0_80 = arith.constant 0 : index
    %c0_81 = arith.constant 0 : index
    %162 = vector.load %arg2[%c0_78, %c4_79, %c0_80, %c0_81] : memref<1x20x20x128xf32, #tpu.memory_space<vmem>>, vector<1x16x16x128xf32>
    %163 = vector.shape_cast %162 : vector<1x16x16x128xf32> to vector<16x16x128xf32>
    %164 = vector.extract_strided_slice %0 {offsets = [4, 0, 0], sizes = [1, 1, 128], strides = [1, 1, 1]} : vector<5x5x128xf32> to vector<1x1x128xf32>
    %165 = vector.shape_cast %164 : vector<1x1x128xf32> to vector<128xf32>
    %166 = vector.shape_cast %165 : vector<128xf32> to vector<1x1x128xf32>
    %167 = vector.broadcast %166 : vector<1x1x128xf32> to vector<16x16x128xf32>
    %168 = arith.mulf %163, %167 : vector<16x16x128xf32>
    %169 = arith.addf %161, %168 : vector<16x16x128xf32>
    %c0_82 = arith.constant 0 : index
    %c4_83 = arith.constant 4 : index
    %c1_84 = arith.constant 1 : index
    %c0_85 = arith.constant 0 : index
    %170 = vector.load %arg2[%c0_82, %c4_83, %c1_84, %c0_85] : memref<1x20x20x128xf32, #tpu.memory_space<vmem>>, vector<1x16x16x128xf32>
    %171 = vector.shape_cast %170 : vector<1x16x16x128xf32> to vector<16x16x128xf32>
    %172 = vector.extract_strided_slice %0 {offsets = [4, 1, 0], sizes = [1, 1, 128], strides = [1, 1, 1]} : vector<5x5x128xf32> to vector<1x1x128xf32>
    %173 = vector.shape_cast %172 : vector<1x1x128xf32> to vector<128xf32>
    %174 = vector.shape_cast %173 : vector<128xf32> to vector<1x1x128xf32>
    %175 = vector.broadcast %174 : vector<1x1x128xf32> to vector<16x16x128xf32>
    %176 = arith.mulf %171, %175 : vector<16x16x128xf32>
    %177 = arith.addf %169, %176 : vector<16x16x128xf32>
    %c0_86 = arith.constant 0 : index
    %c4_87 = arith.constant 4 : index
    %c2_88 = arith.constant 2 : index
    %c0_89 = arith.constant 0 : index
    %178 = vector.load %arg2[%c0_86, %c4_87, %c2_88, %c0_89] : memref<1x20x20x128xf32, #tpu.memory_space<vmem>>, vector<1x16x16x128xf32>
    %179 = vector.shape_cast %178 : vector<1x16x16x128xf32> to vector<16x16x128xf32>
    %180 = vector.extract_strided_slice %0 {offsets = [4, 2, 0], sizes = [1, 1, 128], strides = [1, 1, 1]} : vector<5x5x128xf32> to vector<1x1x128xf32>
    %181 = vector.shape_cast %180 : vector<1x1x128xf32> to vector<128xf32>
    %182 = vector.shape_cast %181 : vector<128xf32> to vector<1x1x128xf32>
    %183 = vector.broadcast %182 : vector<1x1x128xf32> to vector<16x16x128xf32>
    %184 = arith.mulf %179, %183 : vector<16x16x128xf32>
    %185 = arith.addf %177, %184 : vector<16x16x128xf32>
    %c0_90 = arith.constant 0 : index
    %c4_91 = arith.constant 4 : index
    %c3_92 = arith.constant 3 : index
    %c0_93 = arith.constant 0 : index
    %186 = vector.load %arg2[%c0_90, %c4_91, %c3_92, %c0_93] : memref<1x20x20x128xf32, #tpu.memory_space<vmem>>, vector<1x16x16x128xf32>
    %187 = vector.shape_cast %186 : vector<1x16x16x128xf32> to vector<16x16x128xf32>
    %188 = vector.extract_strided_slice %0 {offsets = [4, 3, 0], sizes = [1, 1, 128], strides = [1, 1, 1]} : vector<5x5x128xf32> to vector<1x1x128xf32>
    %189 = vector.shape_cast %188 : vector<1x1x128xf32> to vector<128xf32>
    %190 = vector.shape_cast %189 : vector<128xf32> to vector<1x1x128xf32>
    %191 = vector.broadcast %190 : vector<1x1x128xf32> to vector<16x16x128xf32>
    %192 = arith.mulf %187, %191 : vector<16x16x128xf32>
    %193 = arith.addf %185, %192 : vector<16x16x128xf32>
    %c0_94 = arith.constant 0 : index
    %c4_95 = arith.constant 4 : index
    %c4_96 = arith.constant 4 : index
    %c0_97 = arith.constant 0 : index
    %194 = vector.load %arg2[%c0_94, %c4_95, %c4_96, %c0_97] : memref<1x20x20x128xf32, #tpu.memory_space<vmem>>, vector<1x16x16x128xf32>
    %195 = vector.shape_cast %194 : vector<1x16x16x128xf32> to vector<16x16x128xf32>
    %196 = vector.extract_strided_slice %0 {offsets = [4, 4, 0], sizes = [1, 1, 128], strides = [1, 1, 1]} : vector<5x5x128xf32> to vector<1x1x128xf32>
    %197 = vector.shape_cast %196 : vector<1x1x128xf32> to vector<128xf32>
    %198 = vector.shape_cast %197 : vector<128xf32> to vector<1x1x128xf32>
    %199 = vector.broadcast %198 : vector<1x1x128xf32> to vector<16x16x128xf32>
    %200 = arith.mulf %195, %199 : vector<16x16x128xf32>
    %201 = arith.addf %193, %200 : vector<16x16x128xf32>
    %c0_98 = arith.constant 0 : index
    %c0_99 = arith.constant 0 : index
    %c0_100 = arith.constant 0 : index
    %c0_101 = arith.constant 0 : index
    %202 = vector.load %arg4[%c0_98, %c0_99, %c0_100, %c0_101] : memref<1x16x16x128xf32, #tpu.memory_space<vmem>>, vector<1x16x16x128xf32>
    %203 = vector.shape_cast %202 : vector<1x16x16x128xf32> to vector<16x16x128xf32>
    %204 = vector.shape_cast %201 : vector<16x16x128xf32> to vector<1x16x16x128xf32>
    tpu.vector_store %arg4[%c0_98, %c0_99, %c0_100, %c0_101], %204 {strides = array<i32>} : memref<1x16x16x128xf32, #tpu.memory_space<vmem>>, vector<1x16x16x128xf32>,
    return
  }
  func.func @transform_0(%arg0: i32, %arg1: i32) -> (i32, i32, i32, i32) {
    %c0_i32 = arith.constant 0 : i32
    %c0_i32_0 = arith.constant 0 : i32
    %c0_i32_1 = arith.constant 0 : i32
    return %arg1, %c0_i32, %c0_i32_0, %arg0 : i32, i32, i32, i32
  }
  func.func @transform_1(%arg0: i32, %arg1: i32) -> (i32, i32, i32) {
    %c0_i32 = arith.constant 0 : i32
    %c0_i32_0 = arith.constant 0 : i32
    %c0_i32_1 = arith.constant 0 : i32
    return %c0_i32, %c0_i32_0, %arg0 : i32, i32, i32
  }
  func.func @transform_2(%arg0: i32, %arg1: i32) -> (i32, i32, i32, i32) {
    %c0_i32 = arith.constant 0 : i32
    %c0_i32_0 = arith.constant 0 : i32
    %c0_i32_1 = arith.constant 0 : i32
    return %arg1, %c0_i32, %c0_i32_0, %arg0 : i32, i32, i32, i32
  }
}

</mosaic_0001>

<bundles_post_ra>
// kernel: tpu_custom_call.1
= control target key start
LH: loop header
LB: loop body
LE: loop exit
PB: predicated region body
PF: predicated region fallthrough
CT: control target
= control target key end

     0   :  { %7 = vsyncpa [#allocation3], 0  ;;  %s8598_s0 = inlined_call_operand.vmem [shape: f32[2,20,20,128], index: 0, kind: input, shape index: {}]   ;;  %s8599_s1 = inlined_call_operand.vmem [shape: f32[5,5,128], index: 1, kind: input, shape index: {}]   ;;  %s8600_s2 = inlined_call_operand.hbm [shape: f32[2,16,16,128], index: 2, kind: output, shape index: {}]  }
   0x1   :  { %9 = vsyncpa [#allocation3 + $0x1], 0  ;;  %s3645_s9 = smov 0   ;;  %s3647_s10 = smov 0  }
   0x2   :  { %s3649_s11 = smov 0   ;;  %s3651_s12 = smov 0  }
   0x3   :  { %s3653_s13 = smov 0   ;;  %s3655_s14 = smov 0  }
   0x4 LB: > { %s2833_s15 = sadd.s32 4294967295, %s3625_s14   ;;  %s2834_s16 = sadd.s32 4294967294, %s3625_s14   ;;  %s3625_s14 = sphi %s3655_s14, %s15_s14   ;;  %s3621_s13 = sphi %s3653_s13, %s10040_s13   ;;  %s3617_s12 = sphi %s3651_s12, %s10039_s12   ;;  %s3613_s11 = sphi %s3649_s11, %s10038_s11   ;;  %s3609_s10 = sphi %s3647_s10, %s10037_s10   ;;  %s3605_s9 = sphi %s3645_s9, %s10036_s9  }
   0x5   : > { %s24_s17 = sadd.s32 1, %s3621_s13  ;;  %s90_s18 = sadd.s32 1, %s3613_s11 }
   0x6   : > { %p25_p0 = scmp.ge.s32.totalorder %s24_s17, 2  ;;  %p100_p1 = scmp.ne.s32.totalorder %s3613_s11, %s3609_s10 }
   0x7   : > { %p101_p2 = scmp.eq.s32.totalorder %s2833_s15, 1  ;;  %p106_p3 = scmp.ne.s32.totalorder %s3609_s10, %s3605_s9 }
   0x8   : > { %s10042_s17 = smov (%p25_p0, %s24_s17), 0  ;;  %p107_p5 = scmp.eq.s32.totalorder %s2834_s16, 1 }
   0x9   : > { %p3685_p4 = por %p101_p2, %p100_p1  ;;  %s85_s20 = ssub.s32 %s3621_s13, %s10042_s17 }
   0xa   : > { %p2838_p6 = scmp.ge.s32.totalorder %s3625_s14, 1  ;;  %p88_p7 = scmp.eq.s32.totalorder %s85_s20, 0 }
   0xb   : > { %p3692_p8 = por %p107_p5, %p106_p3  ;;  %p143_p9 = scmp.lt.s32.totalorder %s3625_s14, 3 }
   0xc   : > { %s3698_s22 = scalar_select %p88_p7, %s3613_s11, %s90_s18  }
   0xd   : > { %p144_p10 = pnand %p2838_p6, %p143_p9 }
   0xf   : > { %147 = sbr.rel (%p144_p10) target bundleno = 547 (0x223), region = 28 }
  0x16   : > { %p172_p11 = scmp.lt.s32.totalorder %s3617_s12, 1  ;;  %v221_v0 = vlaneseq  ;;  %v184_v2 = vld [vmem:[%s8599_s1] sm:$0x1f]  ;;  %v185_v3 = vld [vmem:[%s8599_s1 + $0x8] sm:$0x1f]  ;;  %s169_s24 = sand.u32 1, %s3609_s10  }
  0x17   : > { %s8450_s25 = sshll.u32 %s169_s24, 8  ;;  %s3486_s27 = sshll.u32 %s3617_s12, 12 }
  0x18   : > { %v222_v1 = vshrl.u32 %v221_v0, 7  ;;  %s173_s23 = scalar_select %p172_p11, %s3617_s12, 1 }
  0x19   : > { %s8487_s26 = scalar_lea.vmem [#allocation2], %s8450_s25  ;;  %s8530_s30 = scalar_lea.hbm %s8600_s2, %s3486_s27 }
  0x1a   : > { %v3708_v4 = vsub.s32 0, %v222_v1  ;;  %v3710_v5 = vsub.s32 1, %v222_v1  ;;  %v3712_v6 = vsub.s32 2, %v222_v1  ;;  %v3714_v7 = vsub.s32 3, %v222_v1  ;;  %s3487_s28 = smul.u32 480, %s173_s23  ;;  %s3627_s5 = smov [#allocation2]  }
  0x1b   : > { %v3716_v8 = vsub.s32 4, %v222_v1  ;;  %s3551_s6 = sshll.u32 %s3627_s5, 4  ;;  %s3552_s6 = int_to_ptr.vmem [resolvable:$false] %s3551_s6 }
  0x1c   : > { %8945 = vst [vmem:[#allocation5_spill] sm:$0xff] %v3708_v4  ;;  %8946 = vst [vmem:[#allocation6_spill] sm:$0xff] %v3710_v5  ;;  %v3719_v9 = vrot.slane %v184_v2, %v3708_v4  ;;  %s3724_s3 = scalar_lea.vmem %s8598_s0, %s3487_s28  ;;  %v3727_v10 = vrot.slane %v184_v2, %v3710_v5  ;;  %v3730_v11 = vrot.slane %v184_v2, %v3712_v6  ;;  %s2740_s28 = sshll.u32 %s8487_s26, 4  ;;  %s8532_s28 = int_to_ptr.vmem [resolvable:$true] %s2740_s28 }
  0x1d   : > { %8947 = vst [vmem:[#allocation7_spill] sm:$0xff] %v3712_v6  ;;  %8948 = vst [vmem:[#allocation8_spill] sm:$0xff] %v3714_v7  ;;  %v3733_v12 = vrot.slane %v184_v2, %v3714_v7  ;;  %v3736_v13 = vrot.slane %v185_v3, %v3708_v4  ;;  %v189_v14 = vld [vmem:[%s3724_s3] sm:$0xff]  ;;  %v190_v15 = vld [vmem:[%s3724_s3 + $0x8] sm:$0xff]  ;;  %v3742_v17 = vrot.slane %v184_v2, %v3716_v8  ;;  %s3547_s4 = scalar_lea.vmem %s8532_s28, 4096  ;;  %s3553_s7 = scalar_lea.vmem %s3552_s6, 8192 }
  0x1e   : > { %8949 = vst [vmem:[#allocation9_spill] sm:$0xff] %v3716_v8  ;;  %v191_v16 = vld [vmem:[%s3724_s3 + $0x18] sm:$0xff]  ;;  %v3745_v18 = vrot.slane %v185_v3, %v3710_v5  ;;  %v3748_v19 = vrot.slane %v185_v3, %v3712_v6  ;;  %v3751_v20 = vrot.slane %v185_v3, %v3714_v7  ;;  %v192_v21 = vld [vmem:[%s3724_s3 + $0x20] sm:$0xff]  ;;  %v193_v22 = vld [vmem:[%s3724_s3 + $0x30] sm:$0xff]  ;;  %v3757_v24 = vmul.f32 %v3719_v9, %v189_v14  ;;  %p3548_p12 = scmp.ne.s32.totalorder %s8532_s28, %s3547_s4  ;;  %p3554_p1 = scmp.lt.s32.totalorder %s8532_s28, %s3552_s6 }
  0x1f   : > { %8950 = vst [vmem:[#allocation10_spill] sm:$0xff] %v3733_v12  ;;  %8951 = vst [vmem:[#allocation11_spill] sm:$0xff] %v3736_v13  ;;  %v194_v23 = vld [vmem:[%s3724_s3 + $0x38] sm:$0xff]  ;;  %v3760_v25 = vmul.f32 %v3719_v9, %v190_v15  ;;  %v3763_v26 = vmul.f32 %v3719_v9, %v191_v16  ;;  %v3766_v27 = vmul.f32 %v3736_v13, %v191_v16  ;;  %v195_v28 = vld [vmem:[%s3724_s3 + $0x48] sm:$0xff]  ;;  %p3555_p2 = scmp.lt.s32.totalorder %s3553_s7, %s3547_s4 }
  0x20   : > { %8952 = vst [vmem:[#allocation12_spill] sm:$0xff] %v3742_v17  ;;  %8953 = vst [vmem:[#allocation13_spill] sm:$0xff] %v3745_v18  ;;  %v196_v29 = vld [vmem:[%s3724_s3 + $0x50] sm:$0xff]  ;;  %v197_v30 = vld [vmem:[%s3724_s3 + $0x60] sm:$0xff]  ;;  %v3772_v31 = vmul.f32 %v3719_v9, %v192_v21  ;;  %v3775_v32 = vmul.f32 %v3719_v9, %v193_v22  ;;  %v3778_v33 = vmul.f32 %v3719_v9, %v194_v23  ;;  %p3549_p13 = pnand %p3548_p12, %p3685_p4 }
  0x21   : > { %8954 = vst [vmem:[#allocation14_spill] sm:$0xff] %v3748_v19  ;;  %8955 = vst [vmem:[#allocation15_spill] sm:$0xff] %v3751_v20  ;;  %v3781_v34 = vmul.f32 %v3736_v13, %v192_v21  ;;  %v198_v35 = vld [vmem:[%s3724_s3 + $0x68] sm:$0xff]  ;;  %v199_v36 = vld [vmem:[%s3724_s3 + $0x78] sm:$0xff]  ;;  %v3787_v38 = vmul.f32 %v3719_v9, %v195_v28  ;;  %v3790_v39 = vmul.f32 %v3719_v9, %v196_v29  ;;  %p3556_p3 = por %p3555_p2, %p3554_p1 }
  0x22   : > { %8956 = vst [vmem:[#allocation16_spill] sm:$0xff] %v3766_v27  ;;  %v200_v37 = vld [vmem:[%s3724_s3 + $0x80] sm:$0xff]  ;;  %v3793_v40 = vmul.f32 %v3719_v9, %v197_v30  ;;  %v3796_v41 = vmul.f32 %v3736_v13, %v193_v22  ;;  %v201_v42 = vld [vmem:[%s3724_s3 + $0x90] sm:$0xff]  ;;  %v202_v43 = vld [vmem:[%s3724_s3 + $0x98] sm:$0xff]  ;;  %v3804_v45 = vmul.f32 %v3719_v9, %v198_v35  ;;  %v3807_v46 = vmul.f32 %v3719_v9, %v199_v36  ;;  %p3550_p0 = pneg %p3549_p13 }
  0x23   : > { %8957 = vst [vmem:[#allocation17_spill] sm:$0xff] %v3781_v34  ;;  %v3801_v44 = vld [vmem:[%s3724_s3 + $0xa8] sm:$0xff]  ;;  %v3810_v47 = vmul.f32 %v3719_v9, %v200_v37  ;;  %v3813_v48 = vmul.f32 %v3736_v13, %v194_v23  ;;  %v3816_v49 = vld [vmem:[%s3724_s3 + $0xb0] sm:$0xff]  ;;  %v3819_v50 = vld [vmem:[%s3724_s3 + $0xc0] sm:$0xff]  ;;  %v3825_v52 = vmul.f32 %v3719_v9, %v201_v42  ;;  %v3828_v53 = vmul.f32 %v3719_v9, %v202_v43 }
  0x24   : > { %8958 = vst [vmem:[#allocation18_spill] sm:$0xff] %v3796_v41  ;;  %8959 = vst [vmem:[#allocation19_spill] sm:$0xff] %v3801_v44  ;;  %v3822_v51 = vld [vmem:[%s3724_s3 + $0xc8] sm:$0xff]  ;;  %v3832_v54 = vmul.f32 %v3719_v9, %v3801_v44  ;;  %v3835_v55 = vmul.f32 %v3736_v13, %v195_v28  ;;  %v3838_v56 = vld [vmem:[%s3724_s3 + $0xd8] sm:$0xff]  ;;  %v3848_v59 = vmul.f32 %v3719_v9, %v3816_v49  ;;  %p3557_p5 = pnand %p3556_p3, %p3550_p0 }
  0x25   : > { %8960 = vst [vmem:[#allocation20_spill] sm:$0xff] %v3813_v48  ;;  %8961 = vst [vmem:[#allocation21_spill] sm:$0xff] %v3816_v49  ;;  %v3841_v57 = vld [vmem:[%s3724_s3 + $0xe0] sm:$0xff]  ;;  %v3844_v58 = vld [vmem:[%s3724_s3 + $0xf0] sm:$0xff]  ;;  %v3852_v60 = vmul.f32 %v3719_v9, %v3819_v50  ;;  %v3856_v61 = vmul.f32 %v3719_v9, %v3822_v51  ;;  %v3859_v62 = vmul.f32 %v3736_v13, %v196_v29 }
  0x26   : > { %8962 = vst [vmem:[#allocation22_spill] sm:$0xff] %v3819_v50  ;;  %8963 = vst [vmem:[#allocation23_spill] sm:$0xff] %v3822_v51  ;;  %v3862_v63 = vld [vmem:[%s3724_s3 + $0xf8] sm:$0xff]  ;;  %v3865_v0 = vld [vmem:[%s3724_s3 + $0x108] sm:$0xff]  ;;  %v3872_v2 = vmul.f32 %v3719_v9, %v3838_v56  ;;  %v3876_v3 = vmul.f32 %v3719_v9, %v3841_v57  ;;  %v3880_v14 = vmul.f32 %v3719_v9, %v3844_v58 }
  0x27   : > { %8964 = vst [vmem:[#allocation24_spill] sm:$0xff] %v3835_v55  ;;  %8965 = vst [vmem:[#allocation25_spill] sm:$0xff] %v3838_v56  ;;  %v3868_v1 = vld [vmem:[%s3724_s3 + $0x110] sm:$0xff]  ;;  %v3883_v15 = vmul.f32 %v3736_v13, %v197_v30  ;;  %v3886_v16 = vld [vmem:[%s3724_s3 + $0x120] sm:$0xff]  ;;  %v3896_v23 = vmul.f32 %v3719_v9, %v3862_v63  ;;  %v3900_v28 = vmul.f32 %v3719_v9, %v3865_v0 }
  0x28   : > { %8966 = vst [vmem:[#allocation26_spill] sm:$0xff] %v3841_v57  ;;  %8967 = vst [vmem:[#allocation27_spill] sm:$0xff] %v3844_v58  ;;  %v3889_v21 = vld [vmem:[%s3724_s3 + $0x128] sm:$0xff]  ;;  %v3892_v22 = vld [vmem:[%s3724_s3 + $0x138] sm:$0xff]  ;;  %v3904_v29 = vmul.f32 %v3719_v9, %v3868_v1  ;;  %v3907_v30 = vmul.f32 %v3736_v13, %v198_v35  ;;  %v3920_v4 = vmul.f32 %v3719_v9, %v3886_v16 }
  0x29   : > { %8968 = vst [vmem:[#allocation28_spill] sm:$0xff] %v3859_v62  ;;  %8969 = vst [vmem:[#allocation29_spill] sm:$0xff] %v3862_v63  ;;  %v3910_v7 = vld [vmem:[%s3724_s3 + $0x140] sm:$0xff]  ;;  %v3913_v6 = vld [vmem:[%s3724_s3 + $0x150] sm:$0xff]  ;;  %v3924_v8 = vmul.f32 %v3719_v9, %v3889_v21  ;;  %v3928_v35 = vmul.f32 %v3719_v9, %v3892_v22  ;;  %v3931_v20 = vmul.f32 %v3736_v13, %v199_v36 }
  0x2a   : > { %8970 = vst [vmem:[#allocation30_spill] sm:$0xff] %v3865_v0  ;;  %8971 = vst [vmem:[#allocation31_spill] sm:$0xff] %v3868_v1  ;;  %v3916_v5 = vld [vmem:[%s3724_s3 + $0x158] sm:$0xff]  ;;  %v3934_v19 = vld [vmem:[%s3724_s3 + $0x168] sm:$0xff] }
  0x2b   : > { %8972 = vst [vmem:[#allocation32_spill] sm:$0xff] %v3883_v15  ;;  %8973 = vst [vmem:[#allocation33_spill] sm:$0xff] %v3886_v16  ;;  %v3937_v18 = vld [vmem:[%s3724_s3 + $0x170] sm:$0xff]  ;;  %v3945_v15 = vmul.f32 %v3719_v9, %v3913_v6  ;;  %v3949_v62 = vmul.f32 %v3719_v9, %v3916_v5  ;;  %v289_v36 = vld [vmem:[%s3724_s3 + $0x1] sm:$0xff]  ;;  %v3957_v55 = vmul.f32 %v3719_v9, %v3934_v19 }
  0x2c   : > { %8974 = vst [vmem:[#allocation34_spill] sm:$0xff] %v3889_v21  ;;  %8975 = vst [vmem:[#allocation35_spill] sm:$0xff] %v3892_v22  ;;  %v3961_v48 = vmul.f32 %v3719_v9, %v3937_v18  ;;  %v290_v41 = vld [vmem:[%s3724_s3 + $0x9] sm:$0xff]  ;;  %v3965_v34 = vld [vmem:[%s3724_s3 + $0x19] sm:$0xff] }
  0x2d   : > { %8976 = vst [vmem:[#allocation36_spill] sm:$0xff] %v3907_v30  ;;  %8977 = vst [vmem:[#allocation37_spill] sm:$0xff] %v3910_v7  ;;  %v3941_v30 = vmul.f32 %v3719_v9, %v3910_v7  ;;  %v3968_v27 = vld [vmem:[%s3724_s3 + $0x21] sm:$0xff]  ;;  %v326_v9 = vmul.f32 %v3727_v10, %v290_v41  ;;  %v3998_v22 = vld [vmem:[%s3724_s3 + $0x69] sm:$0xff] }
  0x2e   : > { %8978 = vst [vmem:[#allocation38_spill] sm:$0xff] %v3913_v6  ;;  %8979 = vst [vmem:[#allocation39_spill] sm:$0xff] %v3916_v5  ;;  %v325_v5 = vmul.f32 %v3727_v10, %v289_v36  ;;  %v3981_v6 = vld [vmem:[%s3724_s3 + $0x49] sm:$0xff]  ;;  %v328_v36 = vmul.f32 %v3727_v10, %v3968_v27  ;;  %v3995_v7 = vld [vmem:[%s3724_s3 + $0x61] sm:$0xff] }
  0x2f   : > { %8980 = vst [vmem:[#allocation40_spill] sm:$0xff] %v3931_v20  ;;  %8981 = vst [vmem:[#allocation41_spill] sm:$0xff] %v3934_v19  ;;  %v3953_v20 = vmul.f32 %v3736_v13, %v200_v37  ;;  %v3972_v37 = vmul.f32 %v3736_v13, %v201_v42  ;;  %v3978_v19 = vld [vmem:[%s3724_s3 + $0x39] sm:$0xff]  ;;  %v3989_v42 = vmul.f32 %v3736_v13, %v202_v43  ;;  %v4013_v21 = vld [vmem:[%s3724_s3 + $0x81] sm:$0xff] }
  0x30   : > { %8982 = vst [vmem:[#allocation42_spill] sm:$0xff] %v3937_v18  ;;  %8984 = vst [vmem:[#allocation44_spill] sm:$0xff] %v3965_v34  ;;  %v327_v18 = vmul.f32 %v3727_v10, %v3965_v34  ;;  %v330_v34 = vmul.f32 %v3727_v10, %v3978_v19  ;;  %v4007_v43 = vadd.f32 %v325_v5, %v3757_v24  ;;  %v4016_v16 = vld [vmem:[%s3724_s3 + $0x91] sm:$0xff]  ;;  %v4028_v24 = vld [vmem:[%s3724_s3 + $0x99] sm:$0xff] }
  0x31   : > { %8983 = vst [vmem:[#allocation43_spill] sm:$0xff] %v3953_v20  ;;  %8985 = vst [vmem:[#allocation45_spill] sm:$0xff] %v3968_v27  ;;  %v3975_v20 = vld [vmem:[%s3724_s3 + $0x31] sm:$0xff]  ;;  %v331_v27 = vmul.f32 %v3727_v10, %v3981_v6  ;;  %v4025_v5 = vadd.f32 %v326_v9, %v3760_v25  ;;  %v4031_v1 = vld [vmem:[%s3724_s3 + $0xa9] sm:$0xff] }
  0x32   : > { %8986 = vst [vmem:[#allocation46_spill] sm:$0xff] %v3972_v37  ;;  %8987 = vst [vmem:[#allocation47_spill] sm:$0xff] %v3975_v20  ;;  %v3992_v37 = vld [vmem:[%s3724_s3 + $0x51] sm:$0xff]  ;;  %v329_v41 = vmul.f32 %v3727_v10, %v3975_v20  ;;  %v4043_v25 = vadd.f32 %v327_v18, %v3763_v26  ;;  %v4046_v9 = vld [vmem:[%s3724_s3 + $0xc1] sm:$0xff]  ;;  %v4061_v18 = vadd.f32 %v328_v36, %v3772_v31 }
  0x33   : > { %8988 = vst [vmem:[#allocation48_spill] sm:$0xff] %v3978_v19  ;;  %8989 = vst [vmem:[#allocation49_spill] sm:$0xff] %v3981_v6  ;;  %v332_v20 = vmul.f32 %v3727_v10, %v3992_v37  ;;  %v333_v19 = vmul.f32 %v3727_v10, %v3995_v7  ;;  %v334_v6 = vmul.f32 %v3727_v10, %v3998_v22  ;;  %v4034_v0 = vld [vmem:[%s3724_s3 + $0xb1] sm:$0xff]  ;;  %v4049_v63 = vld [vmem:[%s3724_s3 + $0xc9] sm:$0xff] }
  0x34   : > { %8990 = vst [vmem:[#allocation50_spill] sm:$0xff] %v3989_v42  ;;  %8991 = vst [vmem:[#allocation51_spill] sm:$0xff] %v3992_v37  ;;  %v4010_v42 = vld [vmem:[%s3724_s3 + $0x79] sm:$0xff]  ;;  %v4064_v26 = vld [vmem:[%s3724_s3 + $0xe1] sm:$0xff]  ;;  %v4079_v31 = vadd.f32 %v329_v41, %v3775_v32  ;;  %v4097_v32 = vadd.f32 %v330_v34, %v3778_v33 }
  0x35   : > { %8992 = vst [vmem:[#allocation52_spill] sm:$0xff] %v3995_v7  ;;  %8993 = vst [vmem:[#allocation53_spill] sm:$0xff] %v3998_v22  ;;  %v335_v37 = vmul.f32 %v3727_v10, %v4010_v42  ;;  %v336_v7 = vmul.f32 %v3727_v10, %v4013_v21  ;;  %v337_v22 = vmul.f32 %v3727_v10, %v4016_v16  ;;  %v4052_v58 = vld [vmem:[%s3724_s3 + $0xd9] sm:$0xff]  ;;  %v4067_v57 = vld [vmem:[%s3724_s3 + $0xf1] sm:$0xff] }
  0x36   : > { %8994 = vst [vmem:[#allocation54_spill] sm:$0xff] %v4010_v42  ;;  %8995 = vst [vmem:[#allocation55_spill] sm:$0xff] %v4013_v21  ;;  %v338_v42 = vmul.f32 %v3727_v10, %v4028_v24  ;;  %v339_v21 = vmul.f32 %v3727_v10, %v4031_v1  ;;  %v4070_v56 = vld [vmem:[%s3724_s3 + $0xf9] sm:$0xff]  ;;  %v4082_v36 = vld [vmem:[%s3724_s3 + $0x109] sm:$0xff] }
  0x37   : > { %8996 = vst [vmem:[#allocation56_spill] sm:$0xff] %v4016_v16  ;;  %8997 = vst [vmem:[#allocation57_spill] sm:$0xff] %v4028_v24  ;;  %v340_v16 = vmul.f32 %v3727_v10, %v4034_v0  ;;  %v341_v24 = vmul.f32 %v3727_v10, %v4046_v9  ;;  %v4085_v51 = vld [vmem:[%s3724_s3 + $0x111] sm:$0xff]  ;;  %v4088_v50 = vld [vmem:[%s3724_s3 + $0x121] sm:$0xff]  ;;  %v347_v44 = vmul.f32 %v3727_v10, %v4082_v36 }
  0x38   : > { %8998 = vst [vmem:[#allocation58_spill] sm:$0xff] %v4031_v1  ;;  %8999 = vst [vmem:[#allocation59_spill] sm:$0xff] %v4034_v0  ;;  %v342_v1 = vmul.f32 %v3727_v10, %v4049_v63  ;;  %v343_v0 = vmul.f32 %v3727_v10, %v4052_v58  ;;  %v4100_v41 = vld [vmem:[%s3724_s3 + $0x129] sm:$0xff]  ;;  %v4103_v49 = vld [vmem:[%s3724_s3 + $0x139] sm:$0xff] }
  0x39   : > { %9000 = vst [vmem:[#allocation60_spill] sm:$0xff] %v4046_v9  ;;  %9001 = vst [vmem:[#allocation61_spill] sm:$0xff] %v4049_v63  ;;  %v344_v9 = vmul.f32 %v3727_v10, %v4064_v26  ;;  %v345_v63 = vmul.f32 %v3727_v10, %v4067_v57  ;;  %v4106_v13 = vld [vmem:[%s3724_s3 + $0x141] sm:$0xff]  ;;  %v4118_v33 = vld [vmem:[%s3724_s3 + $0x151] sm:$0xff]  ;;  %v350_v12 = vmul.f32 %v3727_v10, %v4100_v41 }
  0x3a   : > { %9002 = vst [vmem:[#allocation62_spill] sm:$0xff] %v4052_v58  ;;  %9003 = vst [vmem:[#allocation63_spill] sm:$0xff] %v4064_v26  ;;  %v346_v58 = vmul.f32 %v3727_v10, %v4070_v56  ;;  %v348_v26 = vmul.f32 %v3727_v10, %v4085_v51  ;;  %v4121_v34 = vld [vmem:[%s3724_s3 + $0x159] sm:$0xff]  ;;  %v4124_v17 = vld [vmem:[%s3724_s3 + $0x169] sm:$0xff] }
  0x3b   : > { %9004 = vst [vmem:[#allocation64_spill] sm:$0xff] %v4067_v57  ;;  %9005 = vst [vmem:[#allocation65_spill] sm:$0xff] %v4070_v56  ;;  %v349_v57 = vmul.f32 %v3727_v10, %v4088_v50  ;;  %v4115_v56 = vadd.f32 %v331_v27, %v3787_v38  ;;  %v4133_v27 = vadd.f32 %v332_v20, %v3790_v39  ;;  %v4136_v38 = vld [vmem:[%s3724_s3 + $0x171] sm:$0xff] }
  0x3c   : > { %9006 = vst [vmem:[#allocation66_spill] sm:$0xff] %v4082_v36  ;;  %9007 = vst [vmem:[#allocation67_spill] sm:$0xff] %v4085_v51  ;;  %v351_v36 = vmul.f32 %v3727_v10, %v4103_v49  ;;  %v352_v51 = vmul.f32 %v3727_v10, %v4106_v13  ;;  %v356_v20 = vmul.f32 %v3727_v10, %v4136_v38 }
  0x3d   : > { %9008 = vst [vmem:[#allocation68_spill] sm:$0xff] %v4088_v50  ;;  %9009 = vst [vmem:[#allocation69_spill] sm:$0xff] %v4100_v41  ;;  %v353_v50 = vmul.f32 %v3727_v10, %v4118_v33  ;;  %v354_v41 = vmul.f32 %v3727_v10, %v4121_v34  ;;  %v4150_v39 = vadd.f32 %v334_v6, %v3804_v45  ;;  %v390_v45 = vld [vmem:[%s3724_s3 + $0xa] sm:$0xff] }
  0x3e   : > { %9010 = vst [vmem:[#allocation70_spill] sm:$0xff] %v4103_v49  ;;  %9011 = vst [vmem:[#allocation71_spill] sm:$0xff] %v4106_v13  ;;  %v355_v49 = vmul.f32 %v3727_v10, %v4124_v17  ;;  %v4153_v13 = vadd.f32 %v335_v37, %v3807_v46  ;;  %v4165_v10 = vadd.f32 %v339_v21, %v3832_v54  ;;  %v4173_v46 = vld [vmem:[%s3724_s3 + $0x1a] sm:$0xff]  ;;  %v4197_v21 = vld [vmem:[%s3724_s3 + $0x4a] sm:$0xff] }
  0x3f   : > { %9012 = vst [vmem:[#allocation72_spill] sm:$0xff] %v4115_v56  ;;  %9013 = vst [vmem:[#allocation73_spill] sm:$0xff] %v4118_v33  ;;  %v4145_v56 = vadd.f32 %v333_v19, %v3793_v40  ;;  %v4162_v19 = vadd.f32 %v338_v42, %v3828_v53  ;;  %v4168_v6 = vadd.f32 %v340_v16, %v3848_v59  ;;  %v389_v40 = vld [vmem:[%s3724_s3 + $0x2] sm:$0xff]  ;;  %v4191_v59 = vld [vmem:[%s3724_s3 + $0x32] sm:$0xff] }
  0x40   : > { %9014 = vst [vmem:[#allocation74_spill] sm:$0xff] %v4121_v34  ;;  %9015 = vst [vmem:[#allocation75_spill] sm:$0xff] %v4124_v17  ;;  %v4156_v34 = vadd.f32 %v336_v7, %v3810_v47  ;;  %v4159_v17 = vadd.f32 %v337_v22, %v3825_v52  ;;  %v4176_v7 = vld [vmem:[%s3724_s3 + $0x22] sm:$0xff]  ;;  %v4179_v47 = vadd.f32 %v341_v24, %v3852_v60  ;;  %v4194_v16 = vld [vmem:[%s3724_s3 + $0x3a] sm:$0xff] }
  0x41   : > { %9016 = vst [vmem:[#allocation76_spill] sm:$0xff] %v4136_v38  ;;  %9017 = vst [vmem:[#allocation77_spill] sm:$0xff] %v4173_v46  ;;  %v4182_v52 = vadd.f32 %v342_v1, %v3856_v61  ;;  %v4185_v53 = vadd.f32 %v343_v0, %v3872_v2  ;;  %v4188_v54 = vadd.f32 %v344_v9, %v3876_v3  ;;  %v4200_v60 = vld [vmem:[%s3724_s3 + $0x52] sm:$0xff]  ;;  %v4215_v3 = vld [vmem:[%s3724_s3 + $0x62] sm:$0xff] }
  0x42   : > { %9018 = vst [vmem:[#allocation78_spill] sm:$0xff] %v4176_v7  ;;  %9019 = vst [vmem:[#allocation79_spill] sm:$0xff] %v4191_v59  ;;  %v4203_v61 = vadd.f32 %v345_v63, %v3880_v14  ;;  %v4206_v0 = vadd.f32 %v346_v58, %v3896_v23  ;;  %v4209_v1 = vadd.f32 %v347_v44, %v3900_v28  ;;  %v4218_v22 = vld [vmem:[%s3724_s3 + $0x6a] sm:$0xff]  ;;  %v4221_v37 = vld [vmem:[%s3724_s3 + $0x7a] sm:$0xff] }
  0x43   : > { %9020 = vst [vmem:[#allocation80_spill] sm:$0xff] %v4194_v16  ;;  %9021 = vst [vmem:[#allocation81_spill] sm:$0xff] %v4197_v21  ;;  %v4212_v2 = vadd.f32 %v348_v26, %v3904_v29  ;;  %v4224_v58 = vadd.f32 %v349_v57, %v3920_v4  ;;  %v4227_v44 = vadd.f32 %v350_v12, %v3924_v8  ;;  %v4236_v23 = vld [vmem:[%s3724_s3 + $0x82] sm:$0xff]  ;;  %v4239_v28 = vld [vmem:[%s3724_s3 + $0x92] sm:$0xff] }
  0x44   : > { %9022 = vst [vmem:[#allocation82_spill] sm:$0xff] %v4200_v60  ;;  %9023 = vst [vmem:[#allocation83_spill] sm:$0xff] %v4215_v3  ;;  %v4230_v63 = vadd.f32 %v351_v36, %v3928_v35  ;;  %v4233_v14 = vadd.f32 %v352_v51, %v3941_v30  ;;  %v4242_v29 = vld [vmem:[%s3724_s3 + $0x9a] sm:$0xff]  ;;  %v4245_v4 = vadd.f32 %v353_v50, %v3945_v15  ;;  %v4257_v57 = vld [vmem:[%s3724_s3 + $0xaa] sm:$0xff] }
  0x45   : > { %9024 = vst [vmem:[#allocation84_spill] sm:$0xff] %v4218_v22  ;;  %9025 = vst [vmem:[#allocation85_spill] sm:$0xff] %v4221_v37  ;;  %v4248_v8 = vadd.f32 %v354_v41, %v3949_v62  ;;  %v4251_v12 = vadd.f32 %v355_v49, %v3957_v55  ;;  %v4254_v51 = vadd.f32 %v356_v20, %v3961_v48  ;;  %v4260_v30 = vld [vmem:[%s3724_s3 + $0xb2] sm:$0xff]  ;;  %v4263_v35 = vld [vmem:[%s3724_s3 + $0xc2] sm:$0xff] }
  0x46   : > { %9026 = vst [vmem:[#allocation86_spill] sm:$0xff] %v4227_v44  ;;  %9027 = vst [vmem:[#allocation87_spill] sm:$0xff] %v4230_v63  ;;  %v4266_v50 = vld [vmem:[%s3724_s3 + $0xca] sm:$0xff]  ;;  %v4269_v15 = vld [vmem:[%s3724_s3 + $0xda] sm:$0xff]  ;;  %v425_v49 = vmul.f32 %v3730_v11, %v389_v40  ;;  %v426_v48 = vmul.f32 %v3730_v11, %v390_v45  ;;  %v427_v55 = vmul.f32 %v3730_v11, %v4173_v46 }
  0x47   : > { %9028 = vst [vmem:[#allocation88_spill] sm:$0xff] %v4233_v14  ;;  %9029 = vst [vmem:[#allocation89_spill] sm:$0xff] %v4236_v23  ;;  %v4272_v62 = vld [vmem:[%s3724_s3 + $0xe2] sm:$0xff]  ;;  %v428_v42 = vmul.f32 %v3730_v11, %v4176_v7  ;;  %v4281_v24 = vld [vmem:[%s3724_s3 + $0xf2] sm:$0xff]  ;;  %v429_v36 = vmul.f32 %v3730_v11, %v4191_v59  ;;  %v430_v41 = vmul.f32 %v3730_v11, %v4194_v16 }
  0x48   : > { %9030 = vst [vmem:[#allocation90_spill] sm:$0xff] %v4239_v28  ;;  %9031 = vst [vmem:[#allocation91_spill] sm:$0xff] %v4242_v29  ;;  %v4284_v9 = vld [vmem:[%s3724_s3 + $0xfa] sm:$0xff]  ;;  %v4287_v26 = vld [vmem:[%s3724_s3 + $0x10a] sm:$0xff]  ;;  %v431_v20 = vmul.f32 %v3730_v11, %v4197_v21  ;;  %v432_v40 = vmul.f32 %v3730_v11, %v4200_v60  ;;  %v433_v59 = vmul.f32 %v3730_v11, %v4215_v3 }
  0x49   : > { %9032 = vst [vmem:[#allocation92_spill] sm:$0xff] %v4245_v4  ;;  %9033 = vst [vmem:[#allocation93_spill] sm:$0xff] %v4248_v8  ;;  %v4298_v45 = vld [vmem:[%s3724_s3 + $0x112] sm:$0xff]  ;;  %v4301_v7 = vld [vmem:[%s3724_s3 + $0x122] sm:$0xff]  ;;  %v434_v16 = vmul.f32 %v3730_v11, %v4218_v22  ;;  %v435_v21 = vmul.f32 %v3730_v11, %v4221_v37  ;;  %v436_v60 = vmul.f32 %v3730_v11, %v4236_v23 }
  0x4a   : > { %9034 = vst [vmem:[#allocation94_spill] sm:$0xff] %v4251_v12  ;;  %9035 = vst [vmem:[#allocation95_spill] sm:$0xff] %v4254_v51  ;;  %v4304_v46 = vld [vmem:[%s3724_s3 + $0x12a] sm:$0xff]  ;;  %v4315_v38 = vld [vmem:[%s3724_s3 + $0x13a] sm:$0xff]  ;;  %v437_v12 = vmul.f32 %v3730_v11, %v4239_v28  ;;  %v438_v3 = vmul.f32 %v3730_v11, %v4242_v29  ;;  %v439_v22 = vmul.f32 %v3730_v11, %v4257_v57 }
  0x4b   : > { %9036 = vst [vmem:[#allocation96_spill] sm:$0xff] %v4257_v57  ;;  %9037 = vst [vmem:[#allocation97_spill] sm:$0xff] %v4260_v30  ;;  %v4318_v33 = vld [vmem:[%s3724_s3 + $0x142] sm:$0xff]  ;;  %v4321_v51 = vld [vmem:[%s3724_s3 + $0x152] sm:$0xff]  ;;  %v440_v37 = vmul.f32 %v3730_v11, %v4260_v30  ;;  %v441_v14 = vmul.f32 %v3730_v11, %v4263_v35  ;;  %v442_v28 = vmul.f32 %v3730_v11, %v4266_v50 }
  0x4c   : > { %9038 = vst [vmem:[#allocation98_spill] sm:$0xff] %v4263_v35  ;;  %9039 = vst [vmem:[#allocation99_spill] sm:$0xff] %v4266_v50  ;;  %v4332_v8 = vld [vmem:[%s3724_s3 + $0x15a] sm:$0xff]  ;;  %v4335_v23 = vld [vmem:[%s3724_s3 + $0x16a] sm:$0xff]  ;;  %v443_v29 = vmul.f32 %v3730_v11, %v4269_v15  ;;  %v444_v57 = vmul.f32 %v3730_v11, %v4272_v62  ;;  %v445_v30 = vmul.f32 %v3730_v11, %v4281_v24 }
  0x4d   : > { %9040 = vst [vmem:[#allocation100_spill] sm:$0xff] %v4269_v15  ;;  %9041 = vst [vmem:[#allocation101_spill] sm:$0xff] %v4272_v62  ;;  %v4338_v4 = vld [vmem:[%s3724_s3 + $0x172] sm:$0xff]  ;;  %v446_v63 = vmul.f32 %v3730_v11, %v4284_v9  ;;  %v447_v44 = vmul.f32 %v3730_v11, %v4287_v26  ;;  %v448_v35 = vmul.f32 %v3730_v11, %v4298_v45 }
  0x4e   : > { %9042 = vst [vmem:[#allocation102_spill] sm:$0xff] %v4281_v24  ;;  %9043 = vst [vmem:[#allocation103_spill] sm:$0xff] %v4284_v9  ;;  %v449_v50 = vmul.f32 %v3730_v11, %v4301_v7  ;;  %v450_v15 = vmul.f32 %v3730_v11, %v4304_v46  ;;  %v451_v62 = vmul.f32 %v3730_v11, %v4315_v38 }
  0x4f   : > { %9044 = vst [vmem:[#allocation104_spill] sm:$0xff] %v4287_v26  ;;  %9045 = vst [vmem:[#allocation105_spill] sm:$0xff] %v4298_v45  ;;  %v452_v24 = vmul.f32 %v3730_v11, %v4318_v33  ;;  %v453_v9 = vmul.f32 %v3730_v11, %v4321_v51  ;;  %v454_v26 = vmul.f32 %v3730_v11, %v4332_v8 }
  0x50   : > { %9046 = vst [vmem:[#allocation106_spill] sm:$0xff] %v4301_v7  ;;  %9047 = vst [vmem:[#allocation107_spill] sm:$0xff] %v4304_v46  ;;  %v455_v45 = vmul.f32 %v3730_v11, %v4335_v23  ;;  %v456_v7 = vmul.f32 %v3730_v11, %v4338_v4  ;;  %v4373_v46 = vadd.f32 %v425_v49, %v4007_v43  ;;  %v9054_v43 = vld [vmem:[#allocation72_spill] sm:$0xff] }
  0x51   : > { %9048 = vst [vmem:[#allocation108_spill] sm:$0xff] %v4315_v38  ;;  %9049 = vst [vmem:[#allocation109_spill] sm:$0xff] %v4318_v33  ;;  %v4376_v38 = vadd.f32 %v426_v48, %v4025_v5  ;;  %v4379_v33 = vadd.f32 %v427_v55, %v4043_v25  ;;  %v4388_v11 = vadd.f32 %v430_v41, %v4097_v32  ;;  %v4510_v41 = vld [vmem:[%s3724_s3 + $0xb3] sm:$0xff] }
  0x52   : > { %9050 = vst [vmem:[#allocation110_spill] sm:$0xff] %v4321_v51  ;;  %9051 = vst [vmem:[#allocation111_spill] sm:$0xff] %v4332_v8  ;;  %v4382_v8 = vadd.f32 %v428_v42, %v4061_v18  ;;  %v4391_v49 = vadd.f32 %v431_v20, %v9054_v43  ;;  %v4394_v5 = vadd.f32 %v432_v40, %v4133_v27  ;;  %v9080_v42 = vld [vmem:[#allocation95_spill] sm:$0xff]  ;;  %v4513_v20 = vld [vmem:[%s3724_s3 + $0xc3] sm:$0xff] }
  0x53   : > { %9052 = vst [vmem:[#allocation112_spill] sm:$0xff] %v4335_v23  ;;  %9053 = vst [vmem:[#allocation113_spill] sm:$0xff] %v4338_v4  ;;  %v4385_v23 = vadd.f32 %v429_v36, %v4079_v31  ;;  %v4397_v25 = vadd.f32 %v433_v59, %v4145_v56  ;;  %v4400_v18 = vadd.f32 %v434_v16, %v4150_v39  ;;  %v489_v59 = vld [vmem:[%s3724_s3 + $0x3] sm:$0xff]  ;;  %v4423_v16 = vld [vmem:[%s3724_s3 + $0x1b] sm:$0xff] }
  0x54   : > { %v4403_v31 = vadd.f32 %v435_v21, %v4153_v13  ;;  %v4406_v32 = vadd.f32 %v436_v60, %v4156_v34  ;;  %v4409_v48 = vadd.f32 %v437_v12, %v4159_v17  ;;  %v4412_v27 = vadd.f32 %v438_v3, %v4162_v19  ;;  %v490_v13 = vld [vmem:[%s3724_s3 + $0xb] sm:$0xff]  ;;  %9055 = vst [vmem:[#allocation72_spill] sm:$0xff] %v4423_v16  ;;  %v4426_v34 = vld [vmem:[%s3724_s3 + $0x23] sm:$0xff]  ;;  %v4441_v21 = vld [vmem:[%s3724_s3 + $0x33] sm:$0xff] }
  0x55   : > { %v4415_v56 = vadd.f32 %v439_v22, %v4165_v10  ;;  %v4418_v39 = vadd.f32 %v440_v37, %v4168_v6  ;;  %9056 = vst [vmem:[#allocation114_spill] sm:$0xff] %v4426_v34  ;;  %v4429_v17 = vadd.f32 %v441_v14, %v4179_v47  ;;  %v4432_v19 = vadd.f32 %v442_v28, %v4182_v52  ;;  %v4444_v60 = vld [vmem:[%s3724_s3 + $0x3b] sm:$0xff]  ;;  %v4447_v3 = vld [vmem:[%s3724_s3 + $0x4b] sm:$0xff]  ;;  %v4450_v47 = vld [vmem:[%s3724_s3 + $0x53] sm:$0xff] }
  0x56   : > { %v4435_v10 = vadd.f32 %v443_v29, %v4185_v53  ;;  %v4438_v6 = vadd.f32 %v444_v57, %v4188_v54  ;;  %9057 = vst [vmem:[#allocation115_spill] sm:$0xff] %v4441_v21  ;;  %9058 = vst [vmem:[#allocation116_spill] sm:$0xff] %v4444_v60  ;;  %v4453_v52 = vadd.f32 %v445_v30, %v4203_v61  ;;  %v4465_v37 = vld [vmem:[%s3724_s3 + $0x63] sm:$0xff]  ;;  %v4468_v14 = vld [vmem:[%s3724_s3 + $0x6b] sm:$0xff] }
  0x57   : > { %9059 = vst [vmem:[#allocation117_spill] sm:$0xff] %v4447_v3  ;;  %9060 = vst [vmem:[#allocation118_spill] sm:$0xff] %v4450_v47  ;;  %v4456_v53 = vadd.f32 %v446_v63, %v4206_v0  ;;  %v4459_v54 = vadd.f32 %v447_v44, %v4209_v1  ;;  %v4462_v22 = vadd.f32 %v448_v35, %v4212_v2  ;;  %v4471_v28 = vld [vmem:[%s3724_s3 + $0x7b] sm:$0xff]  ;;  %v9065_v0 = vld [vmem:[#allocation86_spill] sm:$0xff] }
  0x58   : > { %9061 = vst [vmem:[#allocation119_spill] sm:$0xff] %v4465_v37  ;;  %9062 = vst [vmem:[#allocation120_spill] sm:$0xff] %v4468_v14  ;;  %v4474_v61 = vadd.f32 %v449_v50, %v4224_v58  ;;  %v4477_v1 = vadd.f32 %v450_v15, %v9065_v0  ;;  %v9067_v44 = vld [vmem:[#allocation87_spill] sm:$0xff]  ;;  %v9069_v63 = vld [vmem:[#allocation88_spill] sm:$0xff] }
  0x59   : > { %9063 = vst [vmem:[#allocation121_spill] sm:$0xff] %v4471_v28  ;;  %v4480_v2 = vadd.f32 %v451_v62, %v9067_v44  ;;  %v4483_v29 = vadd.f32 %v452_v24, %v9069_v63  ;;  %v4486_v12 = vld [vmem:[%s3724_s3 + $0x83] sm:$0xff]  ;;  %v4489_v57 = vld [vmem:[%s3724_s3 + $0x93] sm:$0xff]  ;;  %v4492_v30 = vld [vmem:[%s3724_s3 + $0x9b] sm:$0xff]  ;;  %v4504_v24 = vadd.f32 %v456_v7, %v9080_v42 }
  0x5a   : > { %9064 = vst [vmem:[#allocation122_spill] sm:$0xff] %v4474_v61  ;;  %9066 = vst [vmem:[#allocation86_spill] sm:$0xff] %v4477_v1  ;;  %v9074_v35 = vld [vmem:[#allocation92_spill] sm:$0xff]  ;;  %v9076_v50 = vld [vmem:[#allocation93_spill] sm:$0xff] }
  0x5b   : > { %9068 = vst [vmem:[#allocation87_spill] sm:$0xff] %v4480_v2  ;;  %9070 = vst [vmem:[#allocation88_spill] sm:$0xff] %v4483_v29  ;;  %v4495_v58 = vadd.f32 %v453_v9, %v9074_v35  ;;  %v4498_v15 = vadd.f32 %v454_v26, %v9076_v50  ;;  %v9078_v62 = vld [vmem:[#allocation94_spill] sm:$0xff]  ;;  %v4519_v40 = vld [vmem:[%s3724_s3 + $0xdb] sm:$0xff] }
  0x5c   : > { %9071 = vst [vmem:[#allocation123_spill] sm:$0xff] %v4486_v12  ;;  %9072 = vst [vmem:[#allocation124_spill] sm:$0xff] %v4489_v57  ;;  %v4501_v55 = vadd.f32 %v455_v45, %v9078_v62  ;;  %v4507_v36 = vld [vmem:[%s3724_s3 + $0xab] sm:$0xff]  ;;  %v4522_v26 = vld [vmem:[%s3724_s3 + $0xe3] sm:$0xff] }
  0x5d   : > { %9073 = vst [vmem:[#allocation125_spill] sm:$0xff] %v4492_v30  ;;  %9075 = vst [vmem:[#allocation92_spill] sm:$0xff] %v4495_v58  ;;  %v4516_v9 = vld [vmem:[%s3724_s3 + $0xcb] sm:$0xff]  ;;  %v4531_v63 = vld [vmem:[%s3724_s3 + $0xf3] sm:$0xff] }
  0x5e   : > { %9077 = vst [vmem:[#allocation93_spill] sm:$0xff] %v4498_v15  ;;  %9079 = vst [vmem:[#allocation94_spill] sm:$0xff] %v4501_v55  ;;  %v9088_v45 = vld [vmem:[#allocation10_spill] sm:$0xff]  ;;  %v4534_v35 = vld [vmem:[%s3724_s3 + $0xfb] sm:$0xff] }
  0x5f   : > { %9081 = vst [vmem:[#allocation95_spill] sm:$0xff] %v4504_v24  ;;  %9082 = vst [vmem:[#allocation126_spill] sm:$0xff] %v4507_v36  ;;  %v525_v43 = vmul.f32 %v9088_v45, %v489_v59  ;;  %v526_v7 = vmul.f32 %v9088_v45, %v490_v13  ;;  %v527_v0 = vmul.f32 %v9088_v45, %v4423_v16  ;;  %v4537_v50 = vld [vmem:[%s3724_s3 + $0x10b] sm:$0xff]  ;;  %v4551_v16 = vld [vmem:[%s3724_s3 + $0x123] sm:$0xff] }
  0x60   : > { %9083 = vst [vmem:[#allocation127_spill] sm:$0xff] %v4510_v41  ;;  %9084 = vst [vmem:[#allocation128_spill] sm:$0xff] %v4513_v20  ;;  %v528_v44 = vmul.f32 %v9088_v45, %v4426_v34  ;;  %v529_v59 = vmul.f32 %v9088_v45, %v4441_v21  ;;  %v530_v13 = vmul.f32 %v9088_v45, %v4444_v60  ;;  %v4548_v34 = vld [vmem:[%s3724_s3 + $0x113] sm:$0xff]  ;;  %v4554_v4 = vld [vmem:[%s3724_s3 + $0x12b] sm:$0xff] }
  0x61   : > { %9085 = vst [vmem:[#allocation129_spill] sm:$0xff] %v4516_v9  ;;  %9086 = vst [vmem:[#allocation130_spill] sm:$0xff] %v4519_v40  ;;  %v531_v62 = vmul.f32 %v9088_v45, %v4447_v3  ;;  %v532_v42 = vmul.f32 %v9088_v45, %v4450_v47  ;;  %v533_v21 = vmul.f32 %v9088_v45, %v4465_v37  ;;  %v4565_v51 = vld [vmem:[%s3724_s3 + $0x13b] sm:$0xff]  ;;  %v4568_v24 = vld [vmem:[%s3724_s3 + $0x143] sm:$0xff] }
  0x62   : > { %9087 = vst [vmem:[#allocation131_spill] sm:$0xff] %v4522_v26  ;;  %9089 = vst [vmem:[#allocation10_spill] sm:$0xff] %v4531_v63  ;;  %v534_v60 = vmul.f32 %v9088_v45, %v4468_v14  ;;  %v535_v3 = vmul.f32 %v9088_v45, %v4471_v28  ;;  %v536_v47 = vmul.f32 %v9088_v45, %v4486_v12  ;;  %v4571_v55 = vld [vmem:[%s3724_s3 + $0x153] sm:$0xff]  ;;  %v4582_v58 = vld [vmem:[%s3724_s3 + $0x15b] sm:$0xff] }
  0x63   : > { %9090 = vst [vmem:[#allocation132_spill] sm:$0xff] %v4534_v35  ;;  %9091 = vst [vmem:[#allocation133_spill] sm:$0xff] %v4537_v50  ;;  %v537_v15 = vmul.f32 %v9088_v45, %v4489_v57  ;;  %v538_v37 = vmul.f32 %v9088_v45, %v4492_v30  ;;  %v539_v14 = vmul.f32 %v9088_v45, %v4507_v36  ;;  %v4585_v12 = vld [vmem:[%s3724_s3 + $0x16b] sm:$0xff]  ;;  %v4588_v29 = vld [vmem:[%s3724_s3 + $0x173] sm:$0xff] }
  0x64   : > { %9092 = vst [vmem:[#allocation134_spill] sm:$0xff] %v4548_v34  ;;  %9093 = vst [vmem:[#allocation135_spill] sm:$0xff] %v4551_v16  ;;  %v540_v28 = vmul.f32 %v9088_v45, %v4510_v41  ;;  %v541_v2 = vmul.f32 %v9088_v45, %v4513_v20  ;;  %v542_v57 = vmul.f32 %v9088_v45, %v4516_v9 }
  0x65   : > { %9094 = vst [vmem:[#allocation136_spill] sm:$0xff] %v4554_v4  ;;  %9095 = vst [vmem:[#allocation137_spill] sm:$0xff] %v4565_v51  ;;  %v543_v30 = vmul.f32 %v9088_v45, %v4519_v40  ;;  %v544_v36 = vmul.f32 %v9088_v45, %v4522_v26  ;;  %v545_v41 = vmul.f32 %v9088_v45, %v4531_v63 }
  0x66   : > { %9096 = vst [vmem:[#allocation138_spill] sm:$0xff] %v4568_v24  ;;  %9097 = vst [vmem:[#allocation139_spill] sm:$0xff] %v4571_v55  ;;  %v546_v1 = vmul.f32 %v9088_v45, %v4534_v35  ;;  %v547_v61 = vmul.f32 %v9088_v45, %v4537_v50  ;;  %v548_v20 = vmul.f32 %v9088_v45, %v4548_v34 }
  0x67   : > { %9098 = vst [vmem:[#allocation140_spill] sm:$0xff] %v4582_v58  ;;  %9099 = vst [vmem:[#allocation141_spill] sm:$0xff] %v4585_v12  ;;  %v549_v9 = vmul.f32 %v9088_v45, %v4551_v16  ;;  %v550_v40 = vmul.f32 %v9088_v45, %v4554_v4  ;;  %v551_v26 = vmul.f32 %v9088_v45, %v4565_v51 }
  0x68   : > { %9100 = vst [vmem:[#allocation142_spill] sm:$0xff] %v4588_v29  ;;  %v552_v63 = vmul.f32 %v9088_v45, %v4568_v24  ;;  %v553_v35 = vmul.f32 %v9088_v45, %v4571_v55  ;;  %v554_v50 = vmul.f32 %v9088_v45, %v4582_v58  ;;  %v555_v34 = vmul.f32 %v9088_v45, %v4585_v12  ;;  %v4815_v55 = vld [vmem:[%s3724_s3 + $0x13c] sm:$0xff] }
  0x69   : > { %v556_v16 = vmul.f32 %v9088_v45, %v4588_v29  ;;  %v4623_v4 = vadd.f32 %v525_v43, %v4373_v46  ;;  %v4626_v51 = vadd.f32 %v526_v7, %v4376_v38  ;;  %v4629_v24 = vadd.f32 %v527_v0, %v4379_v33  ;;  %v9124_v43 = vld [vmem:[#allocation92_spill] sm:$0xff]  ;;  %v9126_v7 = vld [vmem:[#allocation93_spill] sm:$0xff]  ;;  %v4804_v29 = vld [vmem:[%s3724_s3 + $0x12c] sm:$0xff]  ;;  %9145 = vst [vmem:[#allocation169_spill] sm:$0xff] %v4815_v55 }
  0x6a   : > { %v4632_v58 = vadd.f32 %v528_v44, %v4382_v8  ;;  %v4635_v12 = vadd.f32 %v529_v59, %v4385_v23  ;;  %v4638_v45 = vadd.f32 %v530_v13, %v4388_v11  ;;  %v4641_v46 = vadd.f32 %v531_v62, %v4391_v49  ;;  %v9130_v44 = vld [vmem:[#allocation95_spill] sm:$0xff]  ;;  %v4763_v62 = vld [vmem:[%s3724_s3 + $0xc4] sm:$0xff]  ;;  %9144 = vst [vmem:[#allocation168_spill] sm:$0xff] %v4804_v29 }
  0x6b   : > { %v4644_v38 = vadd.f32 %v532_v42, %v4394_v5  ;;  %v4647_v33 = vadd.f32 %v533_v21, %v4397_v25  ;;  %v4650_v8 = vadd.f32 %v534_v60, %v4400_v18  ;;  %v4653_v23 = vadd.f32 %v535_v3, %v4403_v31  ;;  %v589_v21 = vld [vmem:[%s3724_s3 + $0x4] sm:$0xff]  ;;  %v590_v31 = vld [vmem:[%s3724_s3 + $0xc] sm:$0xff]  ;;  %v4673_v60 = vld [vmem:[%s3724_s3 + $0x1c] sm:$0xff]  ;;  %9134 = vst [vmem:[#allocation160_spill] sm:$0xff] %v4763_v62 }
  0x6c   : > { %v4656_v11 = vadd.f32 %v536_v47, %v4406_v32  ;;  %v4659_v49 = vadd.f32 %v537_v15, %v4409_v48  ;;  %v4662_v5 = vadd.f32 %v538_v37, %v4412_v27  ;;  %v4665_v25 = vadd.f32 %v539_v14, %v4415_v56  ;;  %9101 = vst [vmem:[#allocation143_spill] sm:$0xff] %v4673_v60  ;;  %v4676_v32 = vld [vmem:[%s3724_s3 + $0x24] sm:$0xff]  ;;  %v4691_v3 = vld [vmem:[%s3724_s3 + $0x34] sm:$0xff]  ;;  %v4694_v47 = vld [vmem:[%s3724_s3 + $0x3c] sm:$0xff] }
  0x6d   : > { %v4668_v18 = vadd.f32 %v540_v28, %v4418_v39  ;;  %9102 = vst [vmem:[#allocation144_spill] sm:$0xff] %v4676_v32  ;;  %v4679_v48 = vadd.f32 %v541_v2, %v4429_v17  ;;  %v4682_v27 = vadd.f32 %v542_v57, %v4432_v19  ;;  %v4685_v56 = vadd.f32 %v543_v30, %v4435_v10  ;;  %v4697_v37 = vld [vmem:[%s3724_s3 + $0x4c] sm:$0xff]  ;;  %v4700_v17 = vld [vmem:[%s3724_s3 + $0x54] sm:$0xff]  ;;  %v4715_v28 = vld [vmem:[%s3724_s3 + $0x64] sm:$0xff] }
  0x6e   : > { %v4688_v39 = vadd.f32 %v544_v36, %v4438_v6  ;;  %9103 = vst [vmem:[#allocation145_spill] sm:$0xff] %v4691_v3  ;;  %9104 = vst [vmem:[#allocation146_spill] sm:$0xff] %v4694_v47  ;;  %v4703_v19 = vadd.f32 %v545_v41, %v4453_v52  ;;  %v4706_v10 = vadd.f32 %v546_v1, %v4456_v53  ;;  %v4718_v2 = vld [vmem:[%s3724_s3 + $0x6c] sm:$0xff]  ;;  %v4721_v57 = vld [vmem:[%s3724_s3 + $0x7c] sm:$0xff] }
  0x6f   : > { %9105 = vst [vmem:[#allocation147_spill] sm:$0xff] %v4697_v37  ;;  %9106 = vst [vmem:[#allocation148_spill] sm:$0xff] %v4700_v17  ;;  %v4709_v6 = vadd.f32 %v547_v61, %v4459_v54  ;;  %v4712_v14 = vadd.f32 %v548_v20, %v4462_v22  ;;  %v9113_v52 = vld [vmem:[#allocation122_spill] sm:$0xff]  ;;  %v9117_v61 = vld [vmem:[#allocation87_spill] sm:$0xff] }
  0x70   : > { %9107 = vst [vmem:[#allocation149_spill] sm:$0xff] %v4706_v10  ;;  %9110 = vst [vmem:[#allocation152_spill] sm:$0xff] %v4715_v28  ;;  %v4724_v53 = vadd.f32 %v549_v9, %v9113_v52  ;;  %v9115_v1 = vld [vmem:[#allocation86_spill] sm:$0xff]  ;;  %v4730_v22 = vadd.f32 %v551_v26, %v9117_v61  ;;  %v9119_v30 = vld [vmem:[#allocation88_spill] sm:$0xff]  ;;  %v4745_v9 = vadd.f32 %v553_v35, %v9124_v43 }
  0x71   : > { %9108 = vst [vmem:[#allocation150_spill] sm:$0xff] %v4709_v6  ;;  %9109 = vst [vmem:[#allocation151_spill] sm:$0xff] %v4712_v14  ;;  %v4727_v54 = vadd.f32 %v550_v40, %v9115_v1  ;;  %v4733_v15 = vadd.f32 %v552_v63, %v9119_v30  ;;  %v4736_v36 = vld [vmem:[%s3724_s3 + $0x84] sm:$0xff]  ;;  %v4739_v41 = vld [vmem:[%s3724_s3 + $0x94] sm:$0xff]  ;;  %v4748_v40 = vadd.f32 %v554_v50, %v9126_v7 }
  0x72   : > { %9111 = vst [vmem:[#allocation153_spill] sm:$0xff] %v4718_v2  ;;  %9112 = vst [vmem:[#allocation154_spill] sm:$0xff] %v4721_v57  ;;  %v4742_v20 = vld [vmem:[%s3724_s3 + $0x9c] sm:$0xff]  ;;  %v9128_v26 = vld [vmem:[#allocation94_spill] sm:$0xff]  ;;  %v4754_v63 = vadd.f32 %v556_v16, %v9130_v44 }
  0x73   : > { %9114 = vst [vmem:[#allocation122_spill] sm:$0xff] %v4724_v53  ;;  %9116 = vst [vmem:[#allocation86_spill] sm:$0xff] %v4727_v54  ;;  %v4751_v0 = vadd.f32 %v555_v34, %v9128_v26  ;;  %v4757_v59 = vld [vmem:[%s3724_s3 + $0xac] sm:$0xff]  ;;  %v4760_v13 = vld [vmem:[%s3724_s3 + $0xb4] sm:$0xff] }
  0x74   : > { %9118 = vst [vmem:[#allocation87_spill] sm:$0xff] %v4730_v22  ;;  %9120 = vst [vmem:[#allocation88_spill] sm:$0xff] %v4733_v15  ;;  %v4766_v35 = vld [vmem:[%s3724_s3 + $0xcc] sm:$0xff]  ;;  %v4769_v42 = vld [vmem:[%s3724_s3 + $0xdc] sm:$0xff] }
  0x75   : > { %9121 = vst [vmem:[#allocation155_spill] sm:$0xff] %v4736_v36  ;;  %9122 = vst [vmem:[#allocation156_spill] sm:$0xff] %v4739_v41  ;;  %v4772_v50 = vld [vmem:[%s3724_s3 + $0xe4] sm:$0xff]  ;;  %v9138_v34 = vld [vmem:[#allocation12_spill] sm:$0xff] }
  0x76   : > { %9123 = vst [vmem:[#allocation157_spill] sm:$0xff] %v4742_v20  ;;  %9125 = vst [vmem:[#allocation92_spill] sm:$0xff] %v4745_v9  ;;  %v625_v52 = vmul.f32 %v9138_v34, %v589_v21  ;;  %v626_v16 = vmul.f32 %v9138_v34, %v590_v31  ;;  %v627_v1 = vmul.f32 %v9138_v34, %v4673_v60  ;;  %v4781_v30 = vld [vmem:[%s3724_s3 + $0xf4] sm:$0xff]  ;;  %v4784_v43 = vld [vmem:[%s3724_s3 + $0xfc] sm:$0xff] }
  0x77   : > { %9127 = vst [vmem:[#allocation93_spill] sm:$0xff] %v4748_v40  ;;  %9129 = vst [vmem:[#allocation94_spill] sm:$0xff] %v4751_v0  ;;  %v628_v61 = vmul.f32 %v9138_v34, %v4676_v32  ;;  %v4787_v7 = vld [vmem:[%s3724_s3 + $0x10c] sm:$0xff]  ;;  %v629_v21 = vmul.f32 %v9138_v34, %v4691_v3  ;;  %v630_v31 = vmul.f32 %v9138_v34, %v4694_v47  ;;  %v4798_v32 = vld [vmem:[%s3724_s3 + $0x114] sm:$0xff] }
  0x78   : > { %9131 = vst [vmem:[#allocation95_spill] sm:$0xff] %v4754_v63  ;;  %9132 = vst [vmem:[#allocation158_spill] sm:$0xff] %v4757_v59  ;;  %v631_v26 = vmul.f32 %v9138_v34, %v4697_v37  ;;  %v632_v44 = vmul.f32 %v9138_v34, %v4700_v17  ;;  %v4801_v60 = vld [vmem:[%s3724_s3 + $0x124] sm:$0xff]  ;;  %v633_v3 = vmul.f32 %v9138_v34, %v4715_v28  ;;  %v4821_v0 = vld [vmem:[%s3724_s3 + $0x154] sm:$0xff] }
  0x79   : > { %9133 = vst [vmem:[#allocation159_spill] sm:$0xff] %v4760_v13  ;;  %9135 = vst [vmem:[#allocation161_spill] sm:$0xff] %v4766_v35  ;;  %v634_v47 = vmul.f32 %v9138_v34, %v4718_v2  ;;  %v635_v37 = vmul.f32 %v9138_v34, %v4721_v57  ;;  %v636_v17 = vmul.f32 %v9138_v34, %v4736_v36  ;;  %v4818_v63 = vld [vmem:[%s3724_s3 + $0x144] sm:$0xff]  ;;  %v4832_v9 = vld [vmem:[%s3724_s3 + $0x15c] sm:$0xff] }
  0x7a   : > { %9136 = vst [vmem:[#allocation162_spill] sm:$0xff] %v4769_v42  ;;  %9137 = vst [vmem:[#allocation163_spill] sm:$0xff] %v4772_v50  ;;  %v637_v40 = vmul.f32 %v9138_v34, %v4739_v41  ;;  %v638_v28 = vmul.f32 %v9138_v34, %v4742_v20  ;;  %v639_v2 = vmul.f32 %v9138_v34, %v4757_v59  ;;  %v4835_v36 = vld [vmem:[%s3724_s3 + $0x16c] sm:$0xff]  ;;  %v4838_v15 = vld [vmem:[%s3724_s3 + $0x174] sm:$0xff] }
  0x7b   : > { %9139 = vst [vmem:[#allocation12_spill] sm:$0xff] %v4781_v30  ;;  %9140 = vst [vmem:[#allocation164_spill] sm:$0xff] %v4784_v43  ;;  %v640_v57 = vmul.f32 %v9138_v34, %v4760_v13  ;;  %v641_v22 = vmul.f32 %v9138_v34, %v4763_v62  ;;  %v642_v41 = vmul.f32 %v9138_v34, %v4766_v35 }
  0x7c   : > { %9141 = vst [vmem:[#allocation165_spill] sm:$0xff] %v4787_v7  ;;  %9142 = vst [vmem:[#allocation166_spill] sm:$0xff] %v4798_v32  ;;  %v643_v20 = vmul.f32 %v9138_v34, %v4769_v42  ;;  %v644_v59 = vmul.f32 %v9138_v34, %v4772_v50  ;;  %v645_v13 = vmul.f32 %v9138_v34, %v4781_v30 }
  0x7d   : > { %9143 = vst [vmem:[#allocation167_spill] sm:$0xff] %v4801_v60  ;;  %9146 = vst [vmem:[#allocation170_spill] sm:$0xff] %v4818_v63  ;;  %v646_v54 = vmul.f32 %v9138_v34, %v4784_v43  ;;  %v647_v53 = vmul.f32 %v9138_v34, %v4787_v7  ;;  %v648_v62 = vmul.f32 %v9138_v34, %v4798_v32 }
  0x7e   : > { %9147 = vst [vmem:[#allocation171_spill] sm:$0xff] %v4821_v0  ;;  %9148 = vst [vmem:[#allocation172_spill] sm:$0xff] %v4832_v9  ;;  %v649_v35 = vmul.f32 %v9138_v34, %v4801_v60  ;;  %v650_v42 = vmul.f32 %v9138_v34, %v4804_v29  ;;  %v651_v50 = vmul.f32 %v9138_v34, %v4815_v55 }
  0x7f   : > { %9149 = vst [vmem:[#allocation173_spill] sm:$0xff] %v4835_v36  ;;  %9150 = vst [vmem:[#allocation174_spill] sm:$0xff] %v4838_v15  ;;  %v652_v30 = vmul.f32 %v9138_v34, %v4818_v63  ;;  %v653_v43 = vmul.f32 %v9138_v34, %v4821_v0  ;;  %v654_v7 = vmul.f32 %v9138_v34, %v4832_v9 }
  0x80   : > { %v655_v32 = vmul.f32 %v9138_v34, %v4835_v36  ;;  %v656_v60 = vmul.f32 %v9138_v34, %v4838_v15  ;;  %v657_v29 = vadd.f32 %v625_v52, %v4623_v4  ;;  %v658_v14 = vadd.f32 %v626_v16, %v4626_v51  ;;  %v9165_v52 = vld [vmem:[#allocation22_spill] sm:$0xff]  ;;  %v9188_v15 = vld [vmem:[#allocation20_spill] sm:$0xff] }
  0x81   : > { %v659_v55 = vadd.f32 %v627_v1, %v4629_v24  ;;  %v660_v63 = vadd.f32 %v628_v61, %v4632_v58  ;;  %v661_v6 = vadd.f32 %v629_v21, %v4635_v12  ;;  %v662_v0 = vadd.f32 %v630_v31, %v4638_v45  ;;  %v4913_v1 = vld [vmem:[%s3724_s3 + $0x180] sm:$0xff]  ;;  %v4916_v61 = vld [vmem:[%s3724_s3 + $0x188] sm:$0xff] }
  0x82   : > { %v663_v9 = vadd.f32 %v631_v26, %v4641_v46  ;;  %v664_v10 = vadd.f32 %v632_v44, %v4644_v38  ;;  %v665_v36 = vadd.f32 %v633_v3, %v4647_v33  ;;  %v666_v34 = vadd.f32 %v634_v47, %v4650_v8  ;;  %v9151_v3 = vld [vmem:[#allocation149_spill] sm:$0xff]  ;;  %v9153_v47 = vld [vmem:[#allocation151_spill] sm:$0xff]  ;;  %v9173_v44 = vld [vmem:[#allocation30_spill] sm:$0xff] }
  0x83   : > { %v667_v4 = vadd.f32 %v635_v37, %v4653_v23  ;;  %v668_v51 = vadd.f32 %v636_v17, %v4656_v11  ;;  %v669_v24 = vadd.f32 %v637_v40, %v4659_v49  ;;  %v670_v58 = vadd.f32 %v638_v28, %v4662_v5  ;;  %v9152_v49 = vld [vmem:[#allocation150_spill] sm:$0xff]  ;;  %v9156_v28 = vld [vmem:[#allocation87_spill] sm:$0xff]  ;;  %9167 = vst [vmem:[#allocation149_spill] sm:$0xff] %v4913_v1  ;;  %v9172_v31 = vld [vmem:[#allocation29_spill] sm:$0xff] }
  0x84   : > { %v671_v12 = vadd.f32 %v639_v2, %v4665_v25  ;;  %v672_v45 = vadd.f32 %v640_v57, %v4668_v18  ;;  %v673_v46 = vadd.f32 %v641_v22, %v4679_v48  ;;  %v674_v38 = vadd.f32 %v642_v41, %v4682_v27  ;;  %v9154_v37 = vld [vmem:[#allocation122_spill] sm:$0xff]  ;;  %v9157_v2 = vld [vmem:[#allocation88_spill] sm:$0xff]  ;;  %v9159_v22 = vld [vmem:[#allocation93_spill] sm:$0xff]  ;;  %9168 = vst [vmem:[#allocation150_spill] sm:$0xff] %v4916_v61 }
  0x85   : > { %v675_v33 = vadd.f32 %v643_v20, %v4685_v56  ;;  %v676_v8 = vadd.f32 %v644_v59, %v4688_v39  ;;  %v677_v23 = vadd.f32 %v645_v13, %v4703_v19  ;;  %v678_v11 = vadd.f32 %v646_v54, %v9151_v3  ;;  %v9155_v17 = vld [vmem:[#allocation86_spill] sm:$0xff]  ;;  %v9158_v57 = vld [vmem:[#allocation92_spill] sm:$0xff]  ;;  %v9161_v54 = vld [vmem:[#allocation95_spill] sm:$0xff] }
  0x86   : > { %v679_v5 = vadd.f32 %v647_v53, %v9152_v49  ;;  %v680_v25 = vadd.f32 %v648_v62, %v9153_v47  ;;  %v681_v18 = vadd.f32 %v649_v35, %v9154_v37  ;;  %v682_v48 = vadd.f32 %v650_v42, %v9155_v17  ;;  %v9160_v41 = vld [vmem:[#allocation94_spill] sm:$0xff]  ;;  %v9162_v59 = vld [vmem:[#allocation19_spill] sm:$0xff]  ;;  %v9164_v62 = vld [vmem:[#allocation21_spill] sm:$0xff] }
  0x87   : > { %v683_v27 = vadd.f32 %v651_v50, %v9156_v28  ;;  %v684_v56 = vadd.f32 %v652_v30, %v9157_v2  ;;  %v685_v39 = vadd.f32 %v653_v43, %v9158_v57  ;;  %v686_v19 = vadd.f32 %v654_v7, %v9159_v22  ;;  %v9163_v53 = vld [vmem:[#allocation11_spill] sm:$0xff]  ;;  %v9169_v30 = vld [vmem:[#allocation25_spill] sm:$0xff]  ;;  %v9176_v28 = vld [vmem:[#allocation34_spill] sm:$0xff] }
  0x88   : > { %v687_v20 = vadd.f32 %v655_v32, %v9160_v41  ;;  %v688_v40 = vadd.f32 %v656_v60, %v9161_v54  ;;  %v738_v13 = vmul.f32 %v9163_v53, %v9162_v59  ;;  %v739_v35 = vmul.f32 %v9163_v53, %v9164_v62  ;;  %v9166_v50 = vld [vmem:[#allocation23_spill] sm:$0xff]  ;;  %v9170_v60 = vld [vmem:[#allocation26_spill] sm:$0xff]  ;;  %v9175_v37 = vld [vmem:[#allocation33_spill] sm:$0xff] }
  0x89   : > { %v740_v42 = vmul.f32 %v9163_v53, %v9165_v52  ;;  %v741_v16 = vmul.f32 %v9163_v53, %v9166_v50  ;;  %v742_v32 = vmul.f32 %v9163_v53, %v9169_v30  ;;  %v743_v43 = vmul.f32 %v9163_v53, %v9170_v60  ;;  %v9171_v7 = vld [vmem:[#allocation27_spill] sm:$0xff]  ;;  %v9178_v41 = vld [vmem:[#allocation37_spill] sm:$0xff]  ;;  %v9179_v59 = vld [vmem:[#allocation38_spill] sm:$0xff] }
  0x8a   : > { %v744_v21 = vmul.f32 %v9163_v53, %v9171_v7  ;;  %v745_v26 = vmul.f32 %v9163_v53, %v9172_v31  ;;  %v746_v3 = vmul.f32 %v9163_v53, %v9173_v44  ;;  %v9174_v49 = vld [vmem:[#allocation31_spill] sm:$0xff]  ;;  %v748_v17 = vmul.f32 %v9163_v53, %v9175_v37  ;;  %v9181_v30 = vld [vmem:[#allocation41_spill] sm:$0xff]  ;;  %v9182_v7 = vld [vmem:[#allocation42_spill] sm:$0xff] }
  0x8b   : > { %v747_v47 = vmul.f32 %v9163_v53, %v9174_v49  ;;  %v749_v2 = vmul.f32 %v9163_v53, %v9176_v28  ;;  %v9177_v57 = vld [vmem:[#allocation35_spill] sm:$0xff]  ;;  %v751_v54 = vmul.f32 %v9163_v53, %v9178_v41  ;;  %v752_v62 = vmul.f32 %v9163_v53, %v9179_v59  ;;  %v9183_v37 = vld [vmem:[#allocation16_spill] sm:$0xff]  ;;  %v9187_v59 = vld [vmem:[#allocation18_spill] sm:$0xff] }
  0x8c   : > { %v750_v22 = vmul.f32 %v9163_v53, %v9177_v57  ;;  %v9180_v52 = vld [vmem:[#allocation39_spill] sm:$0xff]  ;;  %v754_v60 = vmul.f32 %v9163_v53, %v9181_v30  ;;  %v755_v31 = vmul.f32 %v9163_v53, %v9182_v7  ;;  %v756_v44 = vmul.f32 %v4913_v1, %v9163_v53  ;;  %v9185_v57 = vld [vmem:[#allocation17_spill] sm:$0xff]  ;;  %v9189_v7 = vld [vmem:[#allocation24_spill] sm:$0xff] }
  0x8d   : > { %v753_v50 = vmul.f32 %v9163_v53, %v9180_v52  ;;  %v757_v49 = vmul.f32 %v4916_v61, %v9163_v53  ;;  %v4951_v28 = vadd.f32 %v9183_v37, %v657_v29  ;;  %v4954_v41 = vadd.f32 %v9185_v57, %v658_v14  ;;  %v9190_v53 = vld [vmem:[#allocation28_spill] sm:$0xff] }
  0x8e   : > { %v4957_v52 = vadd.f32 %v9187_v59, %v659_v55  ;;  %v4960_v30 = vadd.f32 %v9188_v15, %v660_v63  ;;  %v4963_v1 = vadd.f32 %v9189_v7, %v661_v6  ;;  %v4966_v61 = vadd.f32 %v9190_v53, %v662_v0  ;;  %v9191_v29 = vld [vmem:[#allocation32_spill] sm:$0xff]  ;;  %v9194_v55 = vld [vmem:[#allocation43_spill] sm:$0xff]  ;;  %v9195_v15 = vld [vmem:[#allocation46_spill] sm:$0xff] }
  0x8f   : > { %9184 = vst [vmem:[#allocation151_spill] sm:$0xff] %v4951_v28  ;;  %9186 = vst [vmem:[#allocation122_spill] sm:$0xff] %v4954_v41  ;;  %v4969_v37 = vadd.f32 %v9191_v29, %v663_v9  ;;  %v9192_v28 = vld [vmem:[#allocation36_spill] sm:$0xff]  ;;  %v4978_v59 = vadd.f32 %v9194_v55, %v666_v34  ;;  %v4981_v63 = vadd.f32 %v9195_v15, %v667_v4  ;;  %v9196_v6 = vld [vmem:[#allocation50_spill] sm:$0xff] }
  0x90   : > { %v4972_v14 = vadd.f32 %v9192_v28, %v664_v10  ;;  %v9193_v57 = vld [vmem:[#allocation40_spill] sm:$0xff]  ;;  %v4984_v7 = vadd.f32 %v9196_v6, %v668_v51  ;;  %v4986_v0 = vadd.f32 %v738_v13, %v669_v24  ;;  %v4988_v53 = vadd.f32 %v739_v35, %v670_v58  ;;  %v9206_v13 = vld [vmem:[#allocation13_spill] sm:$0xff] }
  0x91   : > { %v4975_v41 = vadd.f32 %v9193_v57, %v665_v36  ;;  %v4990_v9 = vadd.f32 %v740_v42, %v671_v12  ;;  %v4992_v10 = vadd.f32 %v741_v16, %v672_v45  ;;  %v4994_v28 = vadd.f32 %v742_v32, %v673_v46  ;;  %v9207_v35 = vld [vmem:[#allocation45_spill] sm:$0xff]  ;;  %v9211_v42 = vld [vmem:[#allocation51_spill] sm:$0xff]  ;;  %v9212_v16 = vld [vmem:[#allocation52_spill] sm:$0xff] }
  0x92   : > { %v4996_v36 = vadd.f32 %v743_v43, %v674_v38  ;;  %v4998_v34 = vadd.f32 %v744_v21, %v675_v33  ;;  %v5000_v29 = vadd.f32 %v745_v26, %v676_v8  ;;  %v5002_v4 = vadd.f32 %v746_v3, %v677_v23  ;;  %v9213_v43 = vld [vmem:[#allocation53_spill] sm:$0xff]  ;;  %v9214_v26 = vld [vmem:[#allocation54_spill] sm:$0xff] }
  0x93   : > { %v5004_v51 = vadd.f32 %v747_v47, %v678_v11  ;;  %v5006_v24 = vadd.f32 %v748_v17, %v679_v5  ;;  %v5008_v58 = vadd.f32 %v749_v2, %v680_v25  ;;  %v5010_v12 = vadd.f32 %v750_v22, %v681_v18  ;;  %v9205_v5 = vld [vmem:[#allocation44_spill] sm:$0xff]  ;;  %v9215_v47 = vld [vmem:[#allocation55_spill] sm:$0xff]  ;;  %v9221_v55 = vld [vmem:[#allocation61_spill] sm:$0xff] }
  0x94   : > { %v5012_v45 = vadd.f32 %v751_v54, %v682_v48  ;;  %v5014_v46 = vadd.f32 %v752_v62, %v683_v27  ;;  %v5016_v38 = vadd.f32 %v753_v50, %v684_v56  ;;  %v5018_v33 = vadd.f32 %v754_v60, %v685_v39  ;;  %v9208_v48 = vld [vmem:[#allocation47_spill] sm:$0xff]  ;;  %v9209_v56 = vld [vmem:[#allocation48_spill] sm:$0xff]  ;;  %v9217_v54 = vld [vmem:[#allocation57_spill] sm:$0xff] }
  0x95   : > { %9197 = vst [vmem:[#allocation86_spill] sm:$0xff] %v5010_v12  ;;  %v5020_v8 = vadd.f32 %v755_v31, %v686_v19  ;;  %v5022_v23 = vadd.f32 %v756_v44, %v687_v20  ;;  %v5024_v11 = vadd.f32 %v757_v49, %v688_v40  ;;  %v826_v25 = vmul.f32 %v9206_v13, %v9205_v5  ;;  %v9210_v19 = vld [vmem:[#allocation49_spill] sm:$0xff]  ;;  %v9216_v2 = vld [vmem:[#allocation56_spill] sm:$0xff]  ;;  %v9218_v50 = vld [vmem:[#allocation58_spill] sm:$0xff] }
  0x96   : > { %9198 = vst [vmem:[#allocation87_spill] sm:$0xff] %v5012_v45  ;;  %9199 = vst [vmem:[#allocation88_spill] sm:$0xff] %v5014_v46  ;;  %v827_v18 = vmul.f32 %v9206_v13, %v9207_v35  ;;  %v828_v27 = vmul.f32 %v9206_v13, %v9208_v48  ;;  %v829_v39 = vmul.f32 %v9206_v13, %v9209_v56  ;;  %v9219_v31 = vld [vmem:[#allocation59_spill] sm:$0xff]  ;;  %v9220_v49 = vld [vmem:[#allocation60_spill] sm:$0xff] }
  0x97   : > { %9200 = vst [vmem:[#allocation92_spill] sm:$0xff] %v5016_v38  ;;  %9201 = vst [vmem:[#allocation93_spill] sm:$0xff] %v5018_v33  ;;  %v830_v20 = vmul.f32 %v9206_v13, %v9210_v19  ;;  %v831_v40 = vmul.f32 %v9206_v13, %v9211_v42  ;;  %v832_v32 = vmul.f32 %v9206_v13, %v9212_v16  ;;  %v5059_v6 = vld [vmem:[%s3724_s3 + $0x181] sm:$0xff]  ;;  %v5062_v5 = vld [vmem:[%s3724_s3 + $0x189] sm:$0xff] }
  0x98   : > { %9202 = vst [vmem:[#allocation94_spill] sm:$0xff] %v5020_v8  ;;  %9203 = vst [vmem:[#allocation95_spill] sm:$0xff] %v5022_v23  ;;  %v833_v21 = vmul.f32 %v9206_v13, %v9213_v43  ;;  %v834_v3 = vmul.f32 %v9206_v13, %v9214_v26  ;;  %v835_v17 = vmul.f32 %v9206_v13, %v9215_v47  ;;  %v9224_v35 = vld [vmem:[#allocation62_spill] sm:$0xff]  ;;  %v9225_v56 = vld [vmem:[#allocation63_spill] sm:$0xff] }
  0x99   : > { %9204 = vst [vmem:[#allocation19_spill] sm:$0xff] %v5024_v11  ;;  %v836_v22 = vmul.f32 %v9206_v13, %v9216_v2  ;;  %v837_v62 = vmul.f32 %v9206_v13, %v9217_v54  ;;  %v838_v60 = vmul.f32 %v9206_v13, %v9218_v50  ;;  %v839_v44 = vmul.f32 %v9206_v13, %v9219_v31  ;;  %v9226_v42 = vld [vmem:[#allocation64_spill] sm:$0xff]  ;;  %v9227_v43 = vld [vmem:[#allocation65_spill] sm:$0xff]  ;;  %v9228_v47 = vld [vmem:[#allocation66_spill] sm:$0xff] }
  0x9a   : > { %v840_v57 = vmul.f32 %v9206_v13, %v9220_v49  ;;  %v841_v15 = vmul.f32 %v9206_v13, %v9221_v55  ;;  %9222 = vst [vmem:[#allocation11_spill] sm:$0xff] %v5059_v6  ;;  %9223 = vst [vmem:[#allocation21_spill] sm:$0xff] %v5062_v5  ;;  %v842_v48 = vmul.f32 %v9206_v13, %v9224_v35  ;;  %v9229_v54 = vld [vmem:[#allocation67_spill] sm:$0xff]  ;;  %v9230_v31 = vld [vmem:[#allocation68_spill] sm:$0xff] }
  0x9b   : > { %v843_v19 = vmul.f32 %v9206_v13, %v9225_v56  ;;  %v844_v16 = vmul.f32 %v9206_v13, %v9226_v42  ;;  %v845_v26 = vmul.f32 %v9206_v13, %v9227_v43  ;;  %v846_v2 = vmul.f32 %v9206_v13, %v9228_v47  ;;  %v9231_v55 = vld [vmem:[#allocation69_spill] sm:$0xff]  ;;  %v9232_v11 = vld [vmem:[#allocation70_spill] sm:$0xff]  ;;  %v9233_v23 = vld [vmem:[#allocation71_spill] sm:$0xff] }
  0x9c   : > { %v847_v50 = vmul.f32 %v9206_v13, %v9229_v54  ;;  %v848_v49 = vmul.f32 %v9206_v13, %v9230_v31  ;;  %v849_v35 = vmul.f32 %v9206_v13, %v9231_v55  ;;  %v850_v56 = vmul.f32 %v9206_v13, %v9232_v11  ;;  %v9234_v8 = vld [vmem:[#allocation73_spill] sm:$0xff]  ;;  %v9235_v33 = vld [vmem:[#allocation74_spill] sm:$0xff]  ;;  %v9236_v38 = vld [vmem:[#allocation75_spill] sm:$0xff] }
  0x9d   : > { %v851_v42 = vmul.f32 %v9206_v13, %v9233_v23  ;;  %v852_v43 = vmul.f32 %v9206_v13, %v9234_v8  ;;  %v853_v47 = vmul.f32 %v9206_v13, %v9235_v33  ;;  %v854_v54 = vmul.f32 %v9206_v13, %v9236_v38  ;;  %v9237_v46 = vld [vmem:[#allocation76_spill] sm:$0xff]  ;;  %v9238_v45 = vld [vmem:[#allocation151_spill] sm:$0xff]  ;;  %v9239_v12 = vld [vmem:[#allocation122_spill] sm:$0xff] }
  0x9e   : > { %v855_v31 = vmul.f32 %v9206_v13, %v9237_v46  ;;  %v856_v55 = vmul.f32 %v5059_v6, %v9206_v13  ;;  %v857_v11 = vmul.f32 %v5062_v5, %v9206_v13  ;;  %v5097_v23 = vadd.f32 %v826_v25, %v9238_v45  ;;  %v9281_v5 = vld [vmem:[#allocation106_spill] sm:$0xff] }
  0x9f   : > { %v5100_v8 = vadd.f32 %v827_v18, %v9239_v12  ;;  %v5103_v33 = vadd.f32 %v828_v27, %v4957_v52  ;;  %v5106_v38 = vadd.f32 %v829_v39, %v4960_v30  ;;  %v5109_v46 = vadd.f32 %v830_v20, %v4963_v1 }
  0xa0   : > { %v5112_v6 = vadd.f32 %v831_v40, %v4966_v61  ;;  %v5115_v13 = vadd.f32 %v832_v32, %v4969_v37  ;;  %v5118_v45 = vadd.f32 %v833_v21, %v4972_v14  ;;  %v5121_v12 = vadd.f32 %v834_v3, %v4975_v41  ;;  %v9254_v21 = vld [vmem:[#allocation19_spill] sm:$0xff] }
  0xa1   : > { %v5124_v52 = vadd.f32 %v835_v17, %v4978_v59  ;;  %v5127_v30 = vadd.f32 %v836_v22, %v4981_v63  ;;  %v5130_v1 = vadd.f32 %v837_v62, %v4984_v7  ;;  %v5133_v61 = vadd.f32 %v838_v60, %v4986_v0  ;;  %v9256_v17 = vld [vmem:[#allocation77_spill] sm:$0xff]  ;;  %v9257_v22 = vld [vmem:[#allocation14_spill] sm:$0xff] }
  0xa2   : > { %v5136_v37 = vadd.f32 %v839_v44, %v4988_v53  ;;  %v5139_v14 = vadd.f32 %v840_v57, %v4990_v9  ;;  %v5142_v41 = vadd.f32 %v841_v15, %v4992_v10  ;;  %v5145_v59 = vadd.f32 %v842_v48, %v4994_v28  ;;  %v9258_v60 = vld [vmem:[#allocation78_spill] sm:$0xff]  ;;  %v9259_v57 = vld [vmem:[#allocation79_spill] sm:$0xff]  ;;  %v9260_v48 = vld [vmem:[#allocation80_spill] sm:$0xff] }
  0xa3   : > { %v5148_v63 = vadd.f32 %v843_v19, %v4996_v36  ;;  %v5151_v7 = vadd.f32 %v844_v16, %v4998_v34  ;;  %v5154_v0 = vadd.f32 %v845_v26, %v5000_v29  ;;  %v5157_v53 = vadd.f32 %v846_v2, %v5002_v4  ;;  %v9240_v36 = vld [vmem:[#allocation86_spill] sm:$0xff]  ;;  %v9242_v34 = vld [vmem:[#allocation87_spill] sm:$0xff]  ;;  %v9244_v29 = vld [vmem:[#allocation88_spill] sm:$0xff] }
  0xa4   : > { %v5160_v9 = vadd.f32 %v847_v50, %v5004_v51  ;;  %v5163_v10 = vadd.f32 %v848_v49, %v5006_v24  ;;  %v5166_v28 = vadd.f32 %v849_v35, %v5008_v58  ;;  %v5169_v25 = vadd.f32 %v850_v56, %v9240_v36  ;;  %v9246_v4 = vld [vmem:[#allocation92_spill] sm:$0xff]  ;;  %v9248_v51 = vld [vmem:[#allocation93_spill] sm:$0xff]  ;;  %v9250_v24 = vld [vmem:[#allocation94_spill] sm:$0xff] }
  0xa5   : > { %v5172_v18 = vadd.f32 %v851_v42, %v9242_v34  ;;  %v5175_v27 = vadd.f32 %v852_v43, %v9244_v29  ;;  %v5178_v39 = vadd.f32 %v853_v47, %v9246_v4  ;;  %v5181_v20 = vadd.f32 %v854_v54, %v9248_v51  ;;  %v9252_v58 = vld [vmem:[#allocation95_spill] sm:$0xff]  ;;  %v9261_v16 = vld [vmem:[#allocation81_spill] sm:$0xff]  ;;  %v9262_v2 = vld [vmem:[#allocation82_spill] sm:$0xff] }
  0xa6   : > { %9241 = vst [vmem:[#allocation22_spill] sm:$0xff] %v5169_v25  ;;  %v5184_v40 = vadd.f32 %v855_v31, %v9250_v24  ;;  %v5187_v32 = vadd.f32 %v856_v55, %v9252_v58  ;;  %v5190_v3 = vadd.f32 %v857_v11, %v9254_v21  ;;  %v926_v62 = vmul.f32 %v9257_v22, %v9256_v17  ;;  %v9263_v49 = vld [vmem:[#allocation83_spill] sm:$0xff]  ;;  %v9264_v56 = vld [vmem:[#allocation84_spill] sm:$0xff]  ;;  %v9265_v43 = vld [vmem:[#allocation85_spill] sm:$0xff] }
  0xa7   : > { %9243 = vst [vmem:[#allocation23_spill] sm:$0xff] %v5172_v18  ;;  %9245 = vst [vmem:[#allocation25_spill] sm:$0xff] %v5175_v27  ;;  %v927_v44 = vmul.f32 %v9257_v22, %v9258_v60  ;;  %v928_v15 = vmul.f32 %v9257_v22, %v9259_v57  ;;  %v929_v19 = vmul.f32 %v9257_v22, %v9260_v48  ;;  %v9266_v54 = vld [vmem:[#allocation89_spill] sm:$0xff]  ;;  %v9267_v55 = vld [vmem:[#allocation90_spill] sm:$0xff] }
  0xa8   : > { %9247 = vst [vmem:[#allocation26_spill] sm:$0xff] %v5178_v39  ;;  %9249 = vst [vmem:[#allocation27_spill] sm:$0xff] %v5181_v20  ;;  %v930_v26 = vmul.f32 %v9257_v22, %v9261_v16  ;;  %v931_v50 = vmul.f32 %v9257_v22, %v9262_v2  ;;  %v932_v35 = vmul.f32 %v9257_v22, %v9263_v49  ;;  %v9268_v36 = vld [vmem:[#allocation91_spill] sm:$0xff]  ;;  %v9269_v29 = vld [vmem:[#allocation96_spill] sm:$0xff] }
  0xa9   : > { %9251 = vst [vmem:[#allocation29_spill] sm:$0xff] %v5184_v40  ;;  %9253 = vst [vmem:[#allocation30_spill] sm:$0xff] %v5187_v32  ;;  %v933_v42 = vmul.f32 %v9257_v22, %v9264_v56  ;;  %v934_v47 = vmul.f32 %v9257_v22, %v9265_v43  ;;  %v935_v31 = vmul.f32 %v9257_v22, %v9266_v54  ;;  %v9270_v51 = vld [vmem:[#allocation97_spill] sm:$0xff]  ;;  %v9271_v58 = vld [vmem:[#allocation98_spill] sm:$0xff] }
  0xaa   : > { %9255 = vst [vmem:[#allocation31_spill] sm:$0xff] %v5190_v3  ;;  %v936_v11 = vmul.f32 %v9257_v22, %v9267_v55  ;;  %v937_v34 = vmul.f32 %v9257_v22, %v9268_v36  ;;  %v938_v4 = vmul.f32 %v9257_v22, %v9269_v29  ;;  %v939_v24 = vmul.f32 %v9257_v22, %v9270_v51  ;;  %v9272_v17 = vld [vmem:[#allocation99_spill] sm:$0xff]  ;;  %v5225_v57 = vld [vmem:[%s3724_s3 + $0x182] sm:$0xff]  ;;  %v9275_v16 = vld [vmem:[#allocation100_spill] sm:$0xff] }
  0xab   : > { %v940_v21 = vmul.f32 %v9257_v22, %v9271_v58  ;;  %v941_v60 = vmul.f32 %v9257_v22, %v9272_v17  ;;  %9273 = vst [vmem:[#allocation33_spill] sm:$0xff] %v5225_v57  ;;  %v5228_v48 = vld [vmem:[%s3724_s3 + $0x18a] sm:$0xff]  ;;  %v942_v2 = vmul.f32 %v9257_v22, %v9275_v16  ;;  %v9276_v49 = vld [vmem:[#allocation101_spill] sm:$0xff]  ;;  %v9279_v29 = vld [vmem:[#allocation104_spill] sm:$0xff]  ;;  %v948_v3 = vmul.f32 %v9257_v22, %v9281_v5 }
  0xac   : > { %9274 = vst [vmem:[#allocation34_spill] sm:$0xff] %v5228_v48  ;;  %v943_v56 = vmul.f32 %v9257_v22, %v9276_v49  ;;  %v9277_v43 = vld [vmem:[#allocation102_spill] sm:$0xff]  ;;  %v9278_v55 = vld [vmem:[#allocation103_spill] sm:$0xff]  ;;  %v946_v51 = vmul.f32 %v9257_v22, %v9279_v29  ;;  %v9280_v58 = vld [vmem:[#allocation105_spill] sm:$0xff] }
  0xad   : > { %v944_v54 = vmul.f32 %v9257_v22, %v9277_v43  ;;  %v945_v36 = vmul.f32 %v9257_v22, %v9278_v55  ;;  %v947_v17 = vmul.f32 %v9257_v22, %v9280_v58  ;;  %v9282_v32 = vld [vmem:[#allocation107_spill] sm:$0xff]  ;;  %v9283_v40 = vld [vmem:[#allocation108_spill] sm:$0xff]  ;;  %v9284_v20 = vld [vmem:[#allocation109_spill] sm:$0xff] }
  0xae   : > { %v949_v16 = vmul.f32 %v9257_v22, %v9282_v32  ;;  %v950_v49 = vmul.f32 %v9257_v22, %v9283_v40  ;;  %v951_v43 = vmul.f32 %v9257_v22, %v9284_v20  ;;  %v9285_v39 = vld [vmem:[#allocation110_spill] sm:$0xff]  ;;  %v9286_v27 = vld [vmem:[#allocation111_spill] sm:$0xff]  ;;  %v9287_v18 = vld [vmem:[#allocation112_spill] sm:$0xff]  ;;  %v956_v32 = vmul.f32 %v5225_v57, %v9257_v22 }
  0xaf   : > { %v952_v55 = vmul.f32 %v9257_v22, %v9285_v39  ;;  %v953_v29 = vmul.f32 %v9257_v22, %v9286_v27  ;;  %v954_v58 = vmul.f32 %v9257_v22, %v9287_v18  ;;  %v9288_v25 = vld [vmem:[#allocation113_spill] sm:$0xff]  ;;  %v957_v40 = vmul.f32 %v5228_v48, %v9257_v22  ;;  %v9330_v48 = vld [vmem:[#allocation135_spill] sm:$0xff] }
  0xb0   : > { %v955_v5 = vmul.f32 %v9257_v22, %v9288_v25  ;;  %v5263_v20 = vadd.f32 %v926_v62, %v5097_v23  ;;  %v5266_v39 = vadd.f32 %v927_v44, %v5100_v8  ;;  %v5269_v27 = vadd.f32 %v928_v15, %v5103_v33 }
  0xb1   : > { %v5272_v18 = vadd.f32 %v929_v19, %v5106_v38  ;;  %v5275_v25 = vadd.f32 %v930_v26, %v5109_v46  ;;  %v5278_v57 = vadd.f32 %v931_v50, %v5112_v6  ;;  %v5281_v22 = vadd.f32 %v932_v35, %v5115_v13  ;;  %v9303_v35 = vld [vmem:[#allocation31_spill] sm:$0xff] }
  0xb2   : > { %v5284_v23 = vadd.f32 %v933_v42, %v5118_v45  ;;  %v5287_v8 = vadd.f32 %v934_v47, %v5121_v12  ;;  %v5290_v33 = vadd.f32 %v935_v31, %v5124_v52  ;;  %v5293_v38 = vadd.f32 %v936_v11, %v5127_v30  ;;  %v9305_v47 = vld [vmem:[#allocation72_spill] sm:$0xff]  ;;  %v9306_v31 = vld [vmem:[#allocation15_spill] sm:$0xff] }
  0xb3   : > { %v5296_v46 = vadd.f32 %v937_v34, %v5130_v1  ;;  %v5299_v6 = vadd.f32 %v938_v4, %v5133_v61  ;;  %v5302_v13 = vadd.f32 %v939_v24, %v5136_v37  ;;  %v5305_v45 = vadd.f32 %v940_v21, %v5139_v14  ;;  %v9307_v34 = vld [vmem:[#allocation114_spill] sm:$0xff]  ;;  %v9308_v24 = vld [vmem:[#allocation115_spill] sm:$0xff] }
  0xb4   : > { %v5308_v12 = vadd.f32 %v941_v60, %v5142_v41  ;;  %v5311_v52 = vadd.f32 %v942_v2, %v5145_v59  ;;  %v5314_v30 = vadd.f32 %v943_v56, %v5148_v63  ;;  %v5317_v1 = vadd.f32 %v944_v54, %v5151_v7  ;;  %v9289_v63 = vld [vmem:[#allocation22_spill] sm:$0xff]  ;;  %v9291_v7 = vld [vmem:[#allocation23_spill] sm:$0xff]  ;;  %v9309_v60 = vld [vmem:[#allocation116_spill] sm:$0xff] }
  0xb5   : > { %v5320_v61 = vadd.f32 %v945_v36, %v5154_v0  ;;  %v5323_v37 = vadd.f32 %v946_v51, %v5157_v53  ;;  %v5326_v14 = vadd.f32 %v947_v17, %v5160_v9  ;;  %v5329_v41 = vadd.f32 %v948_v3, %v5163_v10  ;;  %v9293_v0 = vld [vmem:[#allocation25_spill] sm:$0xff]  ;;  %v9295_v53 = vld [vmem:[#allocation26_spill] sm:$0xff]  ;;  %v9297_v9 = vld [vmem:[#allocation27_spill] sm:$0xff] }
  0xb6   : > { %v5332_v59 = vadd.f32 %v949_v16, %v5166_v28  ;;  %v5335_v62 = vadd.f32 %v950_v49, %v9289_v63  ;;  %v5338_v44 = vadd.f32 %v951_v43, %v9291_v7  ;;  %v5341_v15 = vadd.f32 %v952_v55, %v9293_v0  ;;  %v9299_v10 = vld [vmem:[#allocation29_spill] sm:$0xff]  ;;  %v9301_v28 = vld [vmem:[#allocation30_spill] sm:$0xff]  ;;  %v9312_v17 = vld [vmem:[#allocation119_spill] sm:$0xff] }
  0xb7   : > { %v5344_v19 = vadd.f32 %v953_v29, %v9295_v53  ;;  %v5347_v26 = vadd.f32 %v954_v58, %v9297_v9  ;;  %v5350_v3 = vadd.f32 %v955_v5, %v9299_v10  ;;  %v5353_v50 = vadd.f32 %v956_v32, %v9301_v28  ;;  %v9310_v56 = vld [vmem:[#allocation117_spill] sm:$0xff]  ;;  %v9311_v36 = vld [vmem:[#allocation118_spill] sm:$0xff]  ;;  %v9313_v49 = vld [vmem:[#allocation120_spill] sm:$0xff] }
  0xb8   : > { %9290 = vst [vmem:[#allocation35_spill] sm:$0xff] %v5335_v62  ;;  %9292 = vst [vmem:[#allocation37_spill] sm:$0xff] %v5338_v44  ;;  %v5356_v42 = vadd.f32 %v957_v40, %v9303_v35  ;;  %v1026_v11 = vmul.f32 %v9306_v31, %v9305_v47  ;;  %v1027_v4 = vmul.f32 %v9306_v31, %v9307_v34  ;;  %v9314_v55 = vld [vmem:[#allocation121_spill] sm:$0xff]  ;;  %v9315_v58 = vld [vmem:[#allocation123_spill] sm:$0xff] }
  0xb9   : > { %9294 = vst [vmem:[#allocation38_spill] sm:$0xff] %v5341_v15  ;;  %9296 = vst [vmem:[#allocation39_spill] sm:$0xff] %v5344_v19  ;;  %v1028_v21 = vmul.f32 %v9306_v31, %v9308_v24  ;;  %v1029_v2 = vmul.f32 %v9306_v31, %v9309_v60  ;;  %v1030_v54 = vmul.f32 %v9306_v31, %v9310_v56  ;;  %v9316_v32 = vld [vmem:[#allocation124_spill] sm:$0xff]  ;;  %v9317_v63 = vld [vmem:[#allocation125_spill] sm:$0xff] }
  0xba   : > { %9298 = vst [vmem:[#allocation41_spill] sm:$0xff] %v5347_v26  ;;  %9300 = vst [vmem:[#allocation42_spill] sm:$0xff] %v5350_v3  ;;  %v1031_v51 = vmul.f32 %v9306_v31, %v9311_v36  ;;  %v1032_v16 = vmul.f32 %v9306_v31, %v9312_v17  ;;  %v1033_v43 = vmul.f32 %v9306_v31, %v9313_v49  ;;  %v9318_v0 = vld [vmem:[#allocation126_spill] sm:$0xff]  ;;  %v9319_v9 = vld [vmem:[#allocation127_spill] sm:$0xff] }
  0xbb   : > { %9302 = vst [vmem:[#allocation16_spill] sm:$0xff] %v5353_v50  ;;  %9304 = vst [vmem:[#allocation17_spill] sm:$0xff] %v5356_v42  ;;  %v1034_v29 = vmul.f32 %v9306_v31, %v9314_v55  ;;  %v1035_v5 = vmul.f32 %v9306_v31, %v9315_v58  ;;  %v1036_v40 = vmul.f32 %v9306_v31, %v9316_v32  ;;  %v9320_v28 = vld [vmem:[#allocation128_spill] sm:$0xff]  ;;  %v9321_v47 = vld [vmem:[#allocation129_spill] sm:$0xff] }
  0xbc   : > { %v1037_v7 = vmul.f32 %v9306_v31, %v9317_v63  ;;  %v1038_v53 = vmul.f32 %v9306_v31, %v9318_v0  ;;  %v1039_v10 = vmul.f32 %v9306_v31, %v9319_v9  ;;  %v1040_v35 = vmul.f32 %v9306_v31, %v9320_v28  ;;  %v5391_v24 = vld [vmem:[%s3724_s3 + $0x183] sm:$0xff]  ;;  %v5394_v60 = vld [vmem:[%s3724_s3 + $0x18b] sm:$0xff]  ;;  %v9327_v32 = vld [vmem:[#allocation132_spill] sm:$0xff] }
  0xbd   : > { %v1041_v34 = vmul.f32 %v9306_v31, %v9321_v47  ;;  %9322 = vst [vmem:[#allocation18_spill] sm:$0xff] %v5391_v24  ;;  %9323 = vst [vmem:[#allocation20_spill] sm:$0xff] %v5394_v60  ;;  %v9324_v56 = vld [vmem:[#allocation130_spill] sm:$0xff]  ;;  %v9325_v17 = vld [vmem:[#allocation131_spill] sm:$0xff]  ;;  %v1045_v63 = vmul.f32 %v9306_v31, %v9327_v32  ;;  %v1048_v42 = vmul.f32 %v9306_v31, %v9330_v48 }
  0xbe   : > { %v1042_v36 = vmul.f32 %v9306_v31, %v9324_v56  ;;  %v1043_v49 = vmul.f32 %v9306_v31, %v9325_v17  ;;  %v9326_v55 = vld [vmem:[#allocation10_spill] sm:$0xff]  ;;  %v9328_v0 = vld [vmem:[#allocation133_spill] sm:$0xff]  ;;  %v9331_v50 = vld [vmem:[#allocation136_spill] sm:$0xff] }
  0xbf   : > { %v1044_v58 = vmul.f32 %v9306_v31, %v9326_v55  ;;  %v1046_v9 = vmul.f32 %v9306_v31, %v9328_v0  ;;  %v9329_v28 = vld [vmem:[#allocation134_spill] sm:$0xff]  ;;  %v1049_v56 = vmul.f32 %v9306_v31, %v9331_v50  ;;  %v9332_v3 = vld [vmem:[#allocation137_spill] sm:$0xff]  ;;  %v9334_v19 = vld [vmem:[#allocation139_spill] sm:$0xff]  ;;  %v1056_v50 = vmul.f32 %v5391_v24, %v9306_v31 }
  0xc0   : > { %v1047_v47 = vmul.f32 %v9306_v31, %v9329_v28  ;;  %v1050_v17 = vmul.f32 %v9306_v31, %v9332_v3  ;;  %v9333_v26 = vld [vmem:[#allocation138_spill] sm:$0xff]  ;;  %v1052_v32 = vmul.f32 %v9306_v31, %v9334_v19  ;;  %v9335_v15 = vld [vmem:[#allocation140_spill] sm:$0xff]  ;;  %v9336_v44 = vld [vmem:[#allocation141_spill] sm:$0xff]  ;;  %v1057_v3 = vmul.f32 %v5394_v60, %v9306_v31 }
  0xc1   : > { %v1051_v55 = vmul.f32 %v9306_v31, %v9333_v26  ;;  %v1053_v0 = vmul.f32 %v9306_v31, %v9335_v15  ;;  %v1054_v28 = vmul.f32 %v9306_v31, %v9336_v44  ;;  %v9337_v62 = vld [vmem:[#allocation142_spill] sm:$0xff]  ;;  %v5429_v26 = vadd.f32 %v1026_v11, %v5263_v20 }
  0xc2   : > { %v1055_v48 = vmul.f32 %v9306_v31, %v9337_v62  ;;  %v5432_v19 = vadd.f32 %v1027_v4, %v5266_v39  ;;  %v5435_v15 = vadd.f32 %v1028_v21, %v5269_v27  ;;  %v5438_v44 = vadd.f32 %v1029_v2, %v5272_v18  ;;  %v9343_v4 = vld [vmem:[#allocation37_spill] sm:$0xff] }
  0xc3   : > { %v5441_v62 = vadd.f32 %v1030_v54, %v5275_v25  ;;  %v5444_v24 = vadd.f32 %v1031_v51, %v5278_v57  ;;  %v5447_v31 = vadd.f32 %v1032_v16, %v5281_v22  ;;  %v5450_v20 = vadd.f32 %v1033_v43, %v5284_v23  ;;  %v9353_v16 = vld [vmem:[#allocation16_spill] sm:$0xff]  ;;  %v5572_v60 = vld [vmem:[%s3724_s3 + $0x184] sm:$0xff] }
  0xc4   : > { %v5453_v39 = vadd.f32 %v1034_v29, %v5287_v8  ;;  %v5456_v27 = vadd.f32 %v1035_v5, %v5290_v33  ;;  %v5459_v18 = vadd.f32 %v1036_v40, %v5293_v38  ;;  %v5462_v25 = vadd.f32 %v1037_v7, %v5296_v46  ;;  %v9355_v29 = vld [vmem:[#allocation17_spill] sm:$0xff]  ;;  %v3545_v40 = vld [vmem:[%s8599_s1 + $0x8] sm:$0x1f]  ;;  %9385 = vst [vmem:[#allocation55_spill] sm:$0xff] %v5572_v60 }
  0xc5   : > { %v5465_v57 = vadd.f32 %v1038_v53, %v5299_v6  ;;  %v5468_v22 = vadd.f32 %v1039_v10, %v5302_v13  ;;  %v5471_v23 = vadd.f32 %v1040_v35, %v5305_v45  ;;  %v5474_v8 = vadd.f32 %v1041_v34, %v5308_v12  ;;  %v186_v13 = vld [vmem:[%s8599_s1 + $0x10] sm:$0x1f]  ;;  %v9357_v7 = vld [vmem:[#allocation9_spill] sm:$0xff]  ;;  %v9360_v34 = vld [vmem:[#allocation6_spill] sm:$0xff] }
  0xc6   : > { %v5477_v33 = vadd.f32 %v1042_v36, %v5311_v52  ;;  %v5480_v38 = vadd.f32 %v1043_v49, %v5314_v30  ;;  %v5483_v46 = vadd.f32 %v1044_v58, %v5317_v1  ;;  %v5486_v6 = vadd.f32 %v1045_v63, %v5320_v61  ;;  %v187_v1 = vld [vmem:[%s8599_s1 + $0x18] sm:$0x1f]  ;;  %v9341_v61 = vld [vmem:[#allocation35_spill] sm:$0xff]  ;;  %v9358_v10 = vld [vmem:[#allocation5_spill] sm:$0xff] }
  0xc7   : > { %v5492_v45 = vadd.f32 %v1046_v9, %v5323_v37  ;;  %v5495_v12 = vadd.f32 %v1047_v47, %v5326_v14  ;;  %v5498_v52 = vadd.f32 %v1048_v42, %v5329_v41  ;;  %v5501_v30 = vadd.f32 %v1049_v56, %v5332_v59  ;;  %v9345_v37 = vld [vmem:[#allocation38_spill] sm:$0xff]  ;;  %v9347_v14 = vld [vmem:[#allocation39_spill] sm:$0xff]  ;;  %v9349_v41 = vld [vmem:[#allocation41_spill] sm:$0xff] }
  0xc8   : > { %v5507_v11 = vadd.f32 %v1050_v17, %v9341_v61  ;;  %v5510_v21 = vadd.f32 %v1051_v55, %v9343_v4  ;;  %v5513_v2 = vadd.f32 %v1052_v32, %v9345_v37  ;;  %v5516_v54 = vadd.f32 %v1053_v0, %v9347_v14  ;;  %v9351_v59 = vld [vmem:[#allocation42_spill] sm:$0xff]  ;;  %v9362_v49 = vld [vmem:[#allocation7_spill] sm:$0xff]  ;;  %v9364_v63 = vld [vmem:[#allocation8_spill] sm:$0xff] }
  0xc9   : > { %9338 = vst [vmem:[#allocation24_spill] sm:$0xff] %v5495_v12  ;;  %9339 = vst [vmem:[#allocation28_spill] sm:$0xff] %v5498_v52  ;;  %v5519_v42 = vadd.f32 %v1054_v28, %v9349_v41  ;;  %v5522_v51 = vadd.f32 %v1055_v48, %v9351_v59  ;;  %v5525_v43 = vadd.f32 %v1056_v50, %v9353_v16  ;;  %v9369_v55 = vld [vmem:[#allocation143_spill] sm:$0xff]  ;;  %v9370_v0 = vld [vmem:[#allocation144_spill] sm:$0xff] }
  0xca   : > { %9340 = vst [vmem:[#allocation32_spill] sm:$0xff] %v5501_v30  ;;  %9342 = vst [vmem:[#allocation36_spill] sm:$0xff] %v5507_v11  ;;  %v5528_v5 = vadd.f32 %v1057_v3, %v9355_v29  ;;  %v1125_v53 = vrot.slane %v3545_v40, %v9357_v7  ;;  %v5535_v35 = vrot.slane %v186_v13, %v9358_v10  ;;  %v9371_v48 = vld [vmem:[#allocation145_spill] sm:$0xff]  ;;  %v9372_v3 = vld [vmem:[#allocation146_spill] sm:$0xff] }
  0xcb   : > { %9344 = vst [vmem:[#allocation40_spill] sm:$0xff] %v5510_v21  ;;  %9346 = vst [vmem:[#allocation43_spill] sm:$0xff] %v5513_v2  ;;  %v5538_v36 = vrot.slane %v186_v13, %v9360_v34  ;;  %v5541_v58 = vrot.slane %v186_v13, %v9362_v49  ;;  %v5544_v9 = vrot.slane %v186_v13, %v9364_v63  ;;  %v9373_v4 = vld [vmem:[#allocation147_spill] sm:$0xff]  ;;  %v9375_v41 = vld [vmem:[#allocation152_spill] sm:$0xff] }
  0xcc   : > { %9348 = vst [vmem:[#allocation46_spill] sm:$0xff] %v5516_v54  ;;  %9350 = vst [vmem:[#allocation50_spill] sm:$0xff] %v5519_v42  ;;  %v5547_v47 = vrot.slane %v186_v13, %v9357_v7  ;;  %v5550_v56 = vrot.slane %v187_v1, %v9358_v10  ;;  %v5553_v17 = vrot.slane %v187_v1, %v9360_v34  ;;  %v9374_v13 = vld [vmem:[#allocation148_spill] sm:$0xff]  ;;  %v9376_v16 = vld [vmem:[#allocation153_spill] sm:$0xff] }
  0xcd   : > { %9352 = vst [vmem:[#allocation44_spill] sm:$0xff] %v5522_v51  ;;  %9354 = vst [vmem:[#allocation13_spill] sm:$0xff] %v5525_v43  ;;  %v1126_v32 = vmul.f32 %v1125_v53, %v9369_v55  ;;  %v1127_v28 = vmul.f32 %v1125_v53, %v9370_v0  ;;  %v1128_v50 = vmul.f32 %v1125_v53, %v9371_v48  ;;  %v9377_v1 = vld [vmem:[#allocation154_spill] sm:$0xff]  ;;  %v9378_v34 = vld [vmem:[#allocation155_spill] sm:$0xff] }
  0xce   : > { %9356 = vst [vmem:[#allocation45_spill] sm:$0xff] %v5528_v5  ;;  %9359 = vst [vmem:[#allocation47_spill] sm:$0xff] %v5535_v35  ;;  %v1129_v61 = vmul.f32 %v1125_v53, %v9372_v3  ;;  %v1130_v37 = vmul.f32 %v1125_v53, %v9373_v4  ;;  %v1131_v14 = vmul.f32 %v1125_v53, %v9374_v13  ;;  %v9379_v10 = vld [vmem:[#allocation156_spill] sm:$0xff]  ;;  %v9380_v0 = vld [vmem:[#allocation157_spill] sm:$0xff] }
  0xcf   : > { %9361 = vst [vmem:[#allocation48_spill] sm:$0xff] %v5538_v36  ;;  %9363 = vst [vmem:[#allocation49_spill] sm:$0xff] %v5541_v58  ;;  %v1132_v59 = vmul.f32 %v1125_v53, %v9375_v41  ;;  %v1133_v29 = vmul.f32 %v1125_v53, %v9376_v16  ;;  %v1134_v40 = vmul.f32 %v1125_v53, %v9377_v1  ;;  %v9381_v49 = vld [vmem:[#allocation158_spill] sm:$0xff]  ;;  %v9389_v58 = vld [vmem:[#allocation12_spill] sm:$0xff] }
  0xd0   : > { %9365 = vst [vmem:[#allocation51_spill] sm:$0xff] %v5544_v9  ;;  %9366 = vst [vmem:[#allocation52_spill] sm:$0xff] %v5547_v47  ;;  %v1135_v55 = vmul.f32 %v1125_v53, %v9378_v34  ;;  %v1136_v7 = vmul.f32 %v1125_v53, %v9379_v10  ;;  %v1137_v63 = vmul.f32 %v1125_v53, %v9380_v0  ;;  %v9384_v47 = vld [vmem:[#allocation161_spill] sm:$0xff]  ;;  %v5575_v41 = vld [vmem:[%s3724_s3 + $0x18c] sm:$0xff] }
  0xd1   : > { %9367 = vst [vmem:[#allocation53_spill] sm:$0xff] %v5550_v56  ;;  %9368 = vst [vmem:[#allocation54_spill] sm:$0xff] %v5553_v17  ;;  %v1138_v48 = vmul.f32 %v1125_v53, %v9381_v49  ;;  %v9382_v17 = vld [vmem:[#allocation159_spill] sm:$0xff]  ;;  %v9383_v56 = vld [vmem:[#allocation160_spill] sm:$0xff]  ;;  %v1141_v13 = vmul.f32 %v1125_v53, %v9384_v47  ;;  %v1144_v10 = vmul.f32 %v1125_v53, %v9389_v58 }
  0xd2   : > { %v1139_v3 = vmul.f32 %v1125_v53, %v9382_v17  ;;  %v1140_v4 = vmul.f32 %v1125_v53, %v9383_v56  ;;  %9386 = vst [vmem:[#allocation56_spill] sm:$0xff] %v5575_v41  ;;  %v9387_v16 = vld [vmem:[#allocation162_spill] sm:$0xff]  ;;  %v9388_v9 = vld [vmem:[#allocation163_spill] sm:$0xff]  ;;  %v9390_v36 = vld [vmem:[#allocation164_spill] sm:$0xff] }
  0xd3   : > { %v1142_v1 = vmul.f32 %v1125_v53, %v9387_v16  ;;  %v1143_v34 = vmul.f32 %v1125_v53, %v9388_v9  ;;  %v1145_v0 = vmul.f32 %v1125_v53, %v9390_v36  ;;  %v9391_v35 = vld [vmem:[#allocation165_spill] sm:$0xff]  ;;  %v9392_v5 = vld [vmem:[#allocation166_spill] sm:$0xff]  ;;  %v9393_v43 = vld [vmem:[#allocation167_spill] sm:$0xff] }
  0xd4   : > { %v1146_v49 = vmul.f32 %v1125_v53, %v9391_v35  ;;  %v1147_v17 = vmul.f32 %v1125_v53, %v9392_v5  ;;  %v1148_v56 = vmul.f32 %v1125_v53, %v9393_v43  ;;  %v9394_v51 = vld [vmem:[#allocation168_spill] sm:$0xff]  ;;  %v9395_v42 = vld [vmem:[#allocation169_spill] sm:$0xff]  ;;  %v9396_v2 = vld [vmem:[#allocation170_spill] sm:$0xff]  ;;  %v1156_v35 = vmul.f32 %v5572_v60, %v1125_v53 }
  0xd5   : > { %v1149_v47 = vmul.f32 %v1125_v53, %v9394_v51  ;;  %v1150_v54 = vmul.f32 %v1125_v53, %v9395_v42  ;;  %v1151_v21 = vmul.f32 %v1125_v53, %v9396_v2  ;;  %v9397_v11 = vld [vmem:[#allocation171_spill] sm:$0xff]  ;;  %v9398_v30 = vld [vmem:[#allocation172_spill] sm:$0xff]  ;;  %v9399_v52 = vld [vmem:[#allocation173_spill] sm:$0xff]  ;;  %v1157_v5 = vmul.f32 %v5575_v41, %v1125_v53 }
  0xd6   : > { %v1152_v16 = vmul.f32 %v1125_v53, %v9397_v11  ;;  %v1153_v9 = vmul.f32 %v1125_v53, %v9398_v30  ;;  %v1154_v58 = vmul.f32 %v1125_v53, %v9399_v52  ;;  %v9400_v12 = vld [vmem:[#allocation174_spill] sm:$0xff]  ;;  %v5594_v43 = vadd.f32 %v1126_v32, %v5429_v26  ;;  %v3001_v2 = vld [vmem:[%s3724_s3 + $0x30] sm:$0xff] }
  0xd7   : > { %v1155_v36 = vmul.f32 %v1125_v53, %v9400_v12  ;;  %v5597_v42 = vadd.f32 %v1127_v28, %v5432_v19  ;;  %v5600_v11 = vadd.f32 %v1128_v50, %v5435_v15  ;;  %v5603_v52 = vadd.f32 %v1129_v61, %v5438_v44  ;;  %v5644_v51 = vld [vmem:[%s3724_s3 + $0x48] sm:$0xff]  ;;  %v9408_v50 = vld [vmem:[#allocation32_spill] sm:$0xff]  ;;  %v5683_v61 = vld [vmem:[%s3724_s3 + $0x80] sm:$0xff] }
  0xd8   : > { %v5606_v12 = vadd.f32 %v1130_v37, %v5441_v62  ;;  %v5609_v30 = vadd.f32 %v1131_v14, %v5444_v24  ;;  %v5612_v26 = vadd.f32 %v1132_v59, %v5447_v31  ;;  %v5615_v19 = vadd.f32 %v1133_v29, %v5450_v20  ;;  %9401 = vst [vmem:[#allocation57_spill] sm:$0xff] %v5644_v51  ;;  %v5665_v53 = vld [vmem:[%s3724_s3 + $0x68] sm:$0xff]  ;;  %v5686_v37 = vld [vmem:[%s3724_s3 + $0x90] sm:$0xff]  ;;  %v5689_v14 = vld [vmem:[%s3724_s3 + $0x98] sm:$0xff] }
  0xd9   : > { %v5618_v15 = vadd.f32 %v1134_v40, %v5453_v39  ;;  %v5621_v44 = vadd.f32 %v1135_v55, %v5456_v27  ;;  %v5624_v62 = vadd.f32 %v1136_v7, %v5459_v18  ;;  %v5627_v24 = vadd.f32 %v1137_v63, %v5462_v25  ;;  %v3002_v18 = vld [vmem:[%s3724_s3 + $0x38] sm:$0xff]  ;;  %v5647_v25 = vld [vmem:[%s3724_s3 + $0x50] sm:$0xff]  ;;  %v5662_v7 = vld [vmem:[%s3724_s3 + $0x60] sm:$0xff]  ;;  %9404 = vst [vmem:[#allocation60_spill] sm:$0xff] %v5665_v53 }
  0xda   : > { %v5630_v31 = vadd.f32 %v1138_v48, %v5465_v57  ;;  %v5633_v20 = vadd.f32 %v1139_v3, %v5468_v22  ;;  %v5636_v39 = vadd.f32 %v1140_v4, %v5471_v23  ;;  %v5639_v27 = vadd.f32 %v1141_v13, %v5474_v8  ;;  %9402 = vst [vmem:[#allocation58_spill] sm:$0xff] %v5647_v25  ;;  %v5668_v63 = vld [vmem:[%s3724_s3 + $0x78] sm:$0xff]  ;;  %v9416_v55 = vld [vmem:[#allocation43_spill] sm:$0xff]  ;;  %v9418_v3 = vld [vmem:[#allocation46_spill] sm:$0xff] }
  0xdb   : > { %v5650_v57 = vadd.f32 %v1142_v1, %v5477_v33  ;;  %v5653_v22 = vadd.f32 %v1143_v34, %v5480_v38  ;;  %v5656_v23 = vadd.f32 %v1144_v10, %v5483_v46  ;;  %v5659_v8 = vadd.f32 %v1145_v0, %v5486_v6  ;;  %9403 = vst [vmem:[#allocation59_spill] sm:$0xff] %v5662_v7  ;;  %v9406_v38 = vld [vmem:[#allocation24_spill] sm:$0xff]  ;;  %v5704_v13 = vld [vmem:[%s3724_s3 + $0xa8] sm:$0xff]  ;;  %v5707_v1 = vld [vmem:[%s3724_s3 + $0xb0] sm:$0xff] }
  0xdc   : > { %9405 = vst [vmem:[#allocation61_spill] sm:$0xff] %v5668_v63  ;;  %v5671_v33 = vadd.f32 %v1146_v49, %v5492_v45  ;;  %v5674_v32 = vadd.f32 %v1147_v17, %v9406_v38  ;;  %v9407_v46 = vld [vmem:[#allocation28_spill] sm:$0xff]  ;;  %v5680_v6 = vadd.f32 %v1149_v47, %v9408_v50  ;;  %9409 = vst [vmem:[#allocation62_spill] sm:$0xff] %v5683_v61  ;;  %v5710_v34 = vld [vmem:[%s3724_s3 + $0xc0] sm:$0xff] }
  0xdd   : > { %v5677_v28 = vadd.f32 %v1148_v56, %v9407_v46  ;;  %9410 = vst [vmem:[#allocation63_spill] sm:$0xff] %v5686_v37  ;;  %9411 = vst [vmem:[#allocation64_spill] sm:$0xff] %v5689_v14  ;;  %v9412_v45 = vld [vmem:[#allocation36_spill] sm:$0xff]  ;;  %v5698_v48 = vadd.f32 %v1152_v16, %v9416_v55  ;;  %v5701_v4 = vadd.f32 %v1153_v9, %v9418_v3  ;;  %v9423_v10 = vld [vmem:[#allocation50_spill] sm:$0xff] }
  0xde   : > { %v5692_v59 = vadd.f32 %v1150_v54, %v9412_v45  ;;  %v9414_v29 = vld [vmem:[#allocation40_spill] sm:$0xff]  ;;  %9420 = vst [vmem:[#allocation69_spill] sm:$0xff] %v5704_v13  ;;  %9421 = vst [vmem:[#allocation70_spill] sm:$0xff] %v5707_v1  ;;  %v5713_v54 = vadd.f32 %v1154_v58, %v9423_v10  ;;  %v9427_v49 = vld [vmem:[#allocation13_spill] sm:$0xff] }
  0xdf   : > { %v5695_v40 = vadd.f32 %v1151_v21, %v9414_v29  ;;  %9417 = vst [vmem:[#allocation67_spill] sm:$0xff] %v5698_v48  ;;  %9419 = vst [vmem:[#allocation68_spill] sm:$0xff] %v5701_v4  ;;  %v9425_v0 = vld [vmem:[#allocation44_spill] sm:$0xff]  ;;  %v5719_v17 = vadd.f32 %v1156_v35, %v9427_v49  ;;  %v9429_v56 = vld [vmem:[#allocation45_spill] sm:$0xff] }
  0xe0   : > { %9413 = vst [vmem:[#allocation65_spill] sm:$0xff] %v5692_v59  ;;  %9422 = vst [vmem:[#allocation71_spill] sm:$0xff] %v5710_v34  ;;  %v5716_v21 = vadd.f32 %v1155_v36, %v9425_v0  ;;  %v5722_v47 = vadd.f32 %v1157_v5, %v9429_v56  ;;  %v5725_v16 = vld [vmem:[%s3724_s3 + $0xc8] sm:$0xff]  ;;  %v5728_v9 = vld [vmem:[%s3724_s3 + $0xd8] sm:$0xff] }
  0xe1   : > { %9415 = vst [vmem:[#allocation66_spill] sm:$0xff] %v5695_v40  ;;  %9424 = vst [vmem:[#allocation73_spill] sm:$0xff] %v5713_v54  ;;  %v5731_v38 = vld [vmem:[%s3724_s3 + $0xe0] sm:$0xff]  ;;  %v5734_v58 = vld [vmem:[%s3724_s3 + $0xf0] sm:$0xff] }
  0xe2   : > { %9426 = vst [vmem:[#allocation74_spill] sm:$0xff] %v5716_v21  ;;  %9428 = vst [vmem:[#allocation75_spill] sm:$0xff] %v5719_v17  ;;  %v5737_v46 = vld [vmem:[%s3724_s3 + $0xf8] sm:$0xff]  ;;  %v5740_v36 = vld [vmem:[%s3724_s3 + $0x108] sm:$0xff] }
  0xe3   : > { %9430 = vst [vmem:[#allocation76_spill] sm:$0xff] %v5722_v47  ;;  %9431 = vst [vmem:[#allocation151_spill] sm:$0xff] %v5725_v16  ;;  %v9437_v35 = vld [vmem:[#allocation47_spill] sm:$0xff]  ;;  %v5752_v3 = vld [vmem:[%s3724_s3 + $0x120] sm:$0xff] }
  0xe4   : > { %9432 = vst [vmem:[#allocation122_spill] sm:$0xff] %v5728_v9  ;;  %9433 = vst [vmem:[#allocation86_spill] sm:$0xff] %v5731_v38  ;;  %v1227_v50 = vmul.f32 %v3001_v2, %v9437_v35  ;;  %v1228_v5 = vmul.f32 %v3002_v18, %v9437_v35  ;;  %v1229_v45 = vmul.f32 %v5644_v51, %v9437_v35  ;;  %v5749_v55 = vld [vmem:[%s3724_s3 + $0x110] sm:$0xff]  ;;  %v5755_v10 = vld [vmem:[%s3724_s3 + $0x128] sm:$0xff] }
  0xe5   : > { %9434 = vst [vmem:[#allocation87_spill] sm:$0xff] %v5734_v58  ;;  %9435 = vst [vmem:[#allocation88_spill] sm:$0xff] %v5737_v46  ;;  %v1230_v29 = vmul.f32 %v5647_v25, %v9437_v35  ;;  %v1231_v2 = vmul.f32 %v5662_v7, %v9437_v35  ;;  %v1232_v18 = vmul.f32 %v5665_v53, %v9437_v35  ;;  %v5766_v56 = vld [vmem:[%s3724_s3 + $0x138] sm:$0xff]  ;;  %v5769_v25 = vld [vmem:[%s3724_s3 + $0x140] sm:$0xff] }
  0xe6   : > { %9436 = vst [vmem:[#allocation92_spill] sm:$0xff] %v5740_v36  ;;  %9438 = vst [vmem:[#allocation93_spill] sm:$0xff] %v5749_v55  ;;  %v1233_v0 = vmul.f32 %v5668_v63, %v9437_v35  ;;  %v1234_v49 = vmul.f32 %v5683_v61, %v9437_v35  ;;  %v5772_v51 = vld [vmem:[%s3724_s3 + $0x150] sm:$0xff]  ;;  %v1235_v7 = vmul.f32 %v5686_v37, %v9437_v35  ;;  %v5783_v61 = vld [vmem:[%s3724_s3 + $0x158] sm:$0xff] }
  0xe7   : > { %9439 = vst [vmem:[#allocation94_spill] sm:$0xff] %v5752_v3  ;;  %9440 = vst [vmem:[#allocation95_spill] sm:$0xff] %v5755_v10  ;;  %v1236_v53 = vmul.f32 %v5689_v14, %v9437_v35  ;;  %v1237_v63 = vmul.f32 %v5704_v13, %v9437_v35  ;;  %v1238_v41 = vmul.f32 %v5707_v1, %v9437_v35  ;;  %v5786_v60 = vld [vmem:[%s3724_s3 + $0x168] sm:$0xff]  ;;  %v5789_v47 = vld [vmem:[%s3724_s3 + $0x170] sm:$0xff] }
  0xe8   : > { %9441 = vst [vmem:[#allocation19_spill] sm:$0xff] %v5766_v56  ;;  %9442 = vst [vmem:[#allocation77_spill] sm:$0xff] %v5769_v25  ;;  %v1239_v17 = vmul.f32 %v5710_v34, %v9437_v35  ;;  %v1240_v37 = vmul.f32 %v5725_v16, %v9437_v35  ;;  %v1241_v14 = vmul.f32 %v5728_v9, %v9437_v35  ;;  %v5800_v21 = vld [vmem:[%s3724_s3 + $0x198] sm:$0xff]  ;;  %v5803_v1 = vld [vmem:[%s3724_s3 + $0x1a0] sm:$0xff] }
  0xe9   : > { %9443 = vst [vmem:[#allocation14_spill] sm:$0xff] %v5772_v51  ;;  %9444 = vst [vmem:[#allocation78_spill] sm:$0xff] %v5783_v61  ;;  %v1242_v13 = vmul.f32 %v5731_v38, %v9437_v35  ;;  %v1243_v54 = vmul.f32 %v5734_v58, %v9437_v35  ;;  %v1244_v4 = vmul.f32 %v5737_v46, %v9437_v35 }
  0xea   : > { %9445 = vst [vmem:[#allocation79_spill] sm:$0xff] %v5786_v60  ;;  %9446 = vst [vmem:[#allocation80_spill] sm:$0xff] %v5789_v47  ;;  %v1245_v34 = vmul.f32 %v5740_v36, %v9437_v35  ;;  %v1246_v16 = vmul.f32 %v5749_v55, %v9437_v35  ;;  %v1247_v9 = vmul.f32 %v5752_v3, %v9437_v35 }
  0xeb   : > { %9447 = vst [vmem:[#allocation81_spill] sm:$0xff] %v5800_v21  ;;  %9448 = vst [vmem:[#allocation82_spill] sm:$0xff] %v5803_v1  ;;  %v1248_v38 = vmul.f32 %v5755_v10, %v9437_v35  ;;  %v1249_v48 = vmul.f32 %v5766_v56, %v9437_v35  ;;  %v1250_v58 = vmul.f32 %v5769_v25, %v9437_v35  ;;  %v9449_v10 = vld [vmem:[#allocation149_spill] sm:$0xff]  ;;  %v9450_v56 = vld [vmem:[#allocation150_spill] sm:$0xff] }
  0xec   : > { %v1251_v46 = vmul.f32 %v5772_v51, %v9437_v35  ;;  %v1252_v36 = vmul.f32 %v5783_v61, %v9437_v35  ;;  %v1253_v55 = vmul.f32 %v5786_v60, %v9437_v35  ;;  %v1254_v3 = vmul.f32 %v5789_v47, %v9437_v35 }
  0xed   : > { %v1255_v40 = vmul.f32 %v9449_v10, %v9437_v35  ;;  %v1256_v59 = vmul.f32 %v9450_v56, %v9437_v35  ;;  %v1257_v25 = vmul.f32 %v5800_v21, %v9437_v35  ;;  %v1258_v51 = vmul.f32 %v5803_v1, %v9437_v35  ;;  %v6030_v21 = vld [vmem:[%s3724_s3 + $0x169] sm:$0xff] }
  0xee   : > { %v5838_v61 = vadd.f32 %v1227_v50, %v5594_v43  ;;  %v5841_v60 = vadd.f32 %v1228_v5, %v5597_v42  ;;  %v5844_v47 = vadd.f32 %v1229_v45, %v5600_v11  ;;  %v5847_v10 = vadd.f32 %v1230_v29, %v5603_v52  ;;  %v9472_v50 = vld [vmem:[#allocation74_spill] sm:$0xff]  ;;  %v9474_v5 = vld [vmem:[#allocation75_spill] sm:$0xff]  ;;  %v9476_v29 = vld [vmem:[#allocation76_spill] sm:$0xff]  ;;  %9492 = vst [vmem:[#allocation72_spill] sm:$0xff] %v6030_v21 }
  0xef   : > { %v5850_v56 = vadd.f32 %v1231_v2, %v5606_v12  ;;  %v5853_v35 = vadd.f32 %v1232_v18, %v5609_v30  ;;  %v5856_v43 = vadd.f32 %v1233_v0, %v5612_v26  ;;  %v5859_v42 = vadd.f32 %v1234_v49, %v5615_v19  ;;  %v5972_v2 = vld [vmem:[%s3724_s3 + $0xd9] sm:$0xff]  ;;  %v5975_v18 = vld [vmem:[%s3724_s3 + $0xe1] sm:$0xff] }
  0xf0   : > { %v5862_v11 = vadd.f32 %v1235_v7, %v5618_v15  ;;  %v5865_v52 = vadd.f32 %v1236_v53, %v5621_v44  ;;  %v5868_v12 = vadd.f32 %v1237_v63, %v5624_v62  ;;  %v5871_v30 = vadd.f32 %v1238_v41, %v5627_v24  ;;  %v3033_v7 = vld [vmem:[%s3724_s3 + $0x31] sm:$0xff]  ;;  %v3034_v62 = vld [vmem:[%s3724_s3 + $0x39] sm:$0xff]  ;;  %v5888_v53 = vld [vmem:[%s3724_s3 + $0x49] sm:$0xff]  ;;  %9479 = vst [vmem:[#allocation110_spill] sm:$0xff] %v5972_v2 }
  0xf1   : > { %v5874_v26 = vadd.f32 %v1239_v17, %v5630_v31  ;;  %v5877_v19 = vadd.f32 %v1240_v37, %v5633_v20  ;;  %v5880_v15 = vadd.f32 %v1241_v14, %v5636_v39  ;;  %v5883_v44 = vadd.f32 %v1242_v13, %v5639_v27  ;;  %9451 = vst [vmem:[#allocation83_spill] sm:$0xff] %v5888_v53  ;;  %v5891_v41 = vld [vmem:[%s3724_s3 + $0x51] sm:$0xff]  ;;  %v5906_v27 = vld [vmem:[%s3724_s3 + $0x61] sm:$0xff]  ;;  %v5909_v63 = vld [vmem:[%s3724_s3 + $0x69] sm:$0xff] }
  0xf2   : > { %9452 = vst [vmem:[#allocation84_spill] sm:$0xff] %v5891_v41  ;;  %v5894_v24 = vadd.f32 %v1243_v54, %v5650_v57  ;;  %v5897_v31 = vadd.f32 %v1244_v4, %v5653_v22  ;;  %v5900_v20 = vadd.f32 %v1245_v34, %v5656_v23  ;;  %v5903_v39 = vadd.f32 %v1246_v16, %v5659_v8  ;;  %v5912_v37 = vld [vmem:[%s3724_s3 + $0x79] sm:$0xff]  ;;  %v5927_v14 = vld [vmem:[%s3724_s3 + $0x81] sm:$0xff]  ;;  %v5930_v4 = vld [vmem:[%s3724_s3 + $0x91] sm:$0xff] }
  0xf3   : > { %9453 = vst [vmem:[#allocation85_spill] sm:$0xff] %v5906_v27  ;;  %9454 = vst [vmem:[#allocation89_spill] sm:$0xff] %v5909_v63  ;;  %v5915_v57 = vadd.f32 %v1247_v9, %v5671_v33  ;;  %v5918_v22 = vadd.f32 %v1248_v38, %v5674_v32  ;;  %v5921_v23 = vadd.f32 %v1249_v48, %v5677_v28  ;;  %v5933_v13 = vld [vmem:[%s3724_s3 + $0x99] sm:$0xff]  ;;  %v9461_v34 = vld [vmem:[#allocation66_spill] sm:$0xff] }
  0xf4   : > { %9455 = vst [vmem:[#allocation90_spill] sm:$0xff] %v5912_v37  ;;  %v5924_v8 = vadd.f32 %v1250_v58, %v5680_v6  ;;  %9456 = vst [vmem:[#allocation91_spill] sm:$0xff] %v5927_v14  ;;  %v9459_v33 = vld [vmem:[#allocation65_spill] sm:$0xff]  ;;  %v5939_v28 = vadd.f32 %v1252_v36, %v9461_v34  ;;  %v9463_v48 = vld [vmem:[#allocation67_spill] sm:$0xff]  ;;  %v5960_v36 = vadd.f32 %v1256_v59, %v9472_v50 }
  0xf5   : > { %9457 = vst [vmem:[#allocation96_spill] sm:$0xff] %v5930_v4  ;;  %9458 = vst [vmem:[#allocation97_spill] sm:$0xff] %v5933_v13  ;;  %v5936_v32 = vadd.f32 %v1251_v46, %v9459_v33  ;;  %v5942_v6 = vadd.f32 %v1253_v55, %v9463_v48  ;;  %v9465_v54 = vld [vmem:[#allocation68_spill] sm:$0xff]  ;;  %v5948_v16 = vld [vmem:[%s3724_s3 + $0xa9] sm:$0xff]  ;;  %v5963_v45 = vadd.f32 %v1257_v25, %v9474_v5 }
  0xf6   : > { %9462 = vst [vmem:[#allocation99_spill] sm:$0xff] %v5939_v28  ;;  %v5945_v17 = vadd.f32 %v1254_v3, %v9465_v54  ;;  %9467 = vst [vmem:[#allocation102_spill] sm:$0xff] %v5948_v16  ;;  %v5951_v9 = vld [vmem:[%s3724_s3 + $0xb1] sm:$0xff]  ;;  %v5954_v38 = vld [vmem:[%s3724_s3 + $0xc1] sm:$0xff]  ;;  %v5966_v55 = vadd.f32 %v1258_v51, %v9476_v29 }
  0xf7   : > { %9460 = vst [vmem:[#allocation98_spill] sm:$0xff] %v5936_v32  ;;  %9464 = vst [vmem:[#allocation100_spill] sm:$0xff] %v5942_v6  ;;  %v9470_v58 = vld [vmem:[#allocation73_spill] sm:$0xff]  ;;  %v5969_v3 = vld [vmem:[%s3724_s3 + $0xc9] sm:$0xff] }
  0xf8   : > { %9466 = vst [vmem:[#allocation101_spill] sm:$0xff] %v5945_v17  ;;  %9468 = vst [vmem:[#allocation103_spill] sm:$0xff] %v5951_v9  ;;  %v5957_v46 = vadd.f32 %v1255_v40, %v9470_v58  ;;  %v5978_v40 = vld [vmem:[%s3724_s3 + $0xf1] sm:$0xff]  ;;  %v5981_v0 = vld [vmem:[%s3724_s3 + $0xf9] sm:$0xff] }
  0xf9   : > { %9469 = vst [vmem:[#allocation104_spill] sm:$0xff] %v5954_v38  ;;  %9473 = vst [vmem:[#allocation106_spill] sm:$0xff] %v5960_v36  ;;  %v5984_v59 = vld [vmem:[%s3724_s3 + $0x109] sm:$0xff]  ;;  %v9484_v25 = vld [vmem:[#allocation48_spill] sm:$0xff] }
  0xfa   : > { %9471 = vst [vmem:[#allocation105_spill] sm:$0xff] %v5957_v46  ;;  %9475 = vst [vmem:[#allocation107_spill] sm:$0xff] %v5963_v45  ;;  %v1327_v49 = vmul.f32 %v3033_v7, %v9484_v25  ;;  %v1328_v51 = vmul.f32 %v3034_v62, %v9484_v25  ;;  %v1329_v33 = vmul.f32 %v5888_v53, %v9484_v25  ;;  %v5993_v48 = vld [vmem:[%s3724_s3 + $0x111] sm:$0xff]  ;;  %v5996_v54 = vld [vmem:[%s3724_s3 + $0x121] sm:$0xff] }
  0xfb   : > { %9477 = vst [vmem:[#allocation108_spill] sm:$0xff] %v5966_v55  ;;  %9478 = vst [vmem:[#allocation109_spill] sm:$0xff] %v5969_v3  ;;  %v1330_v34 = vmul.f32 %v5891_v41, %v9484_v25  ;;  %v5999_v58 = vld [vmem:[%s3724_s3 + $0x129] sm:$0xff]  ;;  %v1331_v7 = vmul.f32 %v5906_v27, %v9484_v25  ;;  %v1332_v62 = vmul.f32 %v5909_v63, %v9484_v25  ;;  %v6010_v29 = vld [vmem:[%s3724_s3 + $0x139] sm:$0xff] }
  0xfc   : > { %9480 = vst [vmem:[#allocation111_spill] sm:$0xff] %v5975_v18  ;;  %9481 = vst [vmem:[#allocation112_spill] sm:$0xff] %v5978_v40  ;;  %v1333_v50 = vmul.f32 %v5912_v37, %v9484_v25  ;;  %v1334_v5 = vmul.f32 %v5927_v14, %v9484_v25  ;;  %v6013_v41 = vld [vmem:[%s3724_s3 + $0x141] sm:$0xff]  ;;  %v6016_v53 = vld [vmem:[%s3724_s3 + $0x151] sm:$0xff]  ;;  %v1335_v27 = vmul.f32 %v5930_v4, %v9484_v25 }
  0xfd   : > { %9482 = vst [vmem:[#allocation113_spill] sm:$0xff] %v5981_v0  ;;  %9483 = vst [vmem:[#allocation22_spill] sm:$0xff] %v5984_v59  ;;  %v1336_v63 = vmul.f32 %v5933_v13, %v9484_v25  ;;  %v1337_v37 = vmul.f32 %v5948_v16, %v9484_v25  ;;  %v1338_v1 = vmul.f32 %v5951_v9, %v9484_v25  ;;  %v6027_v14 = vld [vmem:[%s3724_s3 + $0x159] sm:$0xff]  ;;  %v6033_v55 = vld [vmem:[%s3724_s3 + $0x171] sm:$0xff] }
  0xfe   : > { %9485 = vst [vmem:[#allocation23_spill] sm:$0xff] %v5993_v48  ;;  %9486 = vst [vmem:[#allocation25_spill] sm:$0xff] %v5996_v54  ;;  %v1339_v45 = vmul.f32 %v5954_v38, %v9484_v25  ;;  %v1340_v4 = vmul.f32 %v5969_v3, %v9484_v25  ;;  %v1341_v13 = vmul.f32 %v5972_v2, %v9484_v25  ;;  %v6044_v36 = vld [vmem:[%s3724_s3 + $0x199] sm:$0xff]  ;;  %v6047_v9 = vld [vmem:[%s3724_s3 + $0x1a1] sm:$0xff] }
  0xff   : > { %9487 = vst [vmem:[#allocation26_spill] sm:$0xff] %v5999_v58  ;;  %9488 = vst [vmem:[#allocation27_spill] sm:$0xff] %v6010_v29  ;;  %v1342_v16 = vmul.f32 %v5975_v18, %v9484_v25  ;;  %v1343_v46 = vmul.f32 %v5978_v40, %v9484_v25  ;;  %v1344_v17 = vmul.f32 %v5981_v0, %v9484_v25 }
 0x100   : > { %9489 = vst [vmem:[#allocation29_spill] sm:$0xff] %v6013_v41  ;;  %9490 = vst [vmem:[#allocation30_spill] sm:$0xff] %v6016_v53  ;;  %v1345_v38 = vmul.f32 %v5984_v59, %v9484_v25  ;;  %v1346_v3 = vmul.f32 %v5993_v48, %v9484_v25  ;;  %v1347_v2 = vmul.f32 %v5996_v54, %v9484_v25 }
 0x101   : > { %9491 = vst [vmem:[#allocation31_spill] sm:$0xff] %v6027_v14  ;;  %9493 = vst [vmem:[#allocation15_spill] sm:$0xff] %v6033_v55  ;;  %v1348_v18 = vmul.f32 %v5999_v58, %v9484_v25  ;;  %v1349_v6 = vmul.f32 %v6010_v29, %v9484_v25  ;;  %v1350_v40 = vmul.f32 %v6013_v41, %v9484_v25  ;;  %v9496_v58 = vld [vmem:[#allocation11_spill] sm:$0xff]  ;;  %v9497_v29 = vld [vmem:[#allocation21_spill] sm:$0xff] }
 0x102   : > { %9494 = vst [vmem:[#allocation114_spill] sm:$0xff] %v6044_v36  ;;  %9495 = vst [vmem:[#allocation115_spill] sm:$0xff] %v6047_v9  ;;  %v1351_v0 = vmul.f32 %v6016_v53, %v9484_v25  ;;  %v1352_v59 = vmul.f32 %v6027_v14, %v9484_v25  ;;  %v1353_v48 = vmul.f32 %v6030_v21, %v9484_v25 }
 0x103   : > { %v1354_v54 = vmul.f32 %v6033_v55, %v9484_v25  ;;  %v1355_v28 = vmul.f32 %v9496_v58, %v9484_v25  ;;  %v1356_v32 = vmul.f32 %v9497_v29, %v9484_v25  ;;  %v1357_v41 = vmul.f32 %v6044_v36, %v9484_v25  ;;  %v6274_v36 = vld [vmem:[%s3724_s3 + $0x16a] sm:$0xff] }
 0x104   : > { %v1358_v53 = vmul.f32 %v6047_v9, %v9484_v25  ;;  %v6082_v14 = vadd.f32 %v1327_v49, %v5838_v61  ;;  %v6085_v21 = vadd.f32 %v1328_v51, %v5841_v60  ;;  %v6088_v55 = vadd.f32 %v1329_v33, %v5844_v47  ;;  %v9519_v49 = vld [vmem:[#allocation106_spill] sm:$0xff]  ;;  %v9521_v51 = vld [vmem:[#allocation107_spill] sm:$0xff]  ;;  %9539 = vst [vmem:[#allocation42_spill] sm:$0xff] %v6274_v36 }
 0x105   : > { %v6091_v58 = vadd.f32 %v1330_v34, %v5847_v10  ;;  %v6094_v29 = vadd.f32 %v1331_v7, %v5850_v56  ;;  %v6097_v25 = vadd.f32 %v1332_v62, %v5853_v35  ;;  %v6100_v61 = vadd.f32 %v1333_v50, %v5856_v43  ;;  %v9523_v34 = vld [vmem:[#allocation108_spill] sm:$0xff]  ;;  %v6219_v62 = vld [vmem:[%s3724_s3 + $0xe2] sm:$0xff] }
 0x106   : > { %v6103_v60 = vadd.f32 %v1334_v5, %v5859_v42  ;;  %v6106_v47 = vadd.f32 %v1335_v27, %v5862_v11  ;;  %v6109_v10 = vadd.f32 %v1336_v63, %v5865_v52  ;;  %v6112_v56 = vadd.f32 %v1337_v37, %v5868_v12  ;;  %v3065_v27 = vld [vmem:[%s3724_s3 + $0x32] sm:$0xff]  ;;  %v3066_v12 = vld [vmem:[%s3724_s3 + $0x3a] sm:$0xff]  ;;  %v6132_v63 = vld [vmem:[%s3724_s3 + $0x4a] sm:$0xff]  ;;  %9527 = vst [vmem:[#allocation137_spill] sm:$0xff] %v6219_v62 }
 0x107   : > { %v6115_v35 = vadd.f32 %v1338_v1, %v5871_v30  ;;  %v6118_v43 = vadd.f32 %v1339_v45, %v5874_v26  ;;  %v6121_v42 = vadd.f32 %v1340_v4, %v5877_v19  ;;  %v6124_v11 = vadd.f32 %v1341_v13, %v5880_v15  ;;  %9498 = vst [vmem:[#allocation116_spill] sm:$0xff] %v6132_v63  ;;  %v6135_v1 = vld [vmem:[%s3724_s3 + $0x52] sm:$0xff]  ;;  %v6153_v37 = vld [vmem:[%s3724_s3 + $0x6a] sm:$0xff]  ;;  %v6156_v4 = vld [vmem:[%s3724_s3 + $0x7a] sm:$0xff] }
 0x108   : > { %v6127_v52 = vadd.f32 %v1342_v16, %v5883_v44  ;;  %9499 = vst [vmem:[#allocation117_spill] sm:$0xff] %v6135_v1  ;;  %v6138_v30 = vadd.f32 %v1343_v46, %v5894_v24  ;;  %v6141_v26 = vadd.f32 %v1344_v17, %v5897_v31  ;;  %v6144_v19 = vadd.f32 %v1345_v38, %v5900_v20  ;;  %v6150_v44 = vld [vmem:[%s3724_s3 + $0x62] sm:$0xff]  ;;  %v6174_v17 = vld [vmem:[%s3724_s3 + $0x92] sm:$0xff]  ;;  %v6177_v16 = vld [vmem:[%s3724_s3 + $0x9a] sm:$0xff] }
 0x109   : > { %v6147_v15 = vadd.f32 %v1346_v3, %v5903_v39  ;;  %9500 = vst [vmem:[#allocation118_spill] sm:$0xff] %v6150_v44  ;;  %9501 = vst [vmem:[#allocation119_spill] sm:$0xff] %v6153_v37  ;;  %v6159_v24 = vadd.f32 %v1347_v2, %v5915_v57  ;;  %v6162_v31 = vadd.f32 %v1348_v18, %v5918_v22  ;;  %v6171_v13 = vld [vmem:[%s3724_s3 + $0x82] sm:$0xff]  ;;  %v9508_v38 = vld [vmem:[#allocation99_spill] sm:$0xff] }
 0x10a   : > { %9502 = vst [vmem:[#allocation120_spill] sm:$0xff] %v6156_v4  ;;  %v6165_v20 = vadd.f32 %v1349_v6, %v5921_v23  ;;  %v6168_v39 = vadd.f32 %v1350_v40, %v5924_v8  ;;  %9503 = vst [vmem:[#allocation121_spill] sm:$0xff] %v6171_v13  ;;  %v9506_v57 = vld [vmem:[#allocation98_spill] sm:$0xff]  ;;  %v6183_v23 = vadd.f32 %v1352_v59, %v9508_v38  ;;  %v9510_v6 = vld [vmem:[#allocation100_spill] sm:$0xff] }
 0x10b   : > { %9504 = vst [vmem:[#allocation123_spill] sm:$0xff] %v6174_v17  ;;  %9505 = vst [vmem:[#allocation124_spill] sm:$0xff] %v6177_v16  ;;  %v6180_v22 = vadd.f32 %v1351_v0, %v9506_v57  ;;  %v6186_v8 = vadd.f32 %v1353_v48, %v9510_v6  ;;  %v9512_v46 = vld [vmem:[#allocation101_spill] sm:$0xff]  ;;  %v6192_v3 = vld [vmem:[%s3724_s3 + $0xaa] sm:$0xff]  ;;  %v6204_v59 = vadd.f32 %v1356_v32, %v9519_v49 }
 0x10c   : > { %9509 = vst [vmem:[#allocation126_spill] sm:$0xff] %v6183_v23  ;;  %v6189_v45 = vadd.f32 %v1354_v54, %v9512_v46  ;;  %9514 = vst [vmem:[#allocation129_spill] sm:$0xff] %v6192_v3  ;;  %v6195_v2 = vld [vmem:[%s3724_s3 + $0xb2] sm:$0xff]  ;;  %v6198_v18 = vld [vmem:[%s3724_s3 + $0xc2] sm:$0xff]  ;;  %v6207_v33 = vadd.f32 %v1357_v41, %v9521_v51  ;;  %v6210_v48 = vadd.f32 %v1358_v53, %v9523_v34 }
 0x10d   : > { %9507 = vst [vmem:[#allocation125_spill] sm:$0xff] %v6180_v22  ;;  %9511 = vst [vmem:[#allocation127_spill] sm:$0xff] %v6186_v8  ;;  %v9517_v40 = vld [vmem:[#allocation105_spill] sm:$0xff]  ;;  %v6213_v54 = vld [vmem:[%s3724_s3 + $0xca] sm:$0xff] }
 0x10e   : > { %9513 = vst [vmem:[#allocation128_spill] sm:$0xff] %v6189_v45  ;;  %9515 = vst [vmem:[#allocation130_spill] sm:$0xff] %v6195_v2  ;;  %v6201_v0 = vadd.f32 %v1355_v28, %v9517_v40  ;;  %v6216_v7 = vld [vmem:[%s3724_s3 + $0xda] sm:$0xff]  ;;  %v6222_v28 = vld [vmem:[%s3724_s3 + $0xf2] sm:$0xff] }
 0x10f   : > { %9516 = vst [vmem:[#allocation131_spill] sm:$0xff] %v6198_v18  ;;  %9520 = vst [vmem:[#allocation132_spill] sm:$0xff] %v6204_v59  ;;  %v6225_v50 = vld [vmem:[%s3724_s3 + $0xfa] sm:$0xff]  ;;  %v6228_v32 = vld [vmem:[%s3724_s3 + $0x10a] sm:$0xff] }
 0x110   : > { %9518 = vst [vmem:[#allocation10_spill] sm:$0xff] %v6201_v0  ;;  %9522 = vst [vmem:[#allocation133_spill] sm:$0xff] %v6207_v33  ;;  %v9531_v41 = vld [vmem:[#allocation49_spill] sm:$0xff]  ;;  %v6237_v6 = vld [vmem:[%s3724_s3 + $0x112] sm:$0xff] }
 0x111   : > { %9524 = vst [vmem:[#allocation134_spill] sm:$0xff] %v6210_v48  ;;  %9525 = vst [vmem:[#allocation135_spill] sm:$0xff] %v6213_v54  ;;  %v1427_v5 = vmul.f32 %v3065_v27, %v9531_v41  ;;  %v1428_v53 = vmul.f32 %v3066_v12, %v9531_v41  ;;  %v1429_v57 = vmul.f32 %v6132_v63, %v9531_v41  ;;  %v6240_v46 = vld [vmem:[%s3724_s3 + $0x122] sm:$0xff]  ;;  %v6243_v40 = vld [vmem:[%s3724_s3 + $0x12a] sm:$0xff] }
 0x112   : > { %9526 = vst [vmem:[#allocation136_spill] sm:$0xff] %v6216_v7  ;;  %9528 = vst [vmem:[#allocation138_spill] sm:$0xff] %v6222_v28  ;;  %v1430_v38 = vmul.f32 %v6135_v1, %v9531_v41  ;;  %v1431_v27 = vmul.f32 %v6150_v44, %v9531_v41  ;;  %v1432_v12 = vmul.f32 %v6153_v37, %v9531_v41  ;;  %v6254_v34 = vld [vmem:[%s3724_s3 + $0x13a] sm:$0xff]  ;;  %v6257_v1 = vld [vmem:[%s3724_s3 + $0x142] sm:$0xff] }
 0x113   : > { %9529 = vst [vmem:[#allocation139_spill] sm:$0xff] %v6225_v50  ;;  %9530 = vst [vmem:[#allocation140_spill] sm:$0xff] %v6228_v32  ;;  %v1433_v49 = vmul.f32 %v6156_v4, %v9531_v41  ;;  %v1434_v51 = vmul.f32 %v6171_v13, %v9531_v41  ;;  %v6260_v63 = vld [vmem:[%s3724_s3 + $0x152] sm:$0xff]  ;;  %v1435_v44 = vmul.f32 %v6174_v17, %v9531_v41  ;;  %v6271_v13 = vld [vmem:[%s3724_s3 + $0x15a] sm:$0xff] }
 0x114   : > { %9532 = vst [vmem:[#allocation141_spill] sm:$0xff] %v6237_v6  ;;  %9533 = vst [vmem:[#allocation142_spill] sm:$0xff] %v6240_v46  ;;  %v1436_v37 = vmul.f32 %v6177_v16, %v9531_v41  ;;  %v1437_v4 = vmul.f32 %v6192_v3, %v9531_v41  ;;  %v1438_v9 = vmul.f32 %v6195_v2, %v9531_v41  ;;  %v6277_v48 = vld [vmem:[%s3724_s3 + $0x172] sm:$0xff]  ;;  %v6288_v59 = vld [vmem:[%s3724_s3 + $0x19a] sm:$0xff] }
 0x115   : > { %9534 = vst [vmem:[#allocation35_spill] sm:$0xff] %v6243_v40  ;;  %9535 = vst [vmem:[#allocation37_spill] sm:$0xff] %v6254_v34  ;;  %v1439_v33 = vmul.f32 %v6198_v18, %v9531_v41  ;;  %v1440_v17 = vmul.f32 %v6213_v54, %v9531_v41  ;;  %v1441_v16 = vmul.f32 %v6216_v7, %v9531_v41  ;;  %v6291_v2 = vld [vmem:[%s3724_s3 + $0x1a2] sm:$0xff] }
 0x116   : > { %9536 = vst [vmem:[#allocation38_spill] sm:$0xff] %v6257_v1  ;;  %9537 = vst [vmem:[#allocation39_spill] sm:$0xff] %v6260_v63  ;;  %v1442_v3 = vmul.f32 %v6219_v62, %v9531_v41  ;;  %v1443_v0 = vmul.f32 %v6222_v28, %v9531_v41  ;;  %v1444_v45 = vmul.f32 %v6225_v50, %v9531_v41 }
 0x117   : > { %9538 = vst [vmem:[#allocation41_spill] sm:$0xff] %v6271_v13  ;;  %9540 = vst [vmem:[#allocation16_spill] sm:$0xff] %v6277_v48  ;;  %v1445_v18 = vmul.f32 %v6228_v32, %v9531_v41  ;;  %v1446_v54 = vmul.f32 %v6237_v6, %v9531_v41  ;;  %v1447_v7 = vmul.f32 %v6240_v46, %v9531_v41 }
 0x118   : > { %9541 = vst [vmem:[#allocation17_spill] sm:$0xff] %v6288_v59  ;;  %9542 = vst [vmem:[#allocation143_spill] sm:$0xff] %v6291_v2  ;;  %v1448_v62 = vmul.f32 %v6243_v40, %v9531_v41  ;;  %v1449_v8 = vmul.f32 %v6254_v34, %v9531_v41  ;;  %v1450_v28 = vmul.f32 %v6257_v1, %v9531_v41  ;;  %v9543_v40 = vld [vmem:[#allocation33_spill] sm:$0xff]  ;;  %v9544_v34 = vld [vmem:[#allocation34_spill] sm:$0xff] }
 0x119   : > { %v1451_v50 = vmul.f32 %v6260_v63, %v9531_v41  ;;  %v1452_v32 = vmul.f32 %v6271_v13, %v9531_v41  ;;  %v1453_v6 = vmul.f32 %v6274_v36, %v9531_v41  ;;  %v1454_v46 = vmul.f32 %v6277_v48, %v9531_v41 }
 0x11a   : > { %v1455_v23 = vmul.f32 %v9543_v40, %v9531_v41  ;;  %v1456_v22 = vmul.f32 %v9544_v34, %v9531_v41  ;;  %v1457_v1 = vmul.f32 %v6288_v59, %v9531_v41  ;;  %v1458_v63 = vmul.f32 %v6291_v2, %v9531_v41  ;;  %v6518_v59 = vld [vmem:[%s3724_s3 + $0x16b] sm:$0xff] }
 0x11b   : > { %v6326_v13 = vadd.f32 %v1427_v5, %v6082_v14  ;;  %v6329_v36 = vadd.f32 %v1428_v53, %v6085_v21  ;;  %v6332_v48 = vadd.f32 %v1429_v57, %v6088_v55  ;;  %v6335_v40 = vadd.f32 %v1430_v38, %v6091_v58  ;;  %v9566_v5 = vld [vmem:[#allocation132_spill] sm:$0xff]  ;;  %v9568_v53 = vld [vmem:[#allocation133_spill] sm:$0xff]  ;;  %v9570_v38 = vld [vmem:[#allocation134_spill] sm:$0xff]  ;;  %9586 = vst [vmem:[#allocation36_spill] sm:$0xff] %v6518_v59 }
 0x11c   : > { %v6338_v34 = vadd.f32 %v1431_v27, %v6094_v29  ;;  %v6341_v41 = vadd.f32 %v1432_v12, %v6097_v25  ;;  %v6344_v14 = vadd.f32 %v1433_v49, %v6100_v61  ;;  %v6347_v21 = vadd.f32 %v1434_v51, %v6103_v60  ;;  %v6460_v27 = vld [vmem:[%s3724_s3 + $0xdb] sm:$0xff]  ;;  %v6463_v12 = vld [vmem:[%s3724_s3 + $0xe3] sm:$0xff] }
 0x11d   : > { %v6350_v55 = vadd.f32 %v1435_v44, %v6106_v47  ;;  %v6353_v58 = vadd.f32 %v1436_v37, %v6109_v10  ;;  %v6356_v29 = vadd.f32 %v1437_v4, %v6112_v56  ;;  %v6359_v25 = vadd.f32 %v1438_v9, %v6115_v35  ;;  %v3097_v44 = vld [vmem:[%s3724_s3 + $0x33] sm:$0xff]  ;;  %v3098_v56 = vld [vmem:[%s3724_s3 + $0x3b] sm:$0xff]  ;;  %v6376_v37 = vld [vmem:[%s3724_s3 + $0x4b] sm:$0xff]  ;;  %9573 = vst [vmem:[#allocation166_spill] sm:$0xff] %v6460_v27 }
 0x11e   : > { %v6362_v61 = vadd.f32 %v1439_v33, %v6118_v43  ;;  %v6365_v60 = vadd.f32 %v1440_v17, %v6121_v42  ;;  %v6368_v47 = vadd.f32 %v1441_v16, %v6124_v11  ;;  %v6371_v10 = vadd.f32 %v1442_v3, %v6127_v52  ;;  %9545 = vst [vmem:[#allocation144_spill] sm:$0xff] %v6376_v37  ;;  %v6379_v9 = vld [vmem:[%s3724_s3 + $0x53] sm:$0xff]  ;;  %v6394_v52 = vld [vmem:[%s3724_s3 + $0x63] sm:$0xff]  ;;  %v6397_v4 = vld [vmem:[%s3724_s3 + $0x6b] sm:$0xff] }
 0x11f   : > { %9546 = vst [vmem:[#allocation145_spill] sm:$0xff] %v6379_v9  ;;  %v6382_v35 = vadd.f32 %v1443_v0, %v6138_v30  ;;  %v6385_v43 = vadd.f32 %v1444_v45, %v6141_v26  ;;  %v6388_v42 = vadd.f32 %v1445_v18, %v6144_v19  ;;  %v6391_v11 = vadd.f32 %v1446_v54, %v6147_v15  ;;  %v6400_v17 = vld [vmem:[%s3724_s3 + $0x7b] sm:$0xff]  ;;  %v6415_v16 = vld [vmem:[%s3724_s3 + $0x83] sm:$0xff]  ;;  %v6418_v45 = vld [vmem:[%s3724_s3 + $0x93] sm:$0xff] }
 0x120   : > { %9547 = vst [vmem:[#allocation146_spill] sm:$0xff] %v6394_v52  ;;  %9548 = vst [vmem:[#allocation147_spill] sm:$0xff] %v6397_v4  ;;  %v6403_v30 = vadd.f32 %v1447_v7, %v6159_v24  ;;  %v6406_v26 = vadd.f32 %v1448_v62, %v6162_v31  ;;  %v6409_v19 = vadd.f32 %v1449_v8, %v6165_v20  ;;  %v6421_v3 = vld [vmem:[%s3724_s3 + $0x9b] sm:$0xff]  ;;  %v9555_v18 = vld [vmem:[#allocation126_spill] sm:$0xff] }
 0x121   : > { %9549 = vst [vmem:[#allocation148_spill] sm:$0xff] %v6400_v17  ;;  %v6412_v15 = vadd.f32 %v1450_v28, %v6168_v39  ;;  %9550 = vst [vmem:[#allocation152_spill] sm:$0xff] %v6415_v16  ;;  %v9553_v24 = vld [vmem:[#allocation125_spill] sm:$0xff]  ;;  %v6427_v20 = vadd.f32 %v1452_v32, %v9555_v18  ;;  %v9557_v8 = vld [vmem:[#allocation127_spill] sm:$0xff]  ;;  %v6448_v32 = vadd.f32 %v1456_v22, %v9566_v5 }
 0x122   : > { %9551 = vst [vmem:[#allocation153_spill] sm:$0xff] %v6418_v45  ;;  %9552 = vst [vmem:[#allocation154_spill] sm:$0xff] %v6421_v3  ;;  %v6424_v31 = vadd.f32 %v1451_v50, %v9553_v24  ;;  %v6430_v39 = vadd.f32 %v1453_v6, %v9557_v8  ;;  %v9559_v0 = vld [vmem:[#allocation128_spill] sm:$0xff]  ;;  %v6436_v54 = vld [vmem:[%s3724_s3 + $0xab] sm:$0xff]  ;;  %v6451_v57 = vadd.f32 %v1457_v1, %v9568_v53 }
 0x123   : > { %9556 = vst [vmem:[#allocation156_spill] sm:$0xff] %v6427_v20  ;;  %v6433_v33 = vadd.f32 %v1454_v46, %v9559_v0  ;;  %9561 = vst [vmem:[#allocation159_spill] sm:$0xff] %v6436_v54  ;;  %v6439_v7 = vld [vmem:[%s3724_s3 + $0xb3] sm:$0xff]  ;;  %v6442_v62 = vld [vmem:[%s3724_s3 + $0xc3] sm:$0xff]  ;;  %v6454_v6 = vadd.f32 %v1458_v63, %v9570_v38 }
 0x124   : > { %9554 = vst [vmem:[#allocation155_spill] sm:$0xff] %v6424_v31  ;;  %9558 = vst [vmem:[#allocation157_spill] sm:$0xff] %v6430_v39  ;;  %v9564_v28 = vld [vmem:[#allocation10_spill] sm:$0xff]  ;;  %v6469_v49 = vld [vmem:[%s3724_s3 + $0xfb] sm:$0xff] }
 0x125   : > { %9560 = vst [vmem:[#allocation158_spill] sm:$0xff] %v6433_v33  ;;  %9562 = vst [vmem:[#allocation160_spill] sm:$0xff] %v6439_v7  ;;  %v6445_v50 = vadd.f32 %v1455_v23, %v9564_v28  ;;  %v6457_v46 = vld [vmem:[%s3724_s3 + $0xcb] sm:$0xff]  ;;  %v6466_v23 = vld [vmem:[%s3724_s3 + $0xf3] sm:$0xff] }
 0x126   : > { %9563 = vst [vmem:[#allocation161_spill] sm:$0xff] %v6442_v62  ;;  %9567 = vst [vmem:[#allocation163_spill] sm:$0xff] %v6448_v32  ;;  %v6472_v22 = vld [vmem:[%s3724_s3 + $0x10b] sm:$0xff]  ;;  %v6481_v8 = vld [vmem:[%s3724_s3 + $0x113] sm:$0xff] }
 0x127   : > { %9565 = vst [vmem:[#allocation162_spill] sm:$0xff] %v6445_v50  ;;  %9569 = vst [vmem:[#allocation12_spill] sm:$0xff] %v6451_v57  ;;  %v9578_v1 = vld [vmem:[#allocation51_spill] sm:$0xff]  ;;  %v6484_v0 = vld [vmem:[%s3724_s3 + $0x123] sm:$0xff] }
 0x128   : > { %9571 = vst [vmem:[#allocation164_spill] sm:$0xff] %v6454_v6  ;;  %9572 = vst [vmem:[#allocation165_spill] sm:$0xff] %v6457_v46  ;;  %v1527_v51 = vmul.f32 %v3097_v44, %v9578_v1  ;;  %v1528_v63 = vmul.f32 %v3098_v56, %v9578_v1  ;;  %v1529_v24 = vmul.f32 %v6376_v37, %v9578_v1  ;;  %v6487_v28 = vld [vmem:[%s3724_s3 + $0x12b] sm:$0xff]  ;;  %v6498_v38 = vld [vmem:[%s3724_s3 + $0x13b] sm:$0xff] }
 0x129   : > { %9574 = vst [vmem:[#allocation167_spill] sm:$0xff] %v6463_v12  ;;  %9575 = vst [vmem:[#allocation168_spill] sm:$0xff] %v6466_v23  ;;  %v1530_v18 = vmul.f32 %v6379_v9, %v9578_v1  ;;  %v1531_v44 = vmul.f32 %v6394_v52, %v9578_v1  ;;  %v1532_v56 = vmul.f32 %v6397_v4, %v9578_v1  ;;  %v6501_v9 = vld [vmem:[%s3724_s3 + $0x143] sm:$0xff]  ;;  %v6504_v37 = vld [vmem:[%s3724_s3 + $0x153] sm:$0xff] }
 0x12a   : > { %9576 = vst [vmem:[#allocation169_spill] sm:$0xff] %v6469_v49  ;;  %9577 = vst [vmem:[#allocation170_spill] sm:$0xff] %v6472_v22  ;;  %v1533_v5 = vmul.f32 %v6400_v17, %v9578_v1  ;;  %v1534_v53 = vmul.f32 %v6415_v16, %v9578_v1  ;;  %v1535_v52 = vmul.f32 %v6418_v45, %v9578_v1  ;;  %v6515_v16 = vld [vmem:[%s3724_s3 + $0x15b] sm:$0xff]  ;;  %v6521_v6 = vld [vmem:[%s3724_s3 + $0x173] sm:$0xff] }
 0x12b   : > { %9579 = vst [vmem:[#allocation171_spill] sm:$0xff] %v6481_v8  ;;  %9580 = vst [vmem:[#allocation172_spill] sm:$0xff] %v6484_v0  ;;  %v1536_v4 = vmul.f32 %v6421_v3, %v9578_v1  ;;  %v1537_v17 = vmul.f32 %v6436_v54, %v9578_v1  ;;  %v1538_v2 = vmul.f32 %v6439_v7, %v9578_v1  ;;  %v6532_v32 = vld [vmem:[%s3724_s3 + $0x19b] sm:$0xff]  ;;  %v6535_v7 = vld [vmem:[%s3724_s3 + $0x1a3] sm:$0xff] }
 0x12c   : > { %9581 = vst [vmem:[#allocation173_spill] sm:$0xff] %v6487_v28  ;;  %9582 = vst [vmem:[#allocation174_spill] sm:$0xff] %v6498_v38  ;;  %v1539_v57 = vmul.f32 %v6442_v62, %v9578_v1  ;;  %v1540_v45 = vmul.f32 %v6457_v46, %v9578_v1  ;;  %v1541_v3 = vmul.f32 %v6460_v27, %v9578_v1 }
 0x12d   : > { %9583 = vst [vmem:[#allocation24_spill] sm:$0xff] %v6501_v9  ;;  %9584 = vst [vmem:[#allocation28_spill] sm:$0xff] %v6504_v37  ;;  %v1542_v54 = vmul.f32 %v6463_v12, %v9578_v1  ;;  %v1543_v50 = vmul.f32 %v6466_v23, %v9578_v1  ;;  %v1544_v33 = vmul.f32 %v6469_v49, %v9578_v1 }
 0x12e   : > { %9585 = vst [vmem:[#allocation32_spill] sm:$0xff] %v6515_v16  ;;  %9587 = vst [vmem:[#allocation40_spill] sm:$0xff] %v6521_v6  ;;  %v1545_v62 = vmul.f32 %v6472_v22, %v9578_v1  ;;  %v1546_v46 = vmul.f32 %v6481_v8, %v9578_v1  ;;  %v1547_v27 = vmul.f32 %v6484_v0, %v9578_v1 }
 0x12f   : > { %9588 = vst [vmem:[#allocation43_spill] sm:$0xff] %v6532_v32  ;;  %9589 = vst [vmem:[#allocation46_spill] sm:$0xff] %v6535_v7  ;;  %v1548_v12 = vmul.f32 %v6487_v28, %v9578_v1  ;;  %v1549_v39 = vmul.f32 %v6498_v38, %v9578_v1  ;;  %v1550_v23 = vmul.f32 %v6501_v9, %v9578_v1  ;;  %v9590_v28 = vld [vmem:[#allocation18_spill] sm:$0xff]  ;;  %v9591_v38 = vld [vmem:[#allocation20_spill] sm:$0xff] }
 0x130   : > { %v1551_v49 = vmul.f32 %v6504_v37, %v9578_v1  ;;  %v1552_v22 = vmul.f32 %v6515_v16, %v9578_v1  ;;  %v1553_v8 = vmul.f32 %v6518_v59, %v9578_v1  ;;  %v1554_v0 = vmul.f32 %v6521_v6, %v9578_v1 }
 0x131   : > { %v1555_v20 = vmul.f32 %v9590_v28, %v9578_v1  ;;  %v1556_v31 = vmul.f32 %v9591_v38, %v9578_v1  ;;  %v1557_v9 = vmul.f32 %v6532_v32, %v9578_v1  ;;  %v1558_v37 = vmul.f32 %v6535_v7, %v9578_v1  ;;  %v6762_v32 = vld [vmem:[%s3724_s3 + $0x16c] sm:$0xff] }
 0x132   : > { %v6570_v16 = vadd.f32 %v1527_v51, %v6326_v13  ;;  %v6573_v59 = vadd.f32 %v1528_v63, %v6329_v36  ;;  %v6576_v6 = vadd.f32 %v1529_v24, %v6332_v48  ;;  %v6579_v28 = vadd.f32 %v1530_v18, %v6335_v40  ;;  %v9613_v51 = vld [vmem:[#allocation163_spill] sm:$0xff]  ;;  %v9615_v63 = vld [vmem:[#allocation12_spill] sm:$0xff]  ;;  %9633 = vst [vmem:[#allocation128_spill] sm:$0xff] %v6762_v32 }
 0x133   : > { %v6582_v38 = vadd.f32 %v1531_v44, %v6338_v34  ;;  %v6585_v1 = vadd.f32 %v1532_v56, %v6341_v41  ;;  %v6588_v13 = vadd.f32 %v1533_v5, %v6344_v14  ;;  %v6591_v36 = vadd.f32 %v1534_v53, %v6347_v21  ;;  %v9617_v18 = vld [vmem:[#allocation164_spill] sm:$0xff]  ;;  %v6707_v56 = vld [vmem:[%s3724_s3 + $0xe4] sm:$0xff] }
 0x134   : > { %v6594_v48 = vadd.f32 %v1535_v52, %v6350_v55  ;;  %v6597_v40 = vadd.f32 %v1536_v4, %v6353_v58  ;;  %v6600_v34 = vadd.f32 %v1537_v17, %v6356_v29  ;;  %v6603_v41 = vadd.f32 %v1538_v2, %v6359_v25  ;;  %v3129_v52 = vld [vmem:[%s3724_s3 + $0x34] sm:$0xff]  ;;  %v3130_v29 = vld [vmem:[%s3724_s3 + $0x3c] sm:$0xff]  ;;  %v6620_v4 = vld [vmem:[%s3724_s3 + $0x4c] sm:$0xff]  ;;  %9621 = vst [vmem:[#allocation101_spill] sm:$0xff] %v6707_v56 }
 0x135   : > { %v6606_v14 = vadd.f32 %v1539_v57, %v6362_v61  ;;  %v6609_v21 = vadd.f32 %v1540_v45, %v6365_v60  ;;  %v6612_v55 = vadd.f32 %v1541_v3, %v6368_v47  ;;  %v6615_v58 = vadd.f32 %v1542_v54, %v6371_v10  ;;  %9592 = vst [vmem:[#allocation50_spill] sm:$0xff] %v6620_v4  ;;  %v6623_v2 = vld [vmem:[%s3724_s3 + $0x54] sm:$0xff]  ;;  %v6638_v10 = vld [vmem:[%s3724_s3 + $0x64] sm:$0xff]  ;;  %v6641_v17 = vld [vmem:[%s3724_s3 + $0x6c] sm:$0xff] }
 0x136   : > { %9593 = vst [vmem:[#allocation44_spill] sm:$0xff] %v6623_v2  ;;  %v6626_v25 = vadd.f32 %v1543_v50, %v6382_v35  ;;  %v6629_v61 = vadd.f32 %v1544_v33, %v6385_v43  ;;  %v6632_v60 = vadd.f32 %v1545_v62, %v6388_v42  ;;  %v6635_v47 = vadd.f32 %v1546_v46, %v6391_v11  ;;  %v6644_v45 = vld [vmem:[%s3724_s3 + $0x7c] sm:$0xff]  ;;  %v6659_v3 = vld [vmem:[%s3724_s3 + $0x84] sm:$0xff]  ;;  %v6662_v33 = vld [vmem:[%s3724_s3 + $0x94] sm:$0xff] }
 0x137   : > { %9594 = vst [vmem:[#allocation13_spill] sm:$0xff] %v6638_v10  ;;  %9595 = vst [vmem:[#allocation45_spill] sm:$0xff] %v6641_v17  ;;  %v6647_v35 = vadd.f32 %v1547_v27, %v6403_v30  ;;  %v6650_v43 = vadd.f32 %v1548_v12, %v6406_v26  ;;  %v6653_v42 = vadd.f32 %v1549_v39, %v6409_v19  ;;  %v6665_v54 = vld [vmem:[%s3724_s3 + $0x9c] sm:$0xff]  ;;  %v9600_v30 = vld [vmem:[#allocation155_spill] sm:$0xff] }
 0x138   : > { %9596 = vst [vmem:[#allocation47_spill] sm:$0xff] %v6644_v45  ;;  %v6656_v11 = vadd.f32 %v1550_v23, %v6412_v15  ;;  %9597 = vst [vmem:[#allocation149_spill] sm:$0xff] %v6659_v3  ;;  %v6668_v26 = vadd.f32 %v1551_v49, %v9600_v30  ;;  %v9602_v62 = vld [vmem:[#allocation156_spill] sm:$0xff]  ;;  %v9604_v39 = vld [vmem:[#allocation157_spill] sm:$0xff]  ;;  %v6695_v24 = vadd.f32 %v1557_v9, %v9615_v63 }
 0x139   : > { %9598 = vst [vmem:[#allocation150_spill] sm:$0xff] %v6662_v33  ;;  %9599 = vst [vmem:[#allocation65_spill] sm:$0xff] %v6665_v54  ;;  %v6671_v19 = vadd.f32 %v1552_v22, %v9602_v62  ;;  %v6674_v15 = vadd.f32 %v1553_v8, %v9604_v39  ;;  %v9606_v50 = vld [vmem:[#allocation158_spill] sm:$0xff]  ;;  %v6683_v27 = vld [vmem:[%s3724_s3 + $0xb4] sm:$0xff]  ;;  %v6692_v22 = vadd.f32 %v1556_v31, %v9613_v51 }
 0x13a   : > { %9601 = vst [vmem:[#allocation66_spill] sm:$0xff] %v6668_v26  ;;  %v6677_v57 = vadd.f32 %v1554_v0, %v9606_v50  ;;  %v6680_v46 = vld [vmem:[%s3724_s3 + $0xac] sm:$0xff]  ;;  %9609 = vst [vmem:[#allocation75_spill] sm:$0xff] %v6683_v27  ;;  %v6686_v12 = vld [vmem:[%s3724_s3 + $0xc4] sm:$0xff]  ;;  %v6698_v8 = vadd.f32 %v1558_v37, %v9617_v18 }
 0x13b   : > { %9603 = vst [vmem:[#allocation67_spill] sm:$0xff] %v6671_v19  ;;  %9605 = vst [vmem:[#allocation68_spill] sm:$0xff] %v6674_v15  ;;  %v9611_v23 = vld [vmem:[#allocation162_spill] sm:$0xff]  ;;  %v6704_v44 = vld [vmem:[%s3724_s3 + $0xdc] sm:$0xff] }
 0x13c   : > { %9607 = vst [vmem:[#allocation73_spill] sm:$0xff] %v6677_v57  ;;  %9608 = vst [vmem:[#allocation74_spill] sm:$0xff] %v6680_v46  ;;  %v6689_v49 = vadd.f32 %v1555_v20, %v9611_v23  ;;  %v6701_v0 = vld [vmem:[%s3724_s3 + $0xcc] sm:$0xff]  ;;  %v6710_v20 = vld [vmem:[%s3724_s3 + $0xf4] sm:$0xff] }
 0x13d   : > { %9610 = vst [vmem:[#allocation76_spill] sm:$0xff] %v6686_v12  ;;  %9614 = vst [vmem:[#allocation11_spill] sm:$0xff] %v6692_v22  ;;  %v6713_v5 = vld [vmem:[%s3724_s3 + $0xfc] sm:$0xff]  ;;  %v6716_v31 = vld [vmem:[%s3724_s3 + $0x10c] sm:$0xff] }
 0x13e   : > { %9612 = vst [vmem:[#allocation48_spill] sm:$0xff] %v6689_v49  ;;  %9616 = vst [vmem:[#allocation21_spill] sm:$0xff] %v6695_v24  ;;  %v9625_v9 = vld [vmem:[#allocation52_spill] sm:$0xff]  ;;  %v6728_v50 = vld [vmem:[%s3724_s3 + $0x124] sm:$0xff] }
 0x13f   : > { %9618 = vst [vmem:[#allocation98_spill] sm:$0xff] %v6698_v8  ;;  %9619 = vst [vmem:[#allocation99_spill] sm:$0xff] %v6701_v0  ;;  %v1627_v53 = vmul.f32 %v3129_v52, %v9625_v9  ;;  %v1628_v37 = vmul.f32 %v3130_v29, %v9625_v9  ;;  %v1629_v30 = vmul.f32 %v6620_v4, %v9625_v9  ;;  %v6725_v39 = vld [vmem:[%s3724_s3 + $0x114] sm:$0xff]  ;;  %v6731_v23 = vld [vmem:[%s3724_s3 + $0x12c] sm:$0xff] }
 0x140   : > { %9620 = vst [vmem:[#allocation100_spill] sm:$0xff] %v6704_v44  ;;  %9622 = vst [vmem:[#allocation105_spill] sm:$0xff] %v6710_v20  ;;  %v1630_v62 = vmul.f32 %v6623_v2, %v9625_v9  ;;  %v1631_v52 = vmul.f32 %v6638_v10, %v9625_v9  ;;  %v1632_v29 = vmul.f32 %v6641_v17, %v9625_v9  ;;  %v6742_v18 = vld [vmem:[%s3724_s3 + $0x13c] sm:$0xff]  ;;  %v6745_v2 = vld [vmem:[%s3724_s3 + $0x144] sm:$0xff] }
 0x141   : > { %9623 = vst [vmem:[#allocation106_spill] sm:$0xff] %v6713_v5  ;;  %9624 = vst [vmem:[#allocation107_spill] sm:$0xff] %v6716_v31  ;;  %v1633_v51 = vmul.f32 %v6644_v45, %v9625_v9  ;;  %v1634_v63 = vmul.f32 %v6659_v3, %v9625_v9  ;;  %v6748_v4 = vld [vmem:[%s3724_s3 + $0x154] sm:$0xff]  ;;  %v1635_v10 = vmul.f32 %v6662_v33, %v9625_v9  ;;  %v6759_v3 = vld [vmem:[%s3724_s3 + $0x15c] sm:$0xff] }
 0x142   : > { %9626 = vst [vmem:[#allocation108_spill] sm:$0xff] %v6725_v39  ;;  %9627 = vst [vmem:[#allocation49_spill] sm:$0xff] %v6728_v50  ;;  %v1636_v17 = vmul.f32 %v6665_v54, %v9625_v9  ;;  %v1637_v45 = vmul.f32 %v6680_v46, %v9625_v9  ;;  %v1638_v7 = vmul.f32 %v6683_v27, %v9625_v9  ;;  %v6765_v8 = vld [vmem:[%s3724_s3 + $0x174] sm:$0xff]  ;;  %v6776_v22 = vld [vmem:[%s3724_s3 + $0x19c] sm:$0xff] }
 0x143   : > { %9628 = vst [vmem:[#allocation33_spill] sm:$0xff] %v6731_v23  ;;  %9629 = vst [vmem:[#allocation34_spill] sm:$0xff] %v6742_v18  ;;  %v1639_v24 = vmul.f32 %v6686_v12, %v9625_v9  ;;  %v1640_v33 = vmul.f32 %v6701_v0, %v9625_v9  ;;  %v1641_v54 = vmul.f32 %v6704_v44, %v9625_v9  ;;  %v6779_v27 = vld [vmem:[%s3724_s3 + $0x1a4] sm:$0xff] }
 0x144   : > { %9630 = vst [vmem:[#allocation125_spill] sm:$0xff] %v6745_v2  ;;  %9631 = vst [vmem:[#allocation126_spill] sm:$0xff] %v6748_v4  ;;  %v1642_v46 = vmul.f32 %v6707_v56, %v9625_v9  ;;  %v1643_v49 = vmul.f32 %v6710_v20, %v9625_v9  ;;  %v1644_v57 = vmul.f32 %v6713_v5, %v9625_v9 }
 0x145   : > { %9632 = vst [vmem:[#allocation127_spill] sm:$0xff] %v6759_v3  ;;  %9634 = vst [vmem:[#allocation10_spill] sm:$0xff] %v6765_v8  ;;  %v1645_v12 = vmul.f32 %v6716_v31, %v9625_v9  ;;  %v1646_v0 = vmul.f32 %v6725_v39, %v9625_v9  ;;  %v1647_v44 = vmul.f32 %v6728_v50, %v9625_v9 }
 0x146   : > { %9635 = vst [vmem:[#allocation132_spill] sm:$0xff] %v6776_v22  ;;  %9636 = vst [vmem:[#allocation133_spill] sm:$0xff] %v6779_v27  ;;  %v1648_v56 = vmul.f32 %v6731_v23, %v9625_v9  ;;  %v1649_v15 = vmul.f32 %v6742_v18, %v9625_v9  ;;  %v1650_v20 = vmul.f32 %v6745_v2, %v9625_v9  ;;  %v9637_v23 = vld [vmem:[#allocation55_spill] sm:$0xff]  ;;  %v9638_v18 = vld [vmem:[#allocation56_spill] sm:$0xff] }
 0x147   : > { %v1651_v5 = vmul.f32 %v6748_v4, %v9625_v9  ;;  %v1652_v31 = vmul.f32 %v6759_v3, %v9625_v9  ;;  %v1653_v39 = vmul.f32 %v6762_v32, %v9625_v9  ;;  %v1654_v50 = vmul.f32 %v6765_v8, %v9625_v9 }
 0x148   : > { %v1655_v19 = vmul.f32 %v9637_v23, %v9625_v9  ;;  %v1656_v26 = vmul.f32 %v9638_v18, %v9625_v9  ;;  %v1657_v2 = vmul.f32 %v6776_v22, %v9625_v9  ;;  %v1658_v4 = vmul.f32 %v6779_v27, %v9625_v9 }
 0x149   : > { %v6814_v3 = vadd.f32 %v1627_v53, %v6570_v16  ;;  %v6817_v32 = vadd.f32 %v1628_v37, %v6573_v59  ;;  %v6820_v8 = vadd.f32 %v1629_v30, %v6576_v6  ;;  %v6823_v23 = vadd.f32 %v1630_v62, %v6579_v28  ;;  %v9662_v53 = vld [vmem:[#allocation63_spill] sm:$0xff]  ;;  %v9663_v30 = vld [vmem:[#allocation64_spill] sm:$0xff] }
 0x14a   : > { %v6826_v18 = vadd.f32 %v1631_v52, %v6582_v38  ;;  %v6829_v22 = vadd.f32 %v1632_v29, %v6585_v1  ;;  %v6832_v9 = vadd.f32 %v1633_v51, %v6588_v13  ;;  %v6835_v16 = vadd.f32 %v1634_v63, %v6591_v36  ;;  %v9665_v52 = vld [vmem:[#allocation70_spill] sm:$0xff]  ;;  %v9666_v51 = vld [vmem:[#allocation71_spill] sm:$0xff] }
 0x14b   : > { %v6838_v59 = vadd.f32 %v1635_v10, %v6594_v48  ;;  %v6841_v6 = vadd.f32 %v1636_v17, %v6597_v40  ;;  %v6844_v28 = vadd.f32 %v1637_v45, %v6600_v34  ;;  %v6847_v38 = vadd.f32 %v1638_v7, %v6603_v41  ;;  %v9645_v45 = vld [vmem:[#allocation73_spill] sm:$0xff] }
 0x14c   : > { %v6850_v1 = vadd.f32 %v1639_v24, %v6606_v14  ;;  %v6853_v13 = vadd.f32 %v1640_v33, %v6609_v21  ;;  %v6856_v36 = vadd.f32 %v1641_v54, %v6612_v55  ;;  %v6859_v48 = vadd.f32 %v1642_v46, %v6615_v58 }
 0x14d   : > { %v6862_v40 = vadd.f32 %v1643_v49, %v6626_v25  ;;  %v6865_v34 = vadd.f32 %v1644_v57, %v6629_v61  ;;  %v6868_v7 = vadd.f32 %v1645_v12, %v6632_v60  ;;  %v6871_v41 = vadd.f32 %v1646_v0, %v6635_v47  ;;  %v9639_v25 = vld [vmem:[#allocation66_spill] sm:$0xff]  ;;  %v9641_v60 = vld [vmem:[#allocation67_spill] sm:$0xff]  ;;  %v9643_v47 = vld [vmem:[#allocation68_spill] sm:$0xff] }
 0x14e   : > { %v6874_v14 = vadd.f32 %v1647_v44, %v6647_v35  ;;  %v6877_v21 = vadd.f32 %v1648_v56, %v6650_v43  ;;  %v6880_v55 = vadd.f32 %v1649_v15, %v6653_v42  ;;  %v6883_v58 = vadd.f32 %v1650_v20, %v6656_v11  ;;  %v9647_v43 = vld [vmem:[#allocation48_spill] sm:$0xff]  ;;  %v9649_v42 = vld [vmem:[#allocation11_spill] sm:$0xff]  ;;  %v9651_v11 = vld [vmem:[#allocation21_spill] sm:$0xff] }
 0x14f   : > { %v6886_v61 = vadd.f32 %v1651_v5, %v9639_v25  ;;  %v6889_v10 = vadd.f32 %v1652_v31, %v9641_v60  ;;  %v6892_v17 = vadd.f32 %v1653_v39, %v9643_v47  ;;  %v6895_v35 = vadd.f32 %v1654_v50, %v9645_v45  ;;  %v9653_v57 = vld [vmem:[#allocation98_spill] sm:$0xff]  ;;  %v9655_v12 = vld [vmem:[#allocation53_spill] sm:$0xff]  ;;  %v9659_v20 = vld [vmem:[#allocation60_spill] sm:$0xff] }
 0x150   : > { %v6898_v33 = vadd.f32 %v1655_v19, %v9647_v43  ;;  %v6901_v54 = vadd.f32 %v1656_v26, %v9649_v42  ;;  %v6904_v15 = vadd.f32 %v1657_v2, %v9651_v11  ;;  %v6907_v46 = vadd.f32 %v1658_v4, %v9653_v57  ;;  %v9656_v49 = vld [vmem:[#allocation57_spill] sm:$0xff]  ;;  %v9657_v0 = vld [vmem:[#allocation58_spill] sm:$0xff]  ;;  %v9658_v19 = vld [vmem:[#allocation59_spill] sm:$0xff] }
 0x151   : > { %9640 = vst [vmem:[#allocation134_spill] sm:$0xff] %v6886_v61  ;;  %9642 = vst [vmem:[#allocation51_spill] sm:$0xff] %v6889_v10  ;;  %v1728_v24 = vmul.f32 %v9656_v49, %v9655_v12  ;;  %v1729_v44 = vmul.f32 %v9657_v0, %v9655_v12  ;;  %v1730_v56 = vmul.f32 %v9658_v19, %v9655_v12  ;;  %v9660_v5 = vld [vmem:[#allocation61_spill] sm:$0xff]  ;;  %v9661_v4 = vld [vmem:[#allocation62_spill] sm:$0xff] }
 0x152   : > { %9644 = vst [vmem:[#allocation18_spill] sm:$0xff] %v6892_v17  ;;  %9646 = vst [vmem:[#allocation20_spill] sm:$0xff] %v6895_v35  ;;  %v1731_v26 = vmul.f32 %v9659_v20, %v9655_v12  ;;  %v1732_v2 = vmul.f32 %v9660_v5, %v9655_v12  ;;  %v1733_v31 = vmul.f32 %v9661_v4, %v9655_v12  ;;  %v9664_v39 = vld [vmem:[#allocation69_spill] sm:$0xff]  ;;  %v9667_v25 = vld [vmem:[#allocation151_spill] sm:$0xff] }
 0x153   : > { %9648 = vst [vmem:[#allocation155_spill] sm:$0xff] %v6898_v33  ;;  %9650 = vst [vmem:[#allocation156_spill] sm:$0xff] %v6901_v54  ;;  %v1734_v37 = vmul.f32 %v9662_v53, %v9655_v12  ;;  %v1735_v62 = vmul.f32 %v9663_v30, %v9655_v12  ;;  %v1736_v50 = vmul.f32 %v9664_v39, %v9655_v12  ;;  %v6934_v47 = vld [vmem:[%s3724_s3 + $0x180] sm:$0xff]  ;;  %v6937_v45 = vld [vmem:[%s3724_s3 + $0x188] sm:$0xff] }
 0x154   : > { %9652 = vst [vmem:[#allocation157_spill] sm:$0xff] %v6904_v15  ;;  %9654 = vst [vmem:[#allocation158_spill] sm:$0xff] %v6907_v46  ;;  %v1737_v29 = vmul.f32 %v9665_v52, %v9655_v12  ;;  %v1738_v63 = vmul.f32 %v9666_v51, %v9655_v12  ;;  %v1739_v60 = vmul.f32 %v9667_v25, %v9655_v12  ;;  %v9670_v43 = vld [vmem:[#allocation122_spill] sm:$0xff]  ;;  %v9672_v49 = vld [vmem:[#allocation87_spill] sm:$0xff] }
 0x155   : > { %9668 = vst [vmem:[#allocation162_spill] sm:$0xff] %v6934_v47  ;;  %9669 = vst [vmem:[#allocation163_spill] sm:$0xff] %v6937_v45  ;;  %v1740_v42 = vmul.f32 %v9670_v43, %v9655_v12  ;;  %v9671_v11 = vld [vmem:[#allocation86_spill] sm:$0xff]  ;;  %v1742_v0 = vmul.f32 %v9672_v49, %v9655_v12  ;;  %v9673_v19 = vld [vmem:[#allocation88_spill] sm:$0xff] }
 0x156   : > { %v1741_v57 = vmul.f32 %v9671_v11, %v9655_v12  ;;  %v1743_v20 = vmul.f32 %v9673_v19, %v9655_v12  ;;  %v6948_v5 = vld [vmem:[%s3724_s3 + $0x1b0] sm:$0xff]  ;;  %v6951_v4 = vld [vmem:[%s3724_s3 + $0x1b8] sm:$0xff]  ;;  %v9677_v39 = vld [vmem:[#allocation93_spill] sm:$0xff] }
 0x157   : > { %9674 = vst [vmem:[#allocation12_spill] sm:$0xff] %v6948_v5  ;;  %9675 = vst [vmem:[#allocation164_spill] sm:$0xff] %v6951_v4  ;;  %v9676_v53 = vld [vmem:[#allocation92_spill] sm:$0xff]  ;;  %v1745_v52 = vmul.f32 %v9677_v39, %v9655_v12  ;;  %v9678_v51 = vld [vmem:[#allocation94_spill] sm:$0xff] }
 0x158   : > { %v1744_v30 = vmul.f32 %v9676_v53, %v9655_v12  ;;  %v1746_v25 = vmul.f32 %v9678_v51, %v9655_v12  ;;  %v9679_v43 = vld [vmem:[#allocation95_spill] sm:$0xff]  ;;  %v9681_v19 = vld [vmem:[#allocation77_spill] sm:$0xff]  ;;  %v9682_v15 = vld [vmem:[#allocation14_spill] sm:$0xff] }
 0x159   : > { %v1747_v11 = vmul.f32 %v9679_v43, %v9655_v12  ;;  %v9680_v49 = vld [vmem:[#allocation19_spill] sm:$0xff]  ;;  %v1749_v46 = vmul.f32 %v9681_v19, %v9655_v12  ;;  %v1750_v54 = vmul.f32 %v9682_v15, %v9655_v12  ;;  %v9683_v53 = vld [vmem:[#allocation78_spill] sm:$0xff]  ;;  %v9685_v51 = vld [vmem:[#allocation80_spill] sm:$0xff]  ;;  %v1754_v43 = vmul.f32 %v6934_v47, %v9655_v12 }
 0x15a   : > { %v1748_v27 = vmul.f32 %v9680_v49, %v9655_v12  ;;  %v1751_v33 = vmul.f32 %v9683_v53, %v9655_v12  ;;  %v9684_v39 = vld [vmem:[#allocation79_spill] sm:$0xff]  ;;  %v1753_v17 = vmul.f32 %v9685_v51, %v9655_v12  ;;  %v1755_v49 = vmul.f32 %v6937_v45, %v9655_v12  ;;  %v9686_v19 = vld [vmem:[#allocation81_spill] sm:$0xff]  ;;  %v9687_v15 = vld [vmem:[#allocation82_spill] sm:$0xff] }
 0x15b   : > { %v1752_v35 = vmul.f32 %v9684_v39, %v9655_v12  ;;  %v1756_v10 = vmul.f32 %v9686_v19, %v9655_v12  ;;  %v1757_v61 = vmul.f32 %v9687_v15, %v9655_v12  ;;  %v1758_v53 = vmul.f32 %v6948_v5, %v9655_v12 }
 0x15c   : > { %v1759_v39 = vmul.f32 %v6951_v4, %v9655_v12  ;;  %v6986_v51 = vadd.f32 %v1728_v24, %v6814_v3  ;;  %v6989_v47 = vadd.f32 %v1729_v44, %v6817_v32  ;;  %v6992_v45 = vadd.f32 %v1730_v56, %v6820_v8 }
 0x15d   : > { %v6995_v19 = vadd.f32 %v1731_v26, %v6823_v23  ;;  %v6998_v15 = vadd.f32 %v1732_v2, %v6826_v18  ;;  %v7001_v5 = vadd.f32 %v1733_v31, %v6829_v22  ;;  %v7004_v12 = vadd.f32 %v1734_v37, %v6832_v9  ;;  %v9704_v26 = vld [vmem:[#allocation54_spill] sm:$0xff]  ;;  %v9705_v2 = vld [vmem:[#allocation83_spill] sm:$0xff]  ;;  %v9706_v37 = vld [vmem:[#allocation84_spill] sm:$0xff] }
 0x15e   : > { %v7007_v3 = vadd.f32 %v1735_v62, %v6835_v16  ;;  %v7010_v32 = vadd.f32 %v1736_v50, %v6838_v59  ;;  %v7013_v8 = vadd.f32 %v1737_v29, %v6841_v6  ;;  %v7016_v23 = vadd.f32 %v1738_v63, %v6844_v28  ;;  %v9708_v29 = vld [vmem:[#allocation89_spill] sm:$0xff]  ;;  %v9709_v63 = vld [vmem:[#allocation90_spill] sm:$0xff] }
 0x15f   : > { %v7019_v18 = vadd.f32 %v1739_v60, %v6847_v38  ;;  %v7022_v22 = vadd.f32 %v1740_v42, %v6850_v1  ;;  %v7025_v9 = vadd.f32 %v1741_v57, %v6853_v13  ;;  %v7028_v16 = vadd.f32 %v1742_v0, %v6856_v36  ;;  %v9710_v42 = vld [vmem:[#allocation91_spill] sm:$0xff]  ;;  %v9711_v0 = vld [vmem:[#allocation96_spill] sm:$0xff] }
 0x160   : > { %v7031_v59 = vadd.f32 %v1743_v20, %v6859_v48  ;;  %v7034_v6 = vadd.f32 %v1744_v30, %v6862_v40  ;;  %v7037_v28 = vadd.f32 %v1745_v52, %v6865_v34  ;;  %v7040_v38 = vadd.f32 %v1746_v25, %v6868_v7  ;;  %v9688_v34 = vld [vmem:[#allocation134_spill] sm:$0xff]  ;;  %v9690_v7 = vld [vmem:[#allocation51_spill] sm:$0xff]  ;;  %v9712_v30 = vld [vmem:[#allocation97_spill] sm:$0xff] }
 0x161   : > { %v7043_v1 = vadd.f32 %v1747_v11, %v6871_v41  ;;  %v7046_v13 = vadd.f32 %v1748_v27, %v6874_v14  ;;  %v7049_v36 = vadd.f32 %v1749_v46, %v6877_v21  ;;  %v7052_v48 = vadd.f32 %v1750_v54, %v6880_v55  ;;  %v9692_v41 = vld [vmem:[#allocation18_spill] sm:$0xff]  ;;  %v9694_v27 = vld [vmem:[#allocation20_spill] sm:$0xff]  ;;  %v9696_v21 = vld [vmem:[#allocation155_spill] sm:$0xff] }
 0x162   : > { %v7055_v40 = vadd.f32 %v1751_v33, %v6883_v58  ;;  %v7058_v24 = vadd.f32 %v1752_v35, %v9688_v34  ;;  %v7061_v44 = vadd.f32 %v1753_v17, %v9690_v7  ;;  %v7064_v56 = vadd.f32 %v1754_v43, %v9692_v41  ;;  %v9698_v55 = vld [vmem:[#allocation156_spill] sm:$0xff]  ;;  %v9700_v58 = vld [vmem:[#allocation157_spill] sm:$0xff]  ;;  %v9702_v33 = vld [vmem:[#allocation158_spill] sm:$0xff] }
 0x163   : > { %v7067_v14 = vadd.f32 %v1755_v49, %v9694_v27  ;;  %v7070_v46 = vadd.f32 %v1756_v10, %v9696_v21  ;;  %v7073_v54 = vadd.f32 %v1757_v61, %v9698_v55  ;;  %v7076_v35 = vadd.f32 %v1758_v53, %v9700_v58  ;;  %v9707_v10 = vld [vmem:[#allocation85_spill] sm:$0xff]  ;;  %v9713_v25 = vld [vmem:[#allocation102_spill] sm:$0xff]  ;;  %v9714_v43 = vld [vmem:[#allocation103_spill] sm:$0xff] }
 0x164   : > { %9689 = vst [vmem:[#allocation52_spill] sm:$0xff] %v7058_v24  ;;  %9691 = vst [vmem:[#allocation55_spill] sm:$0xff] %v7061_v44  ;;  %v7079_v17 = vadd.f32 %v1759_v39, %v9702_v33  ;;  %v1828_v31 = vmul.f32 %v9705_v2, %v9704_v26  ;;  %v1829_v62 = vmul.f32 %v9706_v37, %v9704_v26  ;;  %v9715_v53 = vld [vmem:[#allocation104_spill] sm:$0xff]  ;;  %v9716_v34 = vld [vmem:[#allocation109_spill] sm:$0xff] }
 0x165   : > { %9693 = vst [vmem:[#allocation56_spill] sm:$0xff] %v7064_v56  ;;  %9695 = vst [vmem:[#allocation66_spill] sm:$0xff] %v7067_v14  ;;  %v1830_v50 = vmul.f32 %v9707_v10, %v9704_v26  ;;  %v1831_v61 = vmul.f32 %v9708_v29, %v9704_v26  ;;  %v1832_v60 = vmul.f32 %v9709_v63, %v9704_v26  ;;  %v7106_v41 = vld [vmem:[%s3724_s3 + $0x181] sm:$0xff]  ;;  %v7109_v27 = vld [vmem:[%s3724_s3 + $0x189] sm:$0xff] }
 0x166   : > { %9697 = vst [vmem:[#allocation67_spill] sm:$0xff] %v7070_v46  ;;  %9699 = vst [vmem:[#allocation68_spill] sm:$0xff] %v7073_v54  ;;  %v1833_v57 = vmul.f32 %v9710_v42, %v9704_v26  ;;  %v1834_v20 = vmul.f32 %v9711_v0, %v9704_v26  ;;  %v1835_v52 = vmul.f32 %v9712_v30, %v9704_v26  ;;  %v9719_v21 = vld [vmem:[#allocation110_spill] sm:$0xff]  ;;  %v9720_v58 = vld [vmem:[#allocation111_spill] sm:$0xff] }
 0x167   : > { %9701 = vst [vmem:[#allocation73_spill] sm:$0xff] %v7076_v35  ;;  %9703 = vst [vmem:[#allocation48_spill] sm:$0xff] %v7079_v17  ;;  %v1836_v11 = vmul.f32 %v9713_v25, %v9704_v26  ;;  %v1837_v49 = vmul.f32 %v9714_v43, %v9704_v26  ;;  %v1838_v39 = vmul.f32 %v9715_v53, %v9704_v26  ;;  %v9721_v2 = vld [vmem:[#allocation112_spill] sm:$0xff]  ;;  %v9722_v10 = vld [vmem:[#allocation113_spill] sm:$0xff] }
 0x168   : > { %v1839_v7 = vmul.f32 %v9716_v34, %v9704_v26  ;;  %9717 = vst [vmem:[#allocation11_spill] sm:$0xff] %v7106_v41  ;;  %9718 = vst [vmem:[#allocation21_spill] sm:$0xff] %v7109_v27  ;;  %v1840_v55 = vmul.f32 %v9719_v21, %v9704_v26  ;;  %v1841_v33 = vmul.f32 %v9720_v58, %v9704_v26  ;;  %v7120_v63 = vld [vmem:[%s3724_s3 + $0x1b1] sm:$0xff]  ;;  %v7123_v42 = vld [vmem:[%s3724_s3 + $0x1b9] sm:$0xff] }
 0x169   : > { %v1842_v37 = vmul.f32 %v9721_v2, %v9704_v26  ;;  %v1843_v29 = vmul.f32 %v9722_v10, %v9704_v26  ;;  %9723 = vst [vmem:[#allocation98_spill] sm:$0xff] %v7120_v63  ;;  %9724 = vst [vmem:[#allocation53_spill] sm:$0xff] %v7123_v42  ;;  %v9725_v0 = vld [vmem:[#allocation22_spill] sm:$0xff]  ;;  %v9726_v25 = vld [vmem:[#allocation23_spill] sm:$0xff] }
 0x16a   : > { %v1844_v30 = vmul.f32 %v9725_v0, %v9704_v26  ;;  %v1845_v43 = vmul.f32 %v9726_v25, %v9704_v26  ;;  %v9727_v53 = vld [vmem:[#allocation25_spill] sm:$0xff]  ;;  %v9728_v21 = vld [vmem:[#allocation26_spill] sm:$0xff]  ;;  %v9729_v2 = vld [vmem:[#allocation27_spill] sm:$0xff] }
 0x16b   : > { %v1846_v34 = vmul.f32 %v9727_v53, %v9704_v26  ;;  %v1847_v58 = vmul.f32 %v9728_v21, %v9704_v26  ;;  %v1848_v4 = vmul.f32 %v9729_v2, %v9704_v26  ;;  %v9730_v10 = vld [vmem:[#allocation29_spill] sm:$0xff]  ;;  %v9731_v35 = vld [vmem:[#allocation30_spill] sm:$0xff]  ;;  %v9732_v0 = vld [vmem:[#allocation31_spill] sm:$0xff]  ;;  %v1854_v21 = vmul.f32 %v7106_v41, %v9704_v26 }
 0x16c   : > { %v1849_v17 = vmul.f32 %v9730_v10, %v9704_v26  ;;  %v1850_v54 = vmul.f32 %v9731_v35, %v9704_v26  ;;  %v1851_v46 = vmul.f32 %v9732_v0, %v9704_v26  ;;  %v9733_v25 = vld [vmem:[#allocation72_spill] sm:$0xff]  ;;  %v9734_v53 = vld [vmem:[#allocation15_spill] sm:$0xff]  ;;  %v1855_v2 = vmul.f32 %v7109_v27, %v9704_v26  ;;  %v9735_v10 = vld [vmem:[#allocation114_spill] sm:$0xff] }
 0x16d   : > { %v1852_v14 = vmul.f32 %v9733_v25, %v9704_v26  ;;  %v1853_v56 = vmul.f32 %v9734_v53, %v9704_v26  ;;  %v1856_v44 = vmul.f32 %v9735_v10, %v9704_v26  ;;  %v9736_v35 = vld [vmem:[#allocation115_spill] sm:$0xff]  ;;  %v1858_v0 = vmul.f32 %v7120_v63, %v9704_v26 }
 0x16e   : > { %v1857_v24 = vmul.f32 %v9736_v35, %v9704_v26  ;;  %v1859_v25 = vmul.f32 %v7123_v42, %v9704_v26  ;;  %v7158_v53 = vadd.f32 %v1828_v31, %v6986_v51  ;;  %v7161_v41 = vadd.f32 %v1829_v62, %v6989_v47  ;;  %v7304_v42 = vld [vmem:[%s3724_s3 + $0x1b2] sm:$0xff] }
 0x16f   : > { %v7164_v27 = vadd.f32 %v1830_v50, %v6992_v45  ;;  %v7167_v10 = vadd.f32 %v1831_v61, %v6995_v19  ;;  %v7170_v35 = vadd.f32 %v1832_v60, %v6998_v15  ;;  %v7173_v63 = vadd.f32 %v1833_v57, %v7001_v5  ;;  %v9744_v50 = vld [vmem:[#allocation56_spill] sm:$0xff]  ;;  %v9756_v57 = vld [vmem:[#allocation7_spill] sm:$0xff]  ;;  %9786 = vst [vmem:[#allocation19_spill] sm:$0xff] %v7304_v42 }
 0x170   : > { %v7176_v26 = vadd.f32 %v1834_v20, %v7004_v12  ;;  %v7179_v51 = vadd.f32 %v1835_v52, %v7007_v3  ;;  %v7182_v47 = vadd.f32 %v1836_v11, %v7010_v32  ;;  %v7185_v45 = vadd.f32 %v1837_v49, %v7013_v8  ;;  %v9757_v52 = vld [vmem:[#allocation8_spill] sm:$0xff] }
 0x171   : > { %v7188_v19 = vadd.f32 %v1838_v39, %v7016_v23  ;;  %v7191_v15 = vadd.f32 %v1839_v7, %v7019_v18  ;;  %v7194_v5 = vadd.f32 %v1840_v55, %v7022_v22  ;;  %v7197_v12 = vadd.f32 %v1841_v33, %v7025_v9  ;;  %v188_v9 = vld [vmem:[%s8599_s1 + $0x20] sm:$0x1f]  ;;  %v9763_v7 = vld [vmem:[#allocation6_spill] sm:$0xff] }
 0x172   : > { %v7200_v3 = vadd.f32 %v1842_v37, %v7028_v16  ;;  %v7203_v32 = vadd.f32 %v1843_v29, %v7031_v59  ;;  %v7206_v8 = vadd.f32 %v1844_v30, %v7034_v6  ;;  %v7209_v23 = vadd.f32 %v1845_v43, %v7037_v28  ;;  %v9768_v30 = vld [vmem:[#allocation116_spill] sm:$0xff] }
 0x173   : > { %v7212_v18 = vadd.f32 %v1846_v34, %v7040_v38  ;;  %v7215_v22 = vadd.f32 %v1847_v58, %v7043_v1  ;;  %v7221_v16 = vadd.f32 %v1848_v4, %v7046_v13  ;;  %v7224_v59 = vadd.f32 %v1849_v17, %v7049_v36  ;;  %v9740_v38 = vld [vmem:[#allocation52_spill] sm:$0xff]  ;;  %v9742_v1 = vld [vmem:[#allocation55_spill] sm:$0xff]  ;;  %v9746_v4 = vld [vmem:[#allocation66_spill] sm:$0xff] }
 0x174   : > { %v7227_v6 = vadd.f32 %v1850_v54, %v7052_v48  ;;  %v7230_v28 = vadd.f32 %v1851_v46, %v7055_v40  ;;  %v7233_v31 = vadd.f32 %v1852_v14, %v9740_v38  ;;  %v7236_v62 = vadd.f32 %v1853_v56, %v9742_v1  ;;  %v9748_v36 = vld [vmem:[#allocation67_spill] sm:$0xff]  ;;  %v9750_v48 = vld [vmem:[#allocation68_spill] sm:$0xff]  ;;  %v9752_v40 = vld [vmem:[#allocation73_spill] sm:$0xff] }
 0x175   : > { %9737 = vst [vmem:[#allocation57_spill] sm:$0xff] %v7224_v59  ;;  %v7239_v61 = vadd.f32 %v1854_v21, %v9744_v50  ;;  %v7242_v13 = vadd.f32 %v1855_v2, %v9746_v4  ;;  %v7245_v17 = vadd.f32 %v1856_v44, %v9748_v36  ;;  %v7248_v54 = vadd.f32 %v1857_v24, %v9750_v48  ;;  %v9754_v14 = vld [vmem:[#allocation48_spill] sm:$0xff]  ;;  %v9759_v44 = vld [vmem:[#allocation9_spill] sm:$0xff]  ;;  %v9770_v21 = vld [vmem:[#allocation118_spill] sm:$0xff] }
 0x176   : > { %9738 = vst [vmem:[#allocation58_spill] sm:$0xff] %v7227_v6  ;;  %9739 = vst [vmem:[#allocation59_spill] sm:$0xff] %v7230_v28  ;;  %v7251_v46 = vadd.f32 %v1858_v0, %v9752_v40  ;;  %v7254_v60 = vadd.f32 %v1859_v25, %v9754_v14  ;;  %v3546_v56 = vld [vmem:[%s8599_s1 + $0x18] sm:$0x1f]  ;;  %v9761_v24 = vld [vmem:[#allocation5_spill] sm:$0xff]  ;;  %v7270_v55 = vrot.slane %v188_v9, %v9763_v7 }
 0x177   : > { %9741 = vst [vmem:[#allocation60_spill] sm:$0xff] %v7233_v31  ;;  %9743 = vst [vmem:[#allocation61_spill] sm:$0xff] %v7236_v62  ;;  %v1927_v20 = vrot.slane %v3546_v56, %v9756_v57  ;;  %v7261_v11 = vrot.slane %v3546_v56, %v9757_v52  ;;  %v7264_v49 = vrot.slane %v3546_v56, %v9759_v44  ;;  %v9769_v34 = vld [vmem:[#allocation117_spill] sm:$0xff]  ;;  %v9771_v0 = vld [vmem:[#allocation119_spill] sm:$0xff] }
 0x178   : > { %9745 = vst [vmem:[#allocation62_spill] sm:$0xff] %v7239_v61  ;;  %9747 = vst [vmem:[#allocation63_spill] sm:$0xff] %v7242_v13  ;;  %v7267_v39 = vrot.slane %v188_v9, %v9761_v24  ;;  %v7273_v33 = vrot.slane %v188_v9, %v9756_v57  ;;  %v7276_v37 = vrot.slane %v188_v9, %v9757_v52  ;;  %v9772_v38 = vld [vmem:[#allocation120_spill] sm:$0xff]  ;;  %v9773_v50 = vld [vmem:[#allocation121_spill] sm:$0xff] }
 0x179   : > { %9749 = vst [vmem:[#allocation64_spill] sm:$0xff] %v7245_v17  ;;  %9751 = vst [vmem:[#allocation69_spill] sm:$0xff] %v7248_v54  ;;  %v7279_v29 = vrot.slane %v188_v9, %v9759_v44  ;;  %v1928_v43 = vmul.f32 %v9768_v30, %v1927_v20  ;;  %v1929_v58 = vmul.f32 %v9769_v34, %v1927_v20  ;;  %v9774_v36 = vld [vmem:[#allocation123_spill] sm:$0xff]  ;;  %v9775_v40 = vld [vmem:[#allocation124_spill] sm:$0xff] }
 0x17a   : > { %9753 = vst [vmem:[#allocation70_spill] sm:$0xff] %v7251_v46  ;;  %9755 = vst [vmem:[#allocation71_spill] sm:$0xff] %v7254_v60  ;;  %v1930_v2 = vmul.f32 %v9770_v21, %v1927_v20  ;;  %v1931_v25 = vmul.f32 %v9771_v0, %v1927_v20  ;;  %v1932_v1 = vmul.f32 %v9772_v38, %v1927_v20  ;;  %v9776_v9 = vld [vmem:[#allocation129_spill] sm:$0xff]  ;;  %v9777_v57 = vld [vmem:[#allocation130_spill] sm:$0xff] }
 0x17b   : > { %9758 = vst [vmem:[#allocation151_spill] sm:$0xff] %v7261_v11  ;;  %9760 = vst [vmem:[#allocation122_spill] sm:$0xff] %v7264_v49  ;;  %v1933_v4 = vmul.f32 %v9773_v50, %v1927_v20  ;;  %v1934_v48 = vmul.f32 %v9774_v36, %v1927_v20  ;;  %v1935_v14 = vmul.f32 %v9775_v40, %v1927_v20  ;;  %v9778_v44 = vld [vmem:[#allocation131_spill] sm:$0xff]  ;;  %v7294_v34 = vld [vmem:[%s3724_s3 + $0x182] sm:$0xff] }
 0x17c   : > { %9762 = vst [vmem:[#allocation86_spill] sm:$0xff] %v7267_v39  ;;  %9764 = vst [vmem:[#allocation87_spill] sm:$0xff] %v7270_v55  ;;  %v1936_v56 = vmul.f32 %v9776_v9, %v1927_v20  ;;  %v1937_v52 = vmul.f32 %v9777_v57, %v1927_v20  ;;  %v1938_v24 = vmul.f32 %v9778_v44, %v1927_v20  ;;  %v9779_v7 = vld [vmem:[#allocation135_spill] sm:$0xff]  ;;  %v9782_v0 = vld [vmem:[#allocation136_spill] sm:$0xff] }
 0x17d   : > { %9765 = vst [vmem:[#allocation88_spill] sm:$0xff] %v7273_v33  ;;  %9766 = vst [vmem:[#allocation92_spill] sm:$0xff] %v7276_v37  ;;  %v1939_v30 = vmul.f32 %v9779_v7, %v1927_v20  ;;  %v7297_v21 = vld [vmem:[%s3724_s3 + $0x18a] sm:$0xff]  ;;  %v1940_v38 = vmul.f32 %v9782_v0, %v1927_v20  ;;  %v7307_v9 = vld [vmem:[%s3724_s3 + $0x1ba] sm:$0xff] }
 0x17e   : > { %9767 = vst [vmem:[#allocation93_spill] sm:$0xff] %v7279_v29  ;;  %9780 = vst [vmem:[#allocation94_spill] sm:$0xff] %v7294_v34  ;;  %v9783_v29 = vld [vmem:[#allocation137_spill] sm:$0xff]  ;;  %v9784_v37 = vld [vmem:[#allocation138_spill] sm:$0xff] }
 0x17f   : > { %9781 = vst [vmem:[#allocation95_spill] sm:$0xff] %v7297_v21  ;;  %v1941_v50 = vmul.f32 %v9783_v29, %v1927_v20  ;;  %v1942_v36 = vmul.f32 %v9784_v37, %v1927_v20  ;;  %v9785_v33 = vld [vmem:[#allocation139_spill] sm:$0xff]  ;;  %9787 = vst [vmem:[#allocation77_spill] sm:$0xff] %v7307_v9  ;;  %v9788_v57 = vld [vmem:[#allocation140_spill] sm:$0xff] }
 0x180   : > { %v1943_v40 = vmul.f32 %v9785_v33, %v1927_v20  ;;  %v1944_v44 = vmul.f32 %v9788_v57, %v1927_v20  ;;  %v9789_v55 = vld [vmem:[#allocation141_spill] sm:$0xff]  ;;  %v9790_v39 = vld [vmem:[#allocation142_spill] sm:$0xff]  ;;  %v9791_v11 = vld [vmem:[#allocation35_spill] sm:$0xff]  ;;  %v1954_v57 = vmul.f32 %v7294_v34, %v1927_v20 }
 0x181   : > { %v1945_v7 = vmul.f32 %v9789_v55, %v1927_v20  ;;  %v1946_v49 = vmul.f32 %v9790_v39, %v1927_v20  ;;  %v1947_v60 = vmul.f32 %v9791_v11, %v1927_v20  ;;  %v9792_v46 = vld [vmem:[#allocation37_spill] sm:$0xff]  ;;  %v9793_v54 = vld [vmem:[#allocation38_spill] sm:$0xff]  ;;  %v9794_v17 = vld [vmem:[#allocation39_spill] sm:$0xff]  ;;  %v1955_v55 = vmul.f32 %v7297_v21, %v1927_v20 }
 0x182   : > { %v1948_v0 = vmul.f32 %v9792_v46, %v1927_v20  ;;  %v1949_v29 = vmul.f32 %v9793_v54, %v1927_v20  ;;  %v1950_v37 = vmul.f32 %v9794_v17, %v1927_v20  ;;  %v9795_v13 = vld [vmem:[#allocation41_spill] sm:$0xff]  ;;  %v9796_v61 = vld [vmem:[#allocation42_spill] sm:$0xff]  ;;  %v9797_v31 = vld [vmem:[#allocation16_spill] sm:$0xff]  ;;  %v1958_v46 = vmul.f32 %v7304_v42, %v1927_v20 }
 0x183   : > { %v1951_v33 = vmul.f32 %v9795_v13, %v1927_v20  ;;  %v1952_v62 = vmul.f32 %v9796_v61, %v1927_v20  ;;  %v1953_v28 = vmul.f32 %v9797_v31, %v1927_v20  ;;  %v9798_v6 = vld [vmem:[#allocation17_spill] sm:$0xff]  ;;  %v9799_v59 = vld [vmem:[#allocation143_spill] sm:$0xff]  ;;  %v1959_v54 = vmul.f32 %v7307_v9, %v1927_v20 }
 0x184   : > { %v1956_v39 = vmul.f32 %v9798_v6, %v1927_v20  ;;  %v1957_v11 = vmul.f32 %v9799_v59, %v1927_v20  ;;  %v7326_v17 = vadd.f32 %v1928_v43, %v7158_v53  ;;  %v7329_v13 = vadd.f32 %v1929_v58, %v7161_v41 }
 0x185   : > { %v7332_v31 = vadd.f32 %v1930_v2, %v7164_v27  ;;  %v7335_v61 = vadd.f32 %v1931_v25, %v7167_v10  ;;  %v7338_v6 = vadd.f32 %v1932_v1, %v7170_v35  ;;  %v7341_v59 = vadd.f32 %v1933_v4, %v7173_v63  ;;  %v9811_v4 = vld [vmem:[#allocation64_spill] sm:$0xff] }
 0x186   : > { %v7344_v20 = vadd.f32 %v1934_v48, %v7176_v26  ;;  %v7347_v53 = vadd.f32 %v1935_v14, %v7179_v51  ;;  %v7350_v41 = vadd.f32 %v1936_v56, %v7182_v47  ;;  %v7353_v27 = vadd.f32 %v1937_v52, %v7185_v45  ;;  %v9813_v14 = vld [vmem:[#allocation69_spill] sm:$0xff]  ;;  %v9815_v52 = vld [vmem:[#allocation70_spill] sm:$0xff] }
 0x187   : > { %v7356_v10 = vadd.f32 %v1938_v24, %v7188_v19  ;;  %v7359_v35 = vadd.f32 %v1939_v30, %v7191_v15  ;;  %v7362_v63 = vadd.f32 %v1940_v38, %v7194_v5  ;;  %v7365_v26 = vadd.f32 %v1941_v50, %v7197_v12  ;;  %v9817_v24 = vld [vmem:[#allocation71_spill] sm:$0xff]  ;;  %v9820_v38 = vld [vmem:[#allocation144_spill] sm:$0xff] }
 0x188   : > { %v7368_v51 = vadd.f32 %v1942_v36, %v7200_v3  ;;  %v7371_v47 = vadd.f32 %v1943_v40, %v7203_v32  ;;  %v7374_v45 = vadd.f32 %v1944_v44, %v7206_v8  ;;  %v7377_v19 = vadd.f32 %v1945_v7, %v7209_v23  ;;  %v9800_v3 = vld [vmem:[#allocation57_spill] sm:$0xff]  ;;  %v9801_v32 = vld [vmem:[#allocation58_spill] sm:$0xff]  ;;  %v9802_v8 = vld [vmem:[#allocation59_spill] sm:$0xff] }
 0x189   : > { %v7380_v15 = vadd.f32 %v1946_v49, %v7212_v18  ;;  %v7383_v5 = vadd.f32 %v1947_v60, %v7215_v22  ;;  %v7386_v12 = vadd.f32 %v1948_v0, %v7221_v16  ;;  %v7389_v43 = vadd.f32 %v1949_v29, %v9800_v3  ;;  %v9803_v23 = vld [vmem:[#allocation60_spill] sm:$0xff]  ;;  %v9805_v18 = vld [vmem:[#allocation61_spill] sm:$0xff]  ;;  %v9807_v22 = vld [vmem:[#allocation62_spill] sm:$0xff] }
 0x18a   : > { %v7392_v58 = vadd.f32 %v1950_v37, %v9801_v32  ;;  %v7395_v2 = vadd.f32 %v1951_v33, %v9802_v8  ;;  %v7398_v25 = vadd.f32 %v1952_v62, %v9803_v23  ;;  %v7401_v49 = vadd.f32 %v1953_v28, %v9805_v18  ;;  %v9809_v16 = vld [vmem:[#allocation63_spill] sm:$0xff]  ;;  %v9821_v36 = vld [vmem:[#allocation145_spill] sm:$0xff]  ;;  %v9822_v44 = vld [vmem:[#allocation146_spill] sm:$0xff] }
 0x18b   : > { %v7404_v60 = vadd.f32 %v1954_v57, %v9807_v22  ;;  %v7407_v1 = vadd.f32 %v1955_v55, %v9809_v16  ;;  %v7410_v48 = vadd.f32 %v1956_v39, %v9811_v4  ;;  %v7413_v56 = vadd.f32 %v1957_v11, %v9813_v14  ;;  %v9819_v30 = vld [vmem:[#allocation151_spill] sm:$0xff]  ;;  %v9824_v37 = vld [vmem:[#allocation148_spill] sm:$0xff]  ;;  %v9826_v39 = vld [vmem:[#allocation153_spill] sm:$0xff] }
 0x18c   : > { %9804 = vst [vmem:[#allocation14_spill] sm:$0xff] %v7398_v25  ;;  %9806 = vst [vmem:[#allocation78_spill] sm:$0xff] %v7401_v49  ;;  %v7416_v62 = vadd.f32 %v1958_v46, %v9815_v52  ;;  %v7419_v28 = vadd.f32 %v1959_v54, %v9817_v24  ;;  %v2028_v50 = vmul.f32 %v9820_v38, %v9819_v30  ;;  %v9823_v0 = vld [vmem:[#allocation147_spill] sm:$0xff]  ;;  %v9825_v57 = vld [vmem:[#allocation152_spill] sm:$0xff] }
 0x18d   : > { %9808 = vst [vmem:[#allocation79_spill] sm:$0xff] %v7404_v60  ;;  %9810 = vst [vmem:[#allocation80_spill] sm:$0xff] %v7407_v1  ;;  %v2029_v40 = vmul.f32 %v9821_v36, %v9819_v30  ;;  %v2030_v7 = vmul.f32 %v9822_v44, %v9819_v30  ;;  %v2031_v29 = vmul.f32 %v9823_v0, %v9819_v30  ;;  %v9827_v46 = vld [vmem:[#allocation154_spill] sm:$0xff]  ;;  %v9828_v3 = vld [vmem:[#allocation159_spill] sm:$0xff] }
 0x18e   : > { %9812 = vst [vmem:[#allocation81_spill] sm:$0xff] %v7410_v48  ;;  %9814 = vst [vmem:[#allocation82_spill] sm:$0xff] %v7413_v56  ;;  %v2032_v33 = vmul.f32 %v9824_v37, %v9819_v30  ;;  %v2033_v55 = vmul.f32 %v9825_v57, %v9819_v30  ;;  %v2034_v11 = vmul.f32 %v9826_v39, %v9819_v30  ;;  %v9829_v8 = vld [vmem:[#allocation160_spill] sm:$0xff]  ;;  %v9830_v18 = vld [vmem:[#allocation161_spill] sm:$0xff] }
 0x18f   : > { %9816 = vst [vmem:[#allocation134_spill] sm:$0xff] %v7416_v62  ;;  %9818 = vst [vmem:[#allocation51_spill] sm:$0xff] %v7419_v28  ;;  %v2035_v54 = vmul.f32 %v9827_v46, %v9819_v30  ;;  %v2036_v32 = vmul.f32 %v9828_v3, %v9819_v30  ;;  %v2037_v23 = vmul.f32 %v9829_v8, %v9819_v30  ;;  %v9831_v16 = vld [vmem:[#allocation165_spill] sm:$0xff]  ;;  %v7449_v52 = vld [vmem:[%s3724_s3 + $0x18b] sm:$0xff] }
 0x190   : > { %v2038_v22 = vmul.f32 %v9830_v18, %v9819_v30  ;;  %v2039_v4 = vmul.f32 %v9831_v16, %v9819_v30  ;;  %v7446_v14 = vld [vmem:[%s3724_s3 + $0x183] sm:$0xff]  ;;  %9833 = vst [vmem:[#allocation20_spill] sm:$0xff] %v7449_v52  ;;  %v9835_v36 = vld [vmem:[#allocation167_spill] sm:$0xff]  ;;  %v9836_v0 = vld [vmem:[#allocation168_spill] sm:$0xff] }
 0x191   : > { %9832 = vst [vmem:[#allocation18_spill] sm:$0xff] %v7446_v14  ;;  %v9834_v24 = vld [vmem:[#allocation166_spill] sm:$0xff]  ;;  %v2041_v44 = vmul.f32 %v9835_v36, %v9819_v30  ;;  %v2042_v37 = vmul.f32 %v9836_v0, %v9819_v30  ;;  %v9837_v57 = vld [vmem:[#allocation169_spill] sm:$0xff]  ;;  %v7460_v46 = vld [vmem:[%s3724_s3 + $0x1b3] sm:$0xff] }
 0x192   : > { %v2040_v38 = vmul.f32 %v9834_v24, %v9819_v30  ;;  %v2043_v39 = vmul.f32 %v9837_v57, %v9819_v30  ;;  %9838 = vst [vmem:[#allocation155_spill] sm:$0xff] %v7460_v46  ;;  %v7463_v3 = vld [vmem:[%s3724_s3 + $0x1bb] sm:$0xff]  ;;  %v9840_v8 = vld [vmem:[#allocation170_spill] sm:$0xff]  ;;  %v9841_v16 = vld [vmem:[#allocation171_spill] sm:$0xff] }
 0x193   : > { %9839 = vst [vmem:[#allocation156_spill] sm:$0xff] %v7463_v3  ;;  %v2044_v18 = vmul.f32 %v9840_v8, %v9819_v30  ;;  %v2045_v9 = vmul.f32 %v9841_v16, %v9819_v30  ;;  %v9842_v24 = vld [vmem:[#allocation172_spill] sm:$0xff]  ;;  %v9843_v36 = vld [vmem:[#allocation173_spill] sm:$0xff]  ;;  %v9844_v0 = vld [vmem:[#allocation174_spill] sm:$0xff] }
 0x194   : > { %v2046_v42 = vmul.f32 %v9842_v24, %v9819_v30  ;;  %v2047_v21 = vmul.f32 %v9843_v36, %v9819_v30  ;;  %v2048_v34 = vmul.f32 %v9844_v0, %v9819_v30  ;;  %v9845_v57 = vld [vmem:[#allocation24_spill] sm:$0xff]  ;;  %v2054_v36 = vmul.f32 %v7446_v14, %v9819_v30 }
 0x195   : > { %v2049_v28 = vmul.f32 %v9845_v57, %v9819_v30  ;;  %v9846_v62 = vld [vmem:[#allocation28_spill] sm:$0xff]  ;;  %v2055_v0 = vmul.f32 %v7449_v52, %v9819_v30  ;;  %v9850_v57 = vld [vmem:[#allocation43_spill] sm:$0xff]  ;;  %v7501_v14 = vadd.f32 %v2029_v40, %v7329_v13  ;;  %v7504_v52 = vadd.f32 %v2030_v7, %v7332_v31  ;;  %v9869_v40 = vld [vmem:[#allocation50_spill] sm:$0xff] }
 0x196   : > { %v2050_v56 = vmul.f32 %v9846_v62, %v9819_v30  ;;  %v9847_v8 = vld [vmem:[#allocation32_spill] sm:$0xff]  ;;  %v2056_v49 = vmul.f32 %v9850_v57, %v9819_v30  ;;  %v9851_v62 = vld [vmem:[#allocation46_spill] sm:$0xff]  ;;  %v7507_v57 = vadd.f32 %v2031_v29, %v7335_v61  ;;  %v7522_v13 = vadd.f32 %v2036_v32, %v7350_v41 }
 0x197   : > { %v2051_v48 = vmul.f32 %v9847_v8, %v9819_v30  ;;  %v9848_v16 = vld [vmem:[#allocation36_spill] sm:$0xff]  ;;  %v2057_v25 = vmul.f32 %v9851_v62, %v9819_v30  ;;  %v2058_v8 = vmul.f32 %v7460_v46, %v9819_v30  ;;  %v7510_v62 = vadd.f32 %v2032_v33, %v7338_v6 }
 0x198   : > { %v2052_v1 = vmul.f32 %v9848_v16, %v9819_v30  ;;  %v9849_v24 = vld [vmem:[#allocation40_spill] sm:$0xff]  ;;  %v2059_v16 = vmul.f32 %v7463_v3, %v9819_v30  ;;  %v7513_v46 = vadd.f32 %v2033_v55, %v7341_v59  ;;  %v7525_v31 = vadd.f32 %v2037_v23, %v7353_v27  ;;  %v9874_v23 = vld [vmem:[#allocation149_spill] sm:$0xff] }
 0x199   : > { %v2053_v60 = vmul.f32 %v9849_v24, %v9819_v30  ;;  %v7498_v24 = vadd.f32 %v2028_v50, %v7326_v17  ;;  %v7516_v30 = vadd.f32 %v2034_v11, %v7344_v20  ;;  %v7519_v17 = vadd.f32 %v2035_v54, %v7347_v53  ;;  %v9868_v50 = vld [vmem:[#allocation122_spill] sm:$0xff]  ;;  %v9870_v29 = vld [vmem:[#allocation44_spill] sm:$0xff]  ;;  %v9872_v11 = vld [vmem:[#allocation45_spill] sm:$0xff] }
 0x19a   : > { %v7528_v61 = vadd.f32 %v2038_v22, %v7356_v10  ;;  %v7531_v6 = vadd.f32 %v2039_v4, %v7359_v35  ;;  %v7534_v59 = vadd.f32 %v2040_v38, %v7362_v63  ;;  %v7537_v20 = vadd.f32 %v2041_v44, %v7365_v26  ;;  %v9873_v54 = vld [vmem:[#allocation47_spill] sm:$0xff]  ;;  %v9875_v4 = vld [vmem:[#allocation150_spill] sm:$0xff]  ;;  %v9876_v44 = vld [vmem:[#allocation65_spill] sm:$0xff] }
 0x19b   : > { %v7540_v53 = vadd.f32 %v2042_v37, %v7368_v51  ;;  %v7543_v41 = vadd.f32 %v2043_v39, %v7371_v47  ;;  %v7546_v27 = vadd.f32 %v2044_v18, %v7374_v45  ;;  %v7549_v10 = vadd.f32 %v2045_v9, %v7377_v19  ;;  %v9852_v9 = vld [vmem:[#allocation14_spill] sm:$0xff] }
 0x19c   : > { %v7552_v35 = vadd.f32 %v2046_v42, %v7380_v15  ;;  %v7555_v63 = vadd.f32 %v2047_v21, %v7383_v5  ;;  %v7558_v26 = vadd.f32 %v2048_v34, %v7386_v12  ;;  %v7561_v51 = vadd.f32 %v2049_v28, %v7389_v43  ;;  %v9854_v42 = vld [vmem:[#allocation78_spill] sm:$0xff]  ;;  %v9856_v21 = vld [vmem:[#allocation79_spill] sm:$0xff]  ;;  %v9858_v34 = vld [vmem:[#allocation80_spill] sm:$0xff] }
 0x19d   : > { %v7564_v47 = vadd.f32 %v2050_v56, %v7392_v58  ;;  %v7567_v45 = vadd.f32 %v2051_v48, %v7395_v2  ;;  %v7570_v19 = vadd.f32 %v2052_v1, %v9852_v9  ;;  %v7573_v15 = vadd.f32 %v2053_v60, %v9854_v42  ;;  %v9860_v43 = vld [vmem:[#allocation81_spill] sm:$0xff]  ;;  %v9862_v58 = vld [vmem:[#allocation82_spill] sm:$0xff]  ;;  %v9866_v48 = vld [vmem:[#allocation51_spill] sm:$0xff] }
 0x19e   : > { %v7576_v5 = vadd.f32 %v2054_v36, %v9856_v21  ;;  %v7579_v12 = vadd.f32 %v2055_v0, %v9858_v34  ;;  %v7582_v28 = vadd.f32 %v2056_v49, %v9860_v43  ;;  %v7585_v56 = vadd.f32 %v2057_v25, %v9862_v58  ;;  %v9864_v2 = vld [vmem:[#allocation134_spill] sm:$0xff]  ;;  %v9871_v49 = vld [vmem:[#allocation13_spill] sm:$0xff]  ;;  %v9878_v36 = vld [vmem:[#allocation75_spill] sm:$0xff] }
 0x19f   : > { %9853 = vst [vmem:[#allocation157_spill] sm:$0xff] %v7570_v19  ;;  %9855 = vst [vmem:[#allocation158_spill] sm:$0xff] %v7573_v15  ;;  %v7588_v1 = vadd.f32 %v2058_v8, %v9864_v2  ;;  %v7591_v60 = vadd.f32 %v2059_v16, %v9866_v48  ;;  %v2128_v7 = vmul.f32 %v9869_v40, %v9868_v50  ;;  %v9877_v39 = vld [vmem:[#allocation74_spill] sm:$0xff]  ;;  %v9879_v8 = vld [vmem:[#allocation76_spill] sm:$0xff] }
 0x1a0   : > { %9857 = vst [vmem:[#allocation54_spill] sm:$0xff] %v7576_v5  ;;  %9859 = vst [vmem:[#allocation83_spill] sm:$0xff] %v7579_v12  ;;  %v2129_v33 = vmul.f32 %v9870_v29, %v9868_v50  ;;  %v2130_v55 = vmul.f32 %v9871_v49, %v9868_v50  ;;  %v2131_v25 = vmul.f32 %v9872_v11, %v9868_v50  ;;  %v9880_v9 = vld [vmem:[#allocation99_spill] sm:$0xff]  ;;  %v7618_v21 = vld [vmem:[%s3724_s3 + $0x184] sm:$0xff] }
 0x1a1   : > { %9861 = vst [vmem:[#allocation84_spill] sm:$0xff] %v7582_v28  ;;  %9863 = vst [vmem:[#allocation85_spill] sm:$0xff] %v7585_v56  ;;  %v2132_v32 = vmul.f32 %v9873_v54, %v9868_v50  ;;  %v2133_v22 = vmul.f32 %v9874_v23, %v9868_v50  ;;  %v2134_v38 = vmul.f32 %v9875_v4, %v9868_v50  ;;  %v7621_v34 = vld [vmem:[%s3724_s3 + $0x18c] sm:$0xff]  ;;  %v9883_v43 = vld [vmem:[#allocation100_spill] sm:$0xff] }
 0x1a2   : > { %9865 = vst [vmem:[#allocation89_spill] sm:$0xff] %v7588_v1  ;;  %9867 = vst [vmem:[#allocation90_spill] sm:$0xff] %v7591_v60  ;;  %v2135_v37 = vmul.f32 %v9876_v44, %v9868_v50  ;;  %v2136_v18 = vmul.f32 %v9877_v39, %v9868_v50  ;;  %v2137_v0 = vmul.f32 %v9878_v36, %v9868_v50  ;;  %v9884_v2 = vld [vmem:[#allocation101_spill] sm:$0xff]  ;;  %v9886_v49 = vld [vmem:[#allocation106_spill] sm:$0xff] }
 0x1a3   : > { %v2138_v16 = vmul.f32 %v9879_v8, %v9868_v50  ;;  %v2139_v42 = vmul.f32 %v9880_v9, %v9868_v50  ;;  %9881 = vst [vmem:[#allocation91_spill] sm:$0xff] %v7618_v21  ;;  %9882 = vst [vmem:[#allocation96_spill] sm:$0xff] %v7621_v34  ;;  %v2140_v58 = vmul.f32 %v9883_v43, %v9868_v50  ;;  %v9885_v40 = vld [vmem:[#allocation105_spill] sm:$0xff]  ;;  %v7632_v54 = vld [vmem:[%s3724_s3 + $0x1b4] sm:$0xff] }
 0x1a4   : > { %v2141_v48 = vmul.f32 %v9884_v2, %v9868_v50  ;;  %v2142_v29 = vmul.f32 %v9885_v40, %v9868_v50  ;;  %v2143_v11 = vmul.f32 %v9886_v49, %v9868_v50  ;;  %9887 = vst [vmem:[#allocation97_spill] sm:$0xff] %v7632_v54  ;;  %v7635_v23 = vld [vmem:[%s3724_s3 + $0x1bc] sm:$0xff]  ;;  %v9889_v4 = vld [vmem:[#allocation107_spill] sm:$0xff]  ;;  %v9893_v40 = vld [vmem:[#allocation34_spill] sm:$0xff] }
 0x1a5   : > { %9888 = vst [vmem:[#allocation102_spill] sm:$0xff] %v7635_v23  ;;  %v2144_v44 = vmul.f32 %v9889_v4, %v9868_v50  ;;  %v9890_v39 = vld [vmem:[#allocation108_spill] sm:$0xff]  ;;  %v9891_v8 = vld [vmem:[#allocation49_spill] sm:$0xff]  ;;  %v2148_v3 = vmul.f32 %v9893_v40, %v9868_v50  ;;  %v9895_v1 = vld [vmem:[#allocation126_spill] sm:$0xff]  ;;  %v2155_v40 = vmul.f32 %v7621_v34, %v9868_v50  ;;  %v7676_v34 = vadd.f32 %v2130_v55, %v7504_v52 }
 0x1a6   : > { %v2145_v36 = vmul.f32 %v9890_v39, %v9868_v50  ;;  %v2146_v9 = vmul.f32 %v9891_v8, %v9868_v50  ;;  %v9892_v43 = vld [vmem:[#allocation33_spill] sm:$0xff]  ;;  %v2150_v56 = vmul.f32 %v9895_v1, %v9868_v50  ;;  %v9896_v4 = vld [vmem:[#allocation127_spill] sm:$0xff]  ;;  %v9897_v39 = vld [vmem:[#allocation128_spill] sm:$0xff]  ;;  %v7694_v52 = vadd.f32 %v2136_v18, %v7522_v13 }
 0x1a7   : > { %v2147_v2 = vmul.f32 %v9892_v43, %v9868_v50  ;;  %v9894_v49 = vld [vmem:[#allocation125_spill] sm:$0xff]  ;;  %v2151_v28 = vmul.f32 %v9896_v4, %v9868_v50  ;;  %v2152_v12 = vmul.f32 %v9897_v39, %v9868_v50  ;;  %v9898_v8 = vld [vmem:[#allocation10_spill] sm:$0xff]  ;;  %v2154_v43 = vmul.f32 %v7618_v21, %v9868_v50  ;;  %v3325_v55 = vld [vmem:[%s3724_s3 + $0x90] sm:$0xff] }
 0x1a8   : > { %v2149_v60 = vmul.f32 %v9894_v49, %v9868_v50  ;;  %v2153_v5 = vmul.f32 %v9898_v8, %v9868_v50  ;;  %v9899_v49 = vld [vmem:[#allocation132_spill] sm:$0xff]  ;;  %v9900_v1 = vld [vmem:[#allocation133_spill] sm:$0xff]  ;;  %v2158_v4 = vmul.f32 %v7632_v54, %v9868_v50  ;;  %v2159_v39 = vmul.f32 %v7635_v23, %v9868_v50 }
 0x1a9   : > { %v2156_v15 = vmul.f32 %v9899_v49, %v9868_v50  ;;  %v2157_v19 = vmul.f32 %v9900_v1, %v9868_v50  ;;  %v7670_v8 = vadd.f32 %v2128_v7, %v7498_v24  ;;  %v7673_v21 = vadd.f32 %v2129_v33, %v7501_v14  ;;  %v3321_v7 = vld [vmem:[%s3724_s3 + $0x60] sm:$0xff]  ;;  %v3323_v33 = vld [vmem:[%s3724_s3 + $0x78] sm:$0xff] }
 0x1aa   : > { %v7679_v49 = vadd.f32 %v2131_v25, %v7507_v57  ;;  %v7682_v1 = vadd.f32 %v2132_v32, %v7510_v62  ;;  %v7685_v50 = vadd.f32 %v2133_v22, %v7513_v46  ;;  %v7688_v24 = vadd.f32 %v2134_v38, %v7516_v30  ;;  %v3326_v25 = vld [vmem:[%s3724_s3 + $0x98] sm:$0xff]  ;;  %v3328_v22 = vld [vmem:[%s3724_s3 + $0xb0] sm:$0xff]  ;;  %v3329_v38 = vld [vmem:[%s3724_s3 + $0xc0] sm:$0xff] }
 0x1ab   : > { %v7691_v14 = vadd.f32 %v2135_v37, %v7519_v17  ;;  %v7697_v57 = vadd.f32 %v2137_v0, %v7525_v31  ;;  %v7700_v62 = vadd.f32 %v2138_v16, %v7528_v61  ;;  %v7703_v46 = vadd.f32 %v2139_v42, %v7531_v6  ;;  %v3322_v61 = vld [vmem:[%s3724_s3 + $0x68] sm:$0xff]  ;;  %v9903_v37 = vld [vmem:[#allocation157_spill] sm:$0xff]  ;;  %v3331_v18 = vld [vmem:[%s3724_s3 + $0xd8] sm:$0xff] }
 0x1ac   : > { %v7706_v30 = vadd.f32 %v2140_v58, %v7534_v59  ;;  %v7709_v17 = vadd.f32 %v2141_v48, %v7537_v20  ;;  %v7712_v13 = vadd.f32 %v2142_v29, %v7540_v53  ;;  %v7715_v31 = vadd.f32 %v2143_v11, %v7543_v41  ;;  %v3324_v41 = vld [vmem:[%s3724_s3 + $0x80] sm:$0xff]  ;;  %v9911_v16 = vld [vmem:[#allocation84_spill] sm:$0xff]  ;;  %v9917_v29 = vld [vmem:[#allocation90_spill] sm:$0xff] }
 0x1ad   : > { %v7721_v6 = vadd.f32 %v2144_v44, %v7546_v27  ;;  %v7724_v59 = vadd.f32 %v2145_v36, %v7549_v10  ;;  %v7727_v20 = vadd.f32 %v2146_v9, %v7552_v35  ;;  %v7730_v53 = vadd.f32 %v2147_v2, %v7555_v63  ;;  %v3327_v63 = vld [vmem:[%s3724_s3 + $0xa8] sm:$0xff]  ;;  %v3332_v0 = vld [vmem:[%s3724_s3 + $0xe0] sm:$0xff]  ;;  %v3333_v44 = vld [vmem:[%s3724_s3 + $0xf0] sm:$0xff] }
 0x1ae   : > { %v7736_v32 = vadd.f32 %v2148_v3, %v7558_v26  ;;  %v7739_v27 = vadd.f32 %v2149_v60, %v7561_v51  ;;  %v7742_v10 = vadd.f32 %v2150_v56, %v7564_v47  ;;  %v7745_v35 = vadd.f32 %v2151_v28, %v7567_v45  ;;  %v9905_v26 = vld [vmem:[#allocation158_spill] sm:$0xff]  ;;  %v9909_v60 = vld [vmem:[#allocation83_spill] sm:$0xff]  ;;  %v3334_v36 = vld [vmem:[%s3724_s3 + $0xf8] sm:$0xff] }
 0x1af   : > { %v7751_v3 = vadd.f32 %v2152_v12, %v9903_v37  ;;  %v7754_v51 = vadd.f32 %v2153_v5, %v9905_v26  ;;  %v9907_v47 = vld [vmem:[#allocation54_spill] sm:$0xff]  ;;  %v7760_v45 = vadd.f32 %v2155_v40, %v9909_v60  ;;  %v7766_v42 = vadd.f32 %v2156_v15, %v9911_v16  ;;  %v9913_v12 = vld [vmem:[#allocation85_spill] sm:$0xff]  ;;  %v3336_v2 = vld [vmem:[%s3724_s3 + $0x110] sm:$0xff] }
 0x1b0   : > { %9901 = vst [vmem:[#allocation103_spill] sm:$0xff] %v7742_v10  ;;  %9902 = vst [vmem:[#allocation104_spill] sm:$0xff] %v7745_v35  ;;  %v7757_v56 = vadd.f32 %v2154_v43, %v9907_v47  ;;  %v3330_v28 = vld [vmem:[%s3724_s3 + $0xc8] sm:$0xff]  ;;  %v7769_v58 = vadd.f32 %v2157_v19, %v9913_v12  ;;  %v9915_v5 = vld [vmem:[#allocation89_spill] sm:$0xff]  ;;  %v7775_v11 = vadd.f32 %v2159_v39, %v9917_v29 }
 0x1b1   : > { %9904 = vst [vmem:[#allocation109_spill] sm:$0xff] %v7751_v3  ;;  %9906 = vst [vmem:[#allocation110_spill] sm:$0xff] %v7754_v51  ;;  %v7772_v48 = vadd.f32 %v2158_v4, %v9915_v5  ;;  %v3335_v9 = vld [vmem:[%s3724_s3 + $0x108] sm:$0xff]  ;;  %v3337_v43 = vld [vmem:[%s3724_s3 + $0x120] sm:$0xff] }
 0x1b2   : > { %9908 = vst [vmem:[#allocation111_spill] sm:$0xff] %v7757_v56  ;;  %9910 = vst [vmem:[#allocation112_spill] sm:$0xff] %v7760_v45  ;;  %v3338_v15 = vld [vmem:[%s3724_s3 + $0x128] sm:$0xff]  ;;  %v3339_v39 = vld [vmem:[%s3724_s3 + $0x138] sm:$0xff] }
 0x1b3   : > { %9912 = vst [vmem:[#allocation113_spill] sm:$0xff] %v7766_v42  ;;  %9914 = vst [vmem:[#allocation22_spill] sm:$0xff] %v7769_v58  ;;  %v9919_v40 = vld [vmem:[#allocation86_spill] sm:$0xff]  ;;  %v3340_v47 = vld [vmem:[%s3724_s3 + $0x140] sm:$0xff] }
 0x1b4   : > { %9916 = vst [vmem:[#allocation23_spill] sm:$0xff] %v7772_v48  ;;  %9918 = vst [vmem:[#allocation25_spill] sm:$0xff] %v7775_v11  ;;  %v2229_v37 = vmul.f32 %v3321_v7, %v9919_v40  ;;  %v2230_v19 = vmul.f32 %v3322_v61, %v9919_v40  ;;  %v2231_v26 = vmul.f32 %v3323_v33, %v9919_v40  ;;  %v3341_v60 = vld [vmem:[%s3724_s3 + $0x150] sm:$0xff]  ;;  %v3342_v61 = vld [vmem:[%s3724_s3 + $0x158] sm:$0xff] }
 0x1b5   : > { %v2232_v4 = vmul.f32 %v3324_v41, %v9919_v40  ;;  %v2233_v16 = vmul.f32 %v3325_v55, %v9919_v40  ;;  %v2234_v12 = vmul.f32 %v3326_v25, %v9919_v40  ;;  %v2235_v5 = vmul.f32 %v3327_v63, %v9919_v40  ;;  %v3343_v29 = vld [vmem:[%s3724_s3 + $0x168] sm:$0xff]  ;;  %v3344_v33 = vld [vmem:[%s3724_s3 + $0x170] sm:$0xff]  ;;  %v3347_v55 = vld [vmem:[%s3724_s3 + $0x198] sm:$0xff] }
 0x1b6   : > { %v2236_v7 = vmul.f32 %v3328_v22, %v9919_v40  ;;  %v2237_v23 = vmul.f32 %v3329_v38, %v9919_v40  ;;  %v2238_v41 = vmul.f32 %v3330_v28, %v9919_v40  ;;  %v2239_v54 = vmul.f32 %v3331_v18, %v9919_v40  ;;  %v3348_v48 = vld [vmem:[%s3724_s3 + $0x1a0] sm:$0xff]  ;;  %v3351_v42 = vld [vmem:[%s3724_s3 + $0x1c8] sm:$0xff]  ;;  %v3352_v45 = vld [vmem:[%s3724_s3 + $0x1d0] sm:$0xff] }
 0x1b7   : > { %v2240_v11 = vmul.f32 %v3332_v0, %v9919_v40  ;;  %v2241_v25 = vmul.f32 %v3333_v44, %v9919_v40  ;;  %v2242_v63 = vmul.f32 %v3334_v36, %v9919_v40  ;;  %v2243_v58 = vmul.f32 %v3335_v9, %v9919_v40  ;;  %v9921_v3 = vld [vmem:[#allocation163_spill] sm:$0xff] }
 0x1b8   : > { %v2244_v22 = vmul.f32 %v3336_v2, %v9919_v40  ;;  %v2245_v38 = vmul.f32 %v3337_v43, %v9919_v40  ;;  %v2246_v28 = vmul.f32 %v3338_v15, %v9919_v40  ;;  %v2247_v18 = vmul.f32 %v3339_v39, %v9919_v40  ;;  %v9920_v2 = vld [vmem:[#allocation162_spill] sm:$0xff] }
 0x1b9   : > { %v2248_v0 = vmul.f32 %v3340_v47, %v9919_v40  ;;  %v2249_v56 = vmul.f32 %v3341_v60, %v9919_v40  ;;  %v2250_v44 = vmul.f32 %v3342_v61, %v9919_v40  ;;  %v2251_v36 = vmul.f32 %v3343_v29, %v9919_v40  ;;  %v9922_v47 = vld [vmem:[#allocation12_spill] sm:$0xff] }
 0x1ba   : > { %v2252_v9 = vmul.f32 %v3344_v33, %v9919_v40  ;;  %v2253_v51 = vmul.f32 %v9920_v2, %v9919_v40  ;;  %v2254_v43 = vmul.f32 %v9921_v3, %v9919_v40  ;;  %v2255_v15 = vmul.f32 %v3347_v55, %v9919_v40  ;;  %v9923_v60 = vld [vmem:[#allocation164_spill] sm:$0xff] }
 0x1bb   : > { %v2256_v39 = vmul.f32 %v3348_v48, %v9919_v40  ;;  %v2257_v35 = vmul.f32 %v9922_v47, %v9919_v40  ;;  %v2258_v61 = vmul.f32 %v9923_v60, %v9919_v40  ;;  %v2259_v29 = vmul.f32 %v3351_v42, %v9919_v40  ;;  %v3357_v42 = vld [vmem:[%s3724_s3 + $0x91] sm:$0xff]  ;;  %v3369_v47 = vld [vmem:[%s3724_s3 + $0x121] sm:$0xff] }
 0x1bc   : > { %v2260_v33 = vmul.f32 %v3352_v45, %v9919_v40  ;;  %v7830_v10 = vadd.f32 %v2229_v37, %v7670_v8  ;;  %v7833_v3 = vadd.f32 %v2230_v19, %v7673_v21  ;;  %v7836_v48 = vadd.f32 %v2231_v26, %v7676_v34  ;;  %v3360_v19 = vld [vmem:[%s3724_s3 + $0xb1] sm:$0xff]  ;;  %v3361_v26 = vld [vmem:[%s3724_s3 + $0xc1] sm:$0xff] }
 0x1bd   : > { %v7839_v55 = vadd.f32 %v2232_v4, %v7679_v49  ;;  %v7842_v2 = vadd.f32 %v2233_v16, %v7682_v1  ;;  %v7845_v45 = vadd.f32 %v2234_v12, %v7685_v50  ;;  %v7848_v8 = vadd.f32 %v2235_v5, %v7688_v24  ;;  %v9928_v4 = vld [vmem:[#allocation109_spill] sm:$0xff]  ;;  %v9932_v16 = vld [vmem:[#allocation111_spill] sm:$0xff]  ;;  %v9934_v5 = vld [vmem:[#allocation112_spill] sm:$0xff] }
 0x1be   : > { %v7851_v21 = vadd.f32 %v2236_v7, %v7691_v14  ;;  %v7854_v34 = vadd.f32 %v2237_v23, %v7694_v52  ;;  %v7857_v49 = vadd.f32 %v2238_v41, %v7697_v57  ;;  %v7860_v1 = vadd.f32 %v2239_v54, %v7700_v62  ;;  %v3353_v57 = vld [vmem:[%s3724_s3 + $0x61] sm:$0xff]  ;;  %v3354_v54 = vld [vmem:[%s3724_s3 + $0x69] sm:$0xff]  ;;  %v3355_v62 = vld [vmem:[%s3724_s3 + $0x79] sm:$0xff] }
 0x1bf   : > { %v7863_v50 = vadd.f32 %v2240_v11, %v7703_v46  ;;  %v7866_v24 = vadd.f32 %v2241_v25, %v7706_v30  ;;  %v7869_v14 = vadd.f32 %v2242_v63, %v7709_v17  ;;  %v7872_v23 = vadd.f32 %v2243_v58, %v7712_v13  ;;  %v3358_v58 = vld [vmem:[%s3724_s3 + $0x99] sm:$0xff]  ;;  %v3362_v41 = vld [vmem:[%s3724_s3 + $0xc9] sm:$0xff]  ;;  %v3364_v63 = vld [vmem:[%s3724_s3 + $0xe1] sm:$0xff] }
 0x1c0   : > { %v7875_v52 = vadd.f32 %v2244_v22, %v7715_v31  ;;  %v7881_v46 = vadd.f32 %v2245_v38, %v7721_v6  ;;  %v7884_v30 = vadd.f32 %v2246_v28, %v7724_v59  ;;  %v7887_v17 = vadd.f32 %v2247_v18, %v7727_v20  ;;  %v3356_v31 = vld [vmem:[%s3724_s3 + $0x81] sm:$0xff]  ;;  %v9924_v59 = vld [vmem:[#allocation103_spill] sm:$0xff]  ;;  %v9926_v20 = vld [vmem:[#allocation104_spill] sm:$0xff] }
 0x1c1   : > { %v7890_v13 = vadd.f32 %v2248_v0, %v7730_v53  ;;  %v7896_v11 = vadd.f32 %v2249_v56, %v7736_v32  ;;  %v7899_v6 = vadd.f32 %v2250_v44, %v7739_v27  ;;  %v7902_v40 = vadd.f32 %v2251_v36, %v9924_v59  ;;  %v3359_v53 = vld [vmem:[%s3724_s3 + $0xa9] sm:$0xff]  ;;  %v3363_v25 = vld [vmem:[%s3724_s3 + $0xd9] sm:$0xff] }
 0x1c2   : > { %v7905_v37 = vadd.f32 %v2252_v9, %v9926_v20  ;;  %v7911_v32 = vadd.f32 %v2253_v51, %v9928_v4  ;;  %v9930_v56 = vld [vmem:[#allocation110_spill] sm:$0xff]  ;;  %v7917_v12 = vadd.f32 %v2255_v15, %v9932_v16  ;;  %v7920_v7 = vadd.f32 %v2256_v39, %v9934_v5  ;;  %v9936_v22 = vld [vmem:[#allocation113_spill] sm:$0xff]  ;;  %v9940_v18 = vld [vmem:[#allocation23_spill] sm:$0xff] }
 0x1c3   : > { %9925 = vst [vmem:[#allocation26_spill] sm:$0xff] %v7902_v40  ;;  %v7914_v27 = vadd.f32 %v2254_v43, %v9930_v56  ;;  %v7926_v38 = vadd.f32 %v2257_v35, %v9936_v22  ;;  %v9938_v51 = vld [vmem:[#allocation22_spill] sm:$0xff]  ;;  %v7932_v0 = vadd.f32 %v2259_v29, %v9940_v18  ;;  %v9942_v44 = vld [vmem:[#allocation25_spill] sm:$0xff]  ;;  %v3365_v9 = vld [vmem:[%s3724_s3 + $0xf1] sm:$0xff] }
 0x1c4   : > { %9927 = vst [vmem:[#allocation27_spill] sm:$0xff] %v7905_v37  ;;  %9929 = vst [vmem:[#allocation29_spill] sm:$0xff] %v7911_v32  ;;  %v7929_v28 = vadd.f32 %v2258_v61, %v9938_v51  ;;  %v7935_v36 = vadd.f32 %v2260_v33, %v9942_v44  ;;  %v3366_v43 = vld [vmem:[%s3724_s3 + $0xf9] sm:$0xff]  ;;  %v3367_v15 = vld [vmem:[%s3724_s3 + $0x109] sm:$0xff] }
 0x1c5   : > { %9931 = vst [vmem:[#allocation30_spill] sm:$0xff] %v7914_v27  ;;  %9933 = vst [vmem:[#allocation31_spill] sm:$0xff] %v7917_v12  ;;  %v3368_v39 = vld [vmem:[%s3724_s3 + $0x111] sm:$0xff]  ;;  %v3370_v35 = vld [vmem:[%s3724_s3 + $0x129] sm:$0xff] }
 0x1c6   : > { %9935 = vst [vmem:[#allocation72_spill] sm:$0xff] %v7920_v7  ;;  %9937 = vst [vmem:[#allocation15_spill] sm:$0xff] %v7926_v38  ;;  %v9944_v60 = vld [vmem:[#allocation87_spill] sm:$0xff]  ;;  %v3371_v33 = vld [vmem:[%s3724_s3 + $0x139] sm:$0xff] }
 0x1c7   : > { %9939 = vst [vmem:[#allocation114_spill] sm:$0xff] %v7929_v28  ;;  %9941 = vst [vmem:[#allocation115_spill] sm:$0xff] %v7932_v0  ;;  %v2329_v59 = vmul.f32 %v3353_v57, %v9944_v60  ;;  %v2330_v61 = vmul.f32 %v3354_v54, %v9944_v60  ;;  %v2331_v20 = vmul.f32 %v3355_v62, %v9944_v60  ;;  %v3372_v4 = vld [vmem:[%s3724_s3 + $0x141] sm:$0xff]  ;;  %v3373_v56 = vld [vmem:[%s3724_s3 + $0x151] sm:$0xff] }
 0x1c8   : > { %9943 = vst [vmem:[#allocation52_spill] sm:$0xff] %v7935_v36  ;;  %v2332_v29 = vmul.f32 %v3356_v31, %v9944_v60  ;;  %v2333_v16 = vmul.f32 %v3357_v42, %v9944_v60  ;;  %v2334_v5 = vmul.f32 %v3358_v58, %v9944_v60  ;;  %v2335_v22 = vmul.f32 %v3359_v53, %v9944_v60  ;;  %v3374_v54 = vld [vmem:[%s3724_s3 + $0x159] sm:$0xff]  ;;  %v3375_v51 = vld [vmem:[%s3724_s3 + $0x169] sm:$0xff]  ;;  %v3376_v62 = vld [vmem:[%s3724_s3 + $0x171] sm:$0xff] }
 0x1c9   : > { %v2336_v57 = vmul.f32 %v3360_v19, %v9944_v60  ;;  %v2337_v18 = vmul.f32 %v3361_v26, %v9944_v60  ;;  %v2338_v31 = vmul.f32 %v3362_v41, %v9944_v60  ;;  %v2339_v44 = vmul.f32 %v3363_v25, %v9944_v60  ;;  %v3379_v42 = vld [vmem:[%s3724_s3 + $0x199] sm:$0xff]  ;;  %v3380_v0 = vld [vmem:[%s3724_s3 + $0x1a1] sm:$0xff]  ;;  %v3383_v38 = vld [vmem:[%s3724_s3 + $0x1c9] sm:$0xff] }
 0x1ca   : > { %v2340_v36 = vmul.f32 %v3364_v63, %v9944_v60  ;;  %v2341_v58 = vmul.f32 %v3365_v9, %v9944_v60  ;;  %v2342_v53 = vmul.f32 %v3366_v43, %v9944_v60  ;;  %v2343_v28 = vmul.f32 %v3367_v15, %v9944_v60  ;;  %v3384_v7 = vld [vmem:[%s3724_s3 + $0x1d1] sm:$0xff]  ;;  %v9946_v32 = vld [vmem:[#allocation21_spill] sm:$0xff] }
 0x1cb   : > { %v2344_v19 = vmul.f32 %v3368_v39, %v9944_v60  ;;  %v2345_v26 = vmul.f32 %v3369_v47, %v9944_v60  ;;  %v2346_v41 = vmul.f32 %v3370_v35, %v9944_v60  ;;  %v2347_v25 = vmul.f32 %v3371_v33, %v9944_v60  ;;  %v9945_v39 = vld [vmem:[#allocation11_spill] sm:$0xff] }
 0x1cc   : > { %v2348_v63 = vmul.f32 %v3372_v4, %v9944_v60  ;;  %v2349_v12 = vmul.f32 %v3373_v56, %v9944_v60  ;;  %v2350_v9 = vmul.f32 %v3374_v54, %v9944_v60  ;;  %v2351_v43 = vmul.f32 %v3375_v51, %v9944_v60  ;;  %v9947_v4 = vld [vmem:[#allocation98_spill] sm:$0xff]  ;;  %v9948_v56 = vld [vmem:[#allocation53_spill] sm:$0xff] }
 0x1cd   : > { %v2352_v15 = vmul.f32 %v3376_v62, %v9944_v60  ;;  %v2353_v27 = vmul.f32 %v9945_v39, %v9944_v60  ;;  %v2354_v47 = vmul.f32 %v9946_v32, %v9944_v60  ;;  %v2355_v35 = vmul.f32 %v3379_v42, %v9944_v60 }
 0x1ce   : > { %v2356_v33 = vmul.f32 %v3380_v0, %v9944_v60  ;;  %v2357_v37 = vmul.f32 %v9947_v4, %v9944_v60  ;;  %v2358_v54 = vmul.f32 %v9948_v56, %v9944_v60  ;;  %v2359_v51 = vmul.f32 %v3383_v38, %v9944_v60  ;;  %v3385_v38 = vld [vmem:[%s3724_s3 + $0x62] sm:$0xff]  ;;  %v9969_v56 = vld [vmem:[#allocation88_spill] sm:$0xff] }
 0x1cf   : > { %v2360_v62 = vmul.f32 %v3384_v7, %v9944_v60  ;;  %v7990_v40 = vadd.f32 %v2329_v59, %v7830_v10  ;;  %v7993_v32 = vadd.f32 %v2330_v61, %v7833_v3  ;;  %v7996_v0 = vadd.f32 %v2331_v20, %v7836_v48  ;;  %v3387_v60 = vld [vmem:[%s3724_s3 + $0x7a] sm:$0xff]  ;;  %v3401_v4 = vld [vmem:[%s3724_s3 + $0x122] sm:$0xff] }
 0x1d0   : > { %v7999_v42 = vadd.f32 %v2332_v29, %v7839_v55  ;;  %v8002_v39 = vadd.f32 %v2333_v16, %v7842_v2  ;;  %v8005_v7 = vadd.f32 %v2334_v5, %v7845_v45  ;;  %v8008_v10 = vadd.f32 %v2335_v22, %v7848_v8  ;;  %v3392_v29 = vld [vmem:[%s3724_s3 + $0xb2] sm:$0xff]  ;;  %v3393_v16 = vld [vmem:[%s3724_s3 + $0xc2] sm:$0xff] }
 0x1d1   : > { %v8011_v3 = vadd.f32 %v2336_v57, %v7851_v21  ;;  %v8014_v48 = vadd.f32 %v2337_v18, %v7854_v34  ;;  %v8017_v55 = vadd.f32 %v2338_v31, %v7857_v49  ;;  %v8020_v2 = vadd.f32 %v2339_v44, %v7860_v1  ;;  %v3386_v1 = vld [vmem:[%s3724_s3 + $0x6a] sm:$0xff]  ;;  %v9953_v5 = vld [vmem:[#allocation29_spill] sm:$0xff]  ;;  %v9959_v18 = vld [vmem:[#allocation72_spill] sm:$0xff] }
 0x1d2   : > { %v8023_v45 = vadd.f32 %v2340_v36, %v7863_v50  ;;  %v8026_v8 = vadd.f32 %v2341_v58, %v7866_v24  ;;  %v8029_v21 = vadd.f32 %v2342_v53, %v7869_v14  ;;  %v8032_v34 = vadd.f32 %v2343_v28, %v7872_v23  ;;  %v3389_v28 = vld [vmem:[%s3724_s3 + $0x92] sm:$0xff]  ;;  %v3390_v36 = vld [vmem:[%s3724_s3 + $0x9a] sm:$0xff]  ;;  %v3394_v44 = vld [vmem:[%s3724_s3 + $0xca] sm:$0xff] }
 0x1d3   : > { %v8035_v49 = vadd.f32 %v2344_v19, %v7875_v52  ;;  %v8041_v50 = vadd.f32 %v2345_v26, %v7881_v46  ;;  %v8044_v24 = vadd.f32 %v2346_v41, %v7884_v30  ;;  %v8047_v14 = vadd.f32 %v2347_v25, %v7887_v17  ;;  %v3388_v52 = vld [vmem:[%s3724_s3 + $0x82] sm:$0xff]  ;;  %v9951_v17 = vld [vmem:[#allocation27_spill] sm:$0xff]  ;;  %v3395_v58 = vld [vmem:[%s3724_s3 + $0xda] sm:$0xff] }
 0x1d4   : > { %v8050_v23 = vadd.f32 %v2348_v63, %v7890_v13  ;;  %v8056_v59 = vadd.f32 %v2349_v12, %v7896_v11  ;;  %v8059_v46 = vadd.f32 %v2350_v9, %v7899_v6  ;;  %v9949_v30 = vld [vmem:[#allocation26_spill] sm:$0xff]  ;;  %v8065_v20 = vadd.f32 %v2352_v15, %v9951_v17  ;;  %v9957_v22 = vld [vmem:[#allocation31_spill] sm:$0xff]  ;;  %v9967_v9 = vld [vmem:[#allocation52_spill] sm:$0xff] }
 0x1d5   : > { %v8062_v61 = vadd.f32 %v2351_v43, %v9949_v30  ;;  %v3391_v13 = vld [vmem:[%s3724_s3 + $0xaa] sm:$0xff]  ;;  %v8071_v11 = vadd.f32 %v2353_v27, %v9953_v5  ;;  %v8077_v57 = vadd.f32 %v2355_v35, %v9957_v22  ;;  %v8080_v31 = vadd.f32 %v2356_v33, %v9959_v18  ;;  %v3396_v53 = vld [vmem:[%s3724_s3 + $0xe2] sm:$0xff]  ;;  %v3397_v15 = vld [vmem:[%s3724_s3 + $0xf2] sm:$0xff] }
 0x1d6   : > { %9952 = vst [vmem:[#allocation56_spill] sm:$0xff] %v8065_v20  ;;  %v9955_v12 = vld [vmem:[#allocation30_spill] sm:$0xff]  ;;  %v9961_v19 = vld [vmem:[#allocation15_spill] sm:$0xff]  ;;  %v8095_v43 = vadd.f32 %v2360_v62, %v9967_v9  ;;  %v2429_v30 = vmul.f32 %v3385_v38, %v9969_v56  ;;  %v2431_v17 = vmul.f32 %v3387_v60, %v9969_v56  ;;  %v3403_v62 = vld [vmem:[%s3724_s3 + $0x13a] sm:$0xff]  ;;  %v2433_v22 = vmul.f32 %v3389_v28, %v9969_v56 }
 0x1d7   : > { %9950 = vst [vmem:[#allocation55_spill] sm:$0xff] %v8062_v61  ;;  %9954 = vst [vmem:[#allocation66_spill] sm:$0xff] %v8071_v11  ;;  %v8074_v6 = vadd.f32 %v2354_v47, %v9955_v12  ;;  %v8086_v26 = vadd.f32 %v2357_v37, %v9961_v19  ;;  %v9963_v27 = vld [vmem:[#allocation114_spill] sm:$0xff]  ;;  %v9965_v25 = vld [vmem:[#allocation115_spill] sm:$0xff]  ;;  %v2434_v18 = vmul.f32 %v3390_v36, %v9969_v56 }
 0x1d8   : > { %9958 = vst [vmem:[#allocation68_spill] sm:$0xff] %v8077_v57  ;;  %9960 = vst [vmem:[#allocation73_spill] sm:$0xff] %v8080_v31  ;;  %v8089_v41 = vadd.f32 %v2358_v54, %v9963_v27  ;;  %v8092_v63 = vadd.f32 %v2359_v51, %v9965_v25  ;;  %v3398_v47 = vld [vmem:[%s3724_s3 + $0xfa] sm:$0xff]  ;;  %v3399_v35 = vld [vmem:[%s3724_s3 + $0x10a] sm:$0xff]  ;;  %v2430_v54 = vmul.f32 %v3386_v1, %v9969_v56 }
 0x1d9   : > { %9956 = vst [vmem:[#allocation67_spill] sm:$0xff] %v8074_v6  ;;  %9962 = vst [vmem:[#allocation48_spill] sm:$0xff] %v8086_v26  ;;  %v3400_v33 = vld [vmem:[%s3724_s3 + $0x112] sm:$0xff]  ;;  %v3402_v37 = vld [vmem:[%s3724_s3 + $0x12a] sm:$0xff]  ;;  %v2432_v51 = vmul.f32 %v3388_v52, %v9969_v56  ;;  %v2435_v19 = vmul.f32 %v3391_v13, %v9969_v56  ;;  %v2436_v38 = vmul.f32 %v3392_v29, %v9969_v56 }
 0x1da   : > { %9964 = vst [vmem:[#allocation7_spill] sm:$0xff] %v8089_v41  ;;  %9966 = vst [vmem:[#allocation8_spill] sm:$0xff] %v8092_v63  ;;  %v3404_v5 = vld [vmem:[%s3724_s3 + $0x142] sm:$0xff]  ;;  %v3405_v12 = vld [vmem:[%s3724_s3 + $0x152] sm:$0xff]  ;;  %v2437_v25 = vmul.f32 %v3393_v16, %v9969_v56  ;;  %v2438_v52 = vmul.f32 %v3394_v44, %v9969_v56  ;;  %v2439_v9 = vmul.f32 %v3395_v58, %v9969_v56 }
 0x1db   : > { %9968 = vst [vmem:[#allocation9_spill] sm:$0xff] %v8095_v43  ;;  %v3406_v1 = vld [vmem:[%s3724_s3 + $0x15a] sm:$0xff]  ;;  %v3407_v27 = vld [vmem:[%s3724_s3 + $0x16a] sm:$0xff]  ;;  %v3408_v60 = vld [vmem:[%s3724_s3 + $0x172] sm:$0xff]  ;;  %v2440_v43 = vmul.f32 %v3396_v53, %v9969_v56  ;;  %v2441_v36 = vmul.f32 %v3397_v15, %v9969_v56  ;;  %v2442_v13 = vmul.f32 %v3398_v47, %v9969_v56  ;;  %v2443_v41 = vmul.f32 %v3399_v35, %v9969_v56 }
 0x1dc   : > { %v3411_v28 = vld [vmem:[%s3724_s3 + $0x19a] sm:$0xff]  ;;  %v3412_v63 = vld [vmem:[%s3724_s3 + $0x1a2] sm:$0xff]  ;;  %v2444_v29 = vmul.f32 %v3400_v33, %v9969_v56  ;;  %v3415_v26 = vld [vmem:[%s3724_s3 + $0x1ca] sm:$0xff]  ;;  %v2445_v16 = vmul.f32 %v3401_v4, %v9969_v56  ;;  %v2446_v44 = vmul.f32 %v3402_v37, %v9969_v56  ;;  %v2447_v58 = vmul.f32 %v3403_v62, %v9969_v56 }
 0x1dd   : > { %v3416_v31 = vld [vmem:[%s3724_s3 + $0x1d2] sm:$0xff]  ;;  %v2448_v53 = vmul.f32 %v3404_v5, %v9969_v56  ;;  %v2449_v57 = vmul.f32 %v3405_v12, %v9969_v56  ;;  %v2450_v15 = vmul.f32 %v3406_v1, %v9969_v56  ;;  %v2451_v47 = vmul.f32 %v3407_v27, %v9969_v56  ;;  %v9970_v33 = vld [vmem:[#allocation94_spill] sm:$0xff]  ;;  %v9973_v12 = vld [vmem:[#allocation77_spill] sm:$0xff] }
 0x1de   : > { %v2452_v35 = vmul.f32 %v3408_v60, %v9969_v56  ;;  %v2453_v6 = vmul.f32 %v9970_v33, %v9969_v56  ;;  %v9971_v11 = vld [vmem:[#allocation95_spill] sm:$0xff]  ;;  %v2455_v37 = vmul.f32 %v3411_v28, %v9969_v56  ;;  %v2456_v62 = vmul.f32 %v3412_v63, %v9969_v56 }
 0x1df   : > { %v2454_v4 = vmul.f32 %v9971_v11, %v9969_v56  ;;  %v9972_v5 = vld [vmem:[#allocation19_spill] sm:$0xff]  ;;  %v2458_v1 = vmul.f32 %v9973_v12, %v9969_v56  ;;  %v2459_v27 = vmul.f32 %v3415_v26, %v9969_v56  ;;  %v2460_v60 = vmul.f32 %v3416_v31, %v9969_v56  ;;  %v3417_v26 = vld [vmem:[%s3724_s3 + $0x63] sm:$0xff]  ;;  %v9994_v12 = vld [vmem:[#allocation92_spill] sm:$0xff] }
 0x1e0   : > { %v2457_v20 = vmul.f32 %v9972_v5, %v9969_v56  ;;  %v8150_v61 = vadd.f32 %v2429_v30, %v7990_v40  ;;  %v8153_v11 = vadd.f32 %v2430_v54, %v7993_v32  ;;  %v8156_v63 = vadd.f32 %v2431_v17, %v7996_v0  ;;  %v3419_v56 = vld [vmem:[%s3724_s3 + $0x7b] sm:$0xff]  ;;  %v3433_v5 = vld [vmem:[%s3724_s3 + $0x123] sm:$0xff] }
 0x1e1   : > { %v8159_v28 = vadd.f32 %v2432_v51, %v7999_v42  ;;  %v8162_v33 = vadd.f32 %v2433_v22, %v8002_v39  ;;  %v8165_v31 = vadd.f32 %v2434_v18, %v8005_v7  ;;  %v8168_v40 = vadd.f32 %v2435_v19, %v8008_v10  ;;  %v3424_v51 = vld [vmem:[%s3724_s3 + $0xb3] sm:$0xff]  ;;  %v3425_v22 = vld [vmem:[%s3724_s3 + $0xc3] sm:$0xff] }
 0x1e2   : > { %v8171_v32 = vadd.f32 %v2436_v38, %v8011_v3  ;;  %v8174_v0 = vadd.f32 %v2437_v25, %v8014_v48  ;;  %v8177_v42 = vadd.f32 %v2438_v52, %v8017_v55  ;;  %v8180_v39 = vadd.f32 %v2439_v9, %v8020_v2  ;;  %v3418_v2 = vld [vmem:[%s3724_s3 + $0x6b] sm:$0xff]  ;;  %v9982_v19 = vld [vmem:[#allocation68_spill] sm:$0xff]  ;;  %v9984_v25 = vld [vmem:[#allocation73_spill] sm:$0xff] }
 0x1e3   : > { %v8183_v7 = vadd.f32 %v2440_v43, %v8023_v45  ;;  %v8186_v10 = vadd.f32 %v2441_v36, %v8026_v8  ;;  %v8189_v3 = vadd.f32 %v2442_v13, %v8029_v21  ;;  %v8192_v48 = vadd.f32 %v2443_v41, %v8032_v34  ;;  %v3421_v41 = vld [vmem:[%s3724_s3 + $0x93] sm:$0xff]  ;;  %v3422_v43 = vld [vmem:[%s3724_s3 + $0x9b] sm:$0xff]  ;;  %v9978_v18 = vld [vmem:[#allocation66_spill] sm:$0xff] }
 0x1e4   : > { %v8195_v55 = vadd.f32 %v2444_v29, %v8035_v49  ;;  %v8201_v45 = vadd.f32 %v2445_v16, %v8041_v50  ;;  %v8204_v8 = vadd.f32 %v2446_v44, %v8044_v24  ;;  %v8207_v21 = vadd.f32 %v2447_v58, %v8047_v14  ;;  %v3420_v49 = vld [vmem:[%s3724_s3 + $0x83] sm:$0xff]  ;;  %v9974_v24 = vld [vmem:[#allocation55_spill] sm:$0xff]  ;;  %v9976_v14 = vld [vmem:[#allocation56_spill] sm:$0xff] }
 0x1e5   : > { %v8210_v34 = vadd.f32 %v2448_v53, %v8050_v23  ;;  %v8216_v30 = vadd.f32 %v2449_v57, %v8056_v59  ;;  %v8219_v50 = vadd.f32 %v2450_v15, %v8059_v46  ;;  %v8222_v54 = vadd.f32 %v2451_v47, %v9974_v24  ;;  %v3423_v23 = vld [vmem:[%s3724_s3 + $0xab] sm:$0xff]  ;;  %v3427_v36 = vld [vmem:[%s3724_s3 + $0xdb] sm:$0xff]  ;;  %v3428_v13 = vld [vmem:[%s3724_s3 + $0xe3] sm:$0xff] }
 0x1e6   : > { %v8225_v17 = vadd.f32 %v2452_v35, %v9976_v14  ;;  %v8231_v59 = vadd.f32 %v2453_v6, %v9978_v18  ;;  %v9980_v57 = vld [vmem:[#allocation67_spill] sm:$0xff]  ;;  %v8237_v38 = vadd.f32 %v2455_v37, %v9982_v19  ;;  %v8240_v52 = vadd.f32 %v2456_v62, %v9984_v25  ;;  %v9986_v29 = vld [vmem:[#allocation48_spill] sm:$0xff]  ;;  %v9992_v15 = vld [vmem:[#allocation9_spill] sm:$0xff] }
 0x1e7   : > { %9975 = vst [vmem:[#allocation5_spill] sm:$0xff] %v8222_v54  ;;  %v8234_v46 = vadd.f32 %v2454_v4, %v9980_v57  ;;  %v3426_v9 = vld [vmem:[%s3724_s3 + $0xcb] sm:$0xff]  ;;  %v8246_v16 = vadd.f32 %v2457_v20, %v9986_v29  ;;  %v9990_v58 = vld [vmem:[#allocation8_spill] sm:$0xff]  ;;  %v8255_v47 = vadd.f32 %v2460_v60, %v9992_v15  ;;  %v2529_v24 = vmul.f32 %v3417_v26, %v9994_v12  ;;  %v3436_v18 = vld [vmem:[%s3724_s3 + $0x143] sm:$0xff] }
 0x1e8   : > { %9977 = vst [vmem:[#allocation6_spill] sm:$0xff] %v8225_v17  ;;  %9979 = vst [vmem:[#allocation116_spill] sm:$0xff] %v8231_v59  ;;  %v9988_v6 = vld [vmem:[#allocation7_spill] sm:$0xff]  ;;  %v8252_v53 = vadd.f32 %v2459_v27, %v9990_v58  ;;  %v3430_v4 = vld [vmem:[%s3724_s3 + $0xfb] sm:$0xff]  ;;  %v2531_v14 = vmul.f32 %v3419_v56, %v9994_v12  ;;  %v2532_v27 = vmul.f32 %v3420_v49, %v9994_v12 }
 0x1e9   : > { %9981 = vst [vmem:[#allocation117_spill] sm:$0xff] %v8234_v46  ;;  %9983 = vst [vmem:[#allocation118_spill] sm:$0xff] %v8237_v38  ;;  %v8249_v44 = vadd.f32 %v2458_v1, %v9988_v6  ;;  %v3429_v35 = vld [vmem:[%s3724_s3 + $0xf3] sm:$0xff]  ;;  %v3431_v37 = vld [vmem:[%s3724_s3 + $0x10b] sm:$0xff]  ;;  %v2530_v1 = vmul.f32 %v3418_v2, %v9994_v12  ;;  %v2533_v19 = vmul.f32 %v3421_v41, %v9994_v12 }
 0x1ea   : > { %9985 = vst [vmem:[#allocation119_spill] sm:$0xff] %v8240_v52  ;;  %9987 = vst [vmem:[#allocation120_spill] sm:$0xff] %v8246_v16  ;;  %v3432_v62 = vld [vmem:[%s3724_s3 + $0x113] sm:$0xff]  ;;  %v3434_v20 = vld [vmem:[%s3724_s3 + $0x12b] sm:$0xff]  ;;  %v2534_v25 = vmul.f32 %v3422_v43, %v9994_v12  ;;  %v2535_v29 = vmul.f32 %v3423_v23, %v9994_v12  ;;  %v2536_v26 = vmul.f32 %v3424_v51, %v9994_v12 }
 0x1eb   : > { %9989 = vst [vmem:[#allocation121_spill] sm:$0xff] %v8249_v44  ;;  %9991 = vst [vmem:[#allocation123_spill] sm:$0xff] %v8252_v53  ;;  %v3435_v60 = vld [vmem:[%s3724_s3 + $0x13b] sm:$0xff]  ;;  %v3437_v57 = vld [vmem:[%s3724_s3 + $0x153] sm:$0xff]  ;;  %v2537_v58 = vmul.f32 %v3425_v22, %v9994_v12  ;;  %v2538_v49 = vmul.f32 %v3426_v9, %v9994_v12  ;;  %v2539_v15 = vmul.f32 %v3427_v36, %v9994_v12 }
 0x1ec   : > { %9993 = vst [vmem:[#allocation124_spill] sm:$0xff] %v8255_v47  ;;  %v3438_v2 = vld [vmem:[%s3724_s3 + $0x15b] sm:$0xff]  ;;  %v3439_v6 = vld [vmem:[%s3724_s3 + $0x16b] sm:$0xff]  ;;  %v3440_v56 = vld [vmem:[%s3724_s3 + $0x173] sm:$0xff]  ;;  %v2540_v47 = vmul.f32 %v3428_v13, %v9994_v12  ;;  %v2541_v43 = vmul.f32 %v3429_v35, %v9994_v12  ;;  %v2542_v23 = vmul.f32 %v3430_v4, %v9994_v12  ;;  %v2543_v44 = vmul.f32 %v3431_v37, %v9994_v12 }
 0x1ed   : > { %v3443_v41 = vld [vmem:[%s3724_s3 + $0x19b] sm:$0xff]  ;;  %v3444_v53 = vld [vmem:[%s3724_s3 + $0x1a3] sm:$0xff]  ;;  %v2544_v51 = vmul.f32 %v3432_v62, %v9994_v12  ;;  %v3447_v16 = vld [vmem:[%s3724_s3 + $0x1cb] sm:$0xff]  ;;  %v2545_v22 = vmul.f32 %v3433_v5, %v9994_v12  ;;  %v2546_v9 = vmul.f32 %v3434_v20, %v9994_v12  ;;  %v2547_v36 = vmul.f32 %v3435_v60, %v9994_v12 }
 0x1ee   : > { %v3448_v52 = vld [vmem:[%s3724_s3 + $0x1d3] sm:$0xff]  ;;  %v2548_v13 = vmul.f32 %v3436_v18, %v9994_v12  ;;  %v2549_v38 = vmul.f32 %v3437_v57, %v9994_v12  ;;  %v2550_v35 = vmul.f32 %v3438_v2, %v9994_v12  ;;  %v2551_v4 = vmul.f32 %v3439_v6, %v9994_v12  ;;  %v9995_v62 = vld [vmem:[#allocation18_spill] sm:$0xff] }
 0x1ef   : > { %v2552_v37 = vmul.f32 %v3440_v56, %v9994_v12  ;;  %v2553_v46 = vmul.f32 %v9995_v62, %v9994_v12  ;;  %v9996_v59 = vld [vmem:[#allocation20_spill] sm:$0xff]  ;;  %v2555_v20 = vmul.f32 %v3443_v41, %v9994_v12  ;;  %v2556_v60 = vmul.f32 %v3444_v53, %v9994_v12  ;;  %v9997_v18 = vld [vmem:[#allocation155_spill] sm:$0xff] }
 0x1f0   : > { %v2554_v5 = vmul.f32 %v9996_v59, %v9994_v12  ;;  %v2557_v17 = vmul.f32 %v9997_v18, %v9994_v12  ;;  %v9998_v57 = vld [vmem:[#allocation156_spill] sm:$0xff]  ;;  %v2559_v6 = vmul.f32 %v3447_v16, %v9994_v12  ;;  %v2560_v56 = vmul.f32 %v3448_v52, %v9994_v12  ;;  %v3449_v16 = vld [vmem:[%s3724_s3 + $0x64] sm:$0xff] }
 0x1f1   : > { %v2558_v2 = vmul.f32 %v9998_v57, %v9994_v12  ;;  %v8310_v54 = vadd.f32 %v2529_v24, %v8150_v61  ;;  %v8313_v59 = vadd.f32 %v2530_v1, %v8153_v11  ;;  %v8316_v53 = vadd.f32 %v2531_v14, %v8156_v63  ;;  %v3451_v12 = vld [vmem:[%s3724_s3 + $0x7c] sm:$0xff]  ;;  %v3465_v18 = vld [vmem:[%s3724_s3 + $0x124] sm:$0xff] }
 0x1f2   : > { %v8319_v41 = vadd.f32 %v2532_v27, %v8159_v28  ;;  %v8322_v62 = vadd.f32 %v2533_v19, %v8162_v33  ;;  %v8325_v52 = vadd.f32 %v2534_v25, %v8165_v31  ;;  %v8328_v61 = vadd.f32 %v2535_v29, %v8168_v40  ;;  %v3456_v27 = vld [vmem:[%s3724_s3 + $0xb4] sm:$0xff]  ;;  %v3457_v19 = vld [vmem:[%s3724_s3 + $0xc4] sm:$0xff] }
 0x1f3   : > { %v8331_v11 = vadd.f32 %v2536_v26, %v8171_v32  ;;  %v8334_v63 = vadd.f32 %v2537_v58, %v8174_v0  ;;  %v8337_v28 = vadd.f32 %v2538_v49, %v8177_v42  ;;  %v8340_v33 = vadd.f32 %v2539_v15, %v8180_v39  ;;  %v3450_v39 = vld [vmem:[%s3724_s3 + $0x6c] sm:$0xff]  ;;  %v10004_v25 = vld [vmem:[#allocation116_spill] sm:$0xff]  ;;  %v10020_v57 = vld [vmem:[#allocation93_spill] sm:$0xff] }
 0x1f4   : > { %v8343_v31 = vadd.f32 %v2540_v47, %v8183_v7  ;;  %v8346_v40 = vadd.f32 %v2541_v43, %v8186_v10  ;;  %v8349_v32 = vadd.f32 %v2542_v23, %v8189_v3  ;;  %v8352_v0 = vadd.f32 %v2543_v44, %v8192_v48  ;;  %v3453_v44 = vld [vmem:[%s3724_s3 + $0x94] sm:$0xff]  ;;  %v3454_v47 = vld [vmem:[%s3724_s3 + $0x9c] sm:$0xff]  ;;  %v10008_v29 = vld [vmem:[#allocation118_spill] sm:$0xff] }
 0x1f5   : > { %v8355_v42 = vadd.f32 %v2544_v51, %v8195_v55  ;;  %v8361_v7 = vadd.f32 %v2545_v22, %v8201_v45  ;;  %v8364_v10 = vadd.f32 %v2546_v9, %v8204_v8  ;;  %v8367_v3 = vadd.f32 %v2547_v36, %v8207_v21  ;;  %v3452_v55 = vld [vmem:[%s3724_s3 + $0x84] sm:$0xff]  ;;  %v10010_v58 = vld [vmem:[#allocation119_spill] sm:$0xff]  ;;  %v3459_v43 = vld [vmem:[%s3724_s3 + $0xdc] sm:$0xff] }
 0x1f6   : > { %v8370_v48 = vadd.f32 %v2548_v13, %v8210_v34  ;;  %v8376_v24 = vadd.f32 %v2549_v38, %v8216_v30  ;;  %v8379_v45 = vadd.f32 %v2550_v35, %v8219_v50  ;;  %v10000_v8 = vld [vmem:[#allocation5_spill] sm:$0xff]  ;;  %v10002_v21 = vld [vmem:[#allocation6_spill] sm:$0xff]  ;;  %v8391_v30 = vadd.f32 %v2553_v46, %v10004_v25  ;;  %v10012_v51 = vld [vmem:[#allocation120_spill] sm:$0xff] }
 0x1f7   : > { %v8382_v1 = vadd.f32 %v2551_v4, %v10000_v8  ;;  %v8385_v14 = vadd.f32 %v2552_v37, %v10002_v21  ;;  %v3455_v34 = vld [vmem:[%s3724_s3 + $0xac] sm:$0xff]  ;;  %v10006_v38 = vld [vmem:[#allocation117_spill] sm:$0xff]  ;;  %v8397_v26 = vadd.f32 %v2555_v20, %v10008_v29  ;;  %v8400_v49 = vadd.f32 %v2556_v60, %v10010_v58  ;;  %v10018_v35 = vld [vmem:[#allocation124_spill] sm:$0xff] }
 0x1f8   : > { %9999 = vst [vmem:[#allocation129_spill] sm:$0xff] %v8379_v45  ;;  %10005 = vst [vmem:[#allocation135_spill] sm:$0xff] %v8391_v30  ;;  %v8394_v50 = vadd.f32 %v2554_v5, %v10006_v38  ;;  %v3458_v15 = vld [vmem:[%s3724_s3 + $0xcc] sm:$0xff]  ;;  %v3460_v23 = vld [vmem:[%s3724_s3 + $0xe4] sm:$0xff]  ;;  %v8406_v22 = vadd.f32 %v2557_v17, %v10012_v51  ;;  %v8415_v4 = vadd.f32 %v2560_v56, %v10018_v35 }
 0x1f9   : > { %10001 = vst [vmem:[#allocation130_spill] sm:$0xff] %v8382_v1  ;;  %10003 = vst [vmem:[#allocation131_spill] sm:$0xff] %v8385_v14  ;;  %v10014_v46 = vld [vmem:[#allocation121_spill] sm:$0xff]  ;;  %v10016_v36 = vld [vmem:[#allocation123_spill] sm:$0xff]  ;;  %v2629_v8 = vmul.f32 %v3449_v16, %v10020_v57  ;;  %v2631_v21 = vmul.f32 %v3451_v12, %v10020_v57  ;;  %v2633_v29 = vmul.f32 %v3453_v44, %v10020_v57 }
 0x1fa   : > { %10007 = vst [vmem:[#allocation136_spill] sm:$0xff] %v8394_v50  ;;  %10009 = vst [vmem:[#allocation137_spill] sm:$0xff] %v8397_v26  ;;  %v8409_v9 = vadd.f32 %v2558_v2, %v10014_v46  ;;  %v8412_v13 = vadd.f32 %v2559_v6, %v10016_v36  ;;  %v3461_v37 = vld [vmem:[%s3724_s3 + $0xf4] sm:$0xff]  ;;  %v3462_v5 = vld [vmem:[%s3724_s3 + $0xfc] sm:$0xff]  ;;  %v2630_v2 = vmul.f32 %v3450_v39, %v10020_v57 }
 0x1fb   : > { %10011 = vst [vmem:[#allocation138_spill] sm:$0xff] %v8400_v49  ;;  %10013 = vst [vmem:[#allocation139_spill] sm:$0xff] %v8406_v22  ;;  %v3463_v20 = vld [vmem:[%s3724_s3 + $0x10c] sm:$0xff]  ;;  %v3464_v60 = vld [vmem:[%s3724_s3 + $0x114] sm:$0xff]  ;;  %v2632_v6 = vmul.f32 %v3452_v55, %v10020_v57  ;;  %v2634_v58 = vmul.f32 %v3454_v47, %v10020_v57  ;;  %v2635_v51 = vmul.f32 %v3455_v34, %v10020_v57 }
 0x1fc   : > { %10015 = vst [vmem:[#allocation140_spill] sm:$0xff] %v8409_v9  ;;  %10017 = vst [vmem:[#allocation141_spill] sm:$0xff] %v8412_v13  ;;  %v3466_v17 = vld [vmem:[%s3724_s3 + $0x12c] sm:$0xff]  ;;  %v3467_v56 = vld [vmem:[%s3724_s3 + $0x13c] sm:$0xff]  ;;  %v2636_v16 = vmul.f32 %v3456_v27, %v10020_v57  ;;  %v2637_v46 = vmul.f32 %v3457_v19, %v10020_v57  ;;  %v2638_v36 = vmul.f32 %v3458_v15, %v10020_v57 }
 0x1fd   : > { %10019 = vst [vmem:[#allocation142_spill] sm:$0xff] %v8415_v4  ;;  %v3468_v25 = vld [vmem:[%s3724_s3 + $0x144] sm:$0xff]  ;;  %v3469_v38 = vld [vmem:[%s3724_s3 + $0x154] sm:$0xff]  ;;  %v3470_v39 = vld [vmem:[%s3724_s3 + $0x15c] sm:$0xff]  ;;  %v2639_v35 = vmul.f32 %v3459_v43, %v10020_v57  ;;  %v2640_v44 = vmul.f32 %v3460_v23, %v10020_v57  ;;  %v2641_v13 = vmul.f32 %v3461_v37, %v10020_v57  ;;  %v2642_v34 = vmul.f32 %v3462_v5, %v10020_v57 }
 0x1fe   : > { %v3471_v12 = vld [vmem:[%s3724_s3 + $0x16c] sm:$0xff]  ;;  %v3472_v55 = vld [vmem:[%s3724_s3 + $0x174] sm:$0xff]  ;;  %v3475_v4 = vld [vmem:[%s3724_s3 + $0x19c] sm:$0xff]  ;;  %v2643_v27 = vmul.f32 %v3463_v20, %v10020_v57  ;;  %v2644_v9 = vmul.f32 %v3464_v60, %v10020_v57  ;;  %v2645_v15 = vmul.f32 %v3465_v18, %v10020_v57  ;;  %v2646_v43 = vmul.f32 %v3466_v17, %v10020_v57 }
 0x1ff   : > { %v3476_v47 = vld [vmem:[%s3724_s3 + $0x1a4] sm:$0xff]  ;;  %v3479_v19 = vld [vmem:[%s3724_s3 + $0x1cc] sm:$0xff]  ;;  %v3480_v22 = vld [vmem:[%s3724_s3 + $0x1d4] sm:$0xff]  ;;  %v2647_v23 = vmul.f32 %v3467_v56, %v10020_v57  ;;  %v2648_v49 = vmul.f32 %v3468_v25, %v10020_v57  ;;  %v2649_v37 = vmul.f32 %v3469_v38, %v10020_v57  ;;  %v2650_v5 = vmul.f32 %v3470_v39, %v10020_v57  ;;  %s8552_s3 = scalar_lea.sflag [#allocation3], %s169_s24 }
 0x200   : > { %v2651_v20 = vmul.f32 %v3471_v12, %v10020_v57  ;;  %v2652_v60 = vmul.f32 %v3472_v55, %v10020_v57  ;;  %v10021_v26 = vld [vmem:[#allocation91_spill] sm:$0xff]  ;;  %v10022_v30 = vld [vmem:[#allocation96_spill] sm:$0xff]  ;;  %v2655_v17 = vmul.f32 %v3475_v4, %v10020_v57  ;;  %v2656_v56 = vmul.f32 %v3476_v47, %v10020_v57  ;;  %v10023_v25 = vld [vmem:[#allocation97_spill] sm:$0xff] }
 0x201   : > { %v2653_v50 = vmul.f32 %v10021_v26, %v10020_v57  ;;  %v2654_v18 = vmul.f32 %v10022_v30, %v10020_v57  ;;  %v2657_v14 = vmul.f32 %v10023_v25, %v10020_v57  ;;  %v10024_v38 = vld [vmem:[#allocation102_spill] sm:$0xff]  ;;  %v2659_v12 = vmul.f32 %v3479_v19, %v10020_v57 }
 0x202   : > { %v2658_v39 = vmul.f32 %v10024_v38, %v10020_v57  ;;  %v2660_v55 = vmul.f32 %v3480_v22, %v10020_v57  ;;  %v2661_v26 = vadd.f32 %v2629_v8, %v8310_v54  ;;  %v2662_v1 = vadd.f32 %v2630_v2, %v8313_v59 }
 0x203   : > { %v2663_v30 = vadd.f32 %v2631_v21, %v8316_v53  ;;  %v2664_v4 = vadd.f32 %v2632_v6, %v8319_v41  ;;  %v2665_v47 = vadd.f32 %v2633_v29, %v8322_v62  ;;  %v2666_v25 = vadd.f32 %v2634_v58, %v8325_v52  ;;  %v10033_v57 = vld [vmem:[#allocation140_spill] sm:$0xff]  ;;  %v10034_v2 = vld [vmem:[#allocation141_spill] sm:$0xff] }
 0x204   : > { %v2667_v45 = vadd.f32 %v2635_v51, %v8328_v61  ;;  %v2668_v38 = vadd.f32 %v2636_v16, %v8331_v11  ;;  %v2669_v19 = vadd.f32 %v2637_v46, %v8334_v63  ;;  %v2670_v22 = vadd.f32 %v2638_v36, %v8337_v28  ;;  %2693 = vst [vmem:[%s8487_s26] sm:$0xff] %v2661_v26  ;;  %v10035_v6 = vld [vmem:[#allocation142_spill] sm:$0xff] }
 0x205   : > { %v2671_v54 = vadd.f32 %v2639_v35, %v8340_v33  ;;  %v2672_v59 = vadd.f32 %v2640_v44, %v8343_v31  ;;  %2694 = vst [vmem:[%s8487_s26 + $0x8] sm:$0xff] %v2662_v1  ;;  %2695 = vst [vmem:[%s8487_s26 + $0x10] sm:$0xff] %v2663_v30  ;;  %v2673_v53 = vadd.f32 %v2641_v13, %v8346_v40  ;;  %v10025_v31 = vld [vmem:[#allocation129_spill] sm:$0xff] }
 0x206   : > { %2696 = vst [vmem:[%s8487_s26 + $0x18] sm:$0xff] %v2664_v4  ;;  %v2674_v41 = vadd.f32 %v2642_v34, %v8349_v32  ;;  %v2675_v62 = vadd.f32 %v2643_v27, %v8352_v0  ;;  %v2676_v52 = vadd.f32 %v2644_v9, %v8355_v42  ;;  %2697 = vst [vmem:[%s8487_s26 + $0x20] sm:$0xff] %v2665_v47  ;;  %v10026_v32 = vld [vmem:[#allocation130_spill] sm:$0xff]  ;;  %v10027_v42 = vld [vmem:[#allocation131_spill] sm:$0xff] }
 0x207   : > { %2698 = vst [vmem:[%s8487_s26 + $0x28] sm:$0xff] %v2666_v25  ;;  %2699 = vst [vmem:[%s8487_s26 + $0x30] sm:$0xff] %v2667_v45  ;;  %v2677_v61 = vadd.f32 %v2645_v15, %v8361_v7  ;;  %v2678_v11 = vadd.f32 %v2646_v43, %v8364_v10  ;;  %v2679_v63 = vadd.f32 %v2647_v23, %v8367_v3  ;;  %v10028_v10 = vld [vmem:[#allocation135_spill] sm:$0xff]  ;;  %v10030_v1 = vld [vmem:[#allocation137_spill] sm:$0xff] }
 0x208   : > { %2700 = vst [vmem:[%s8487_s26 + $0x38] sm:$0xff] %v2668_v38  ;;  %v2680_v28 = vadd.f32 %v2648_v49, %v8370_v48  ;;  %2701 = vst [vmem:[%s8487_s26 + $0x40] sm:$0xff] %v2669_v19  ;;  %v2681_v33 = vadd.f32 %v2649_v37, %v8376_v24  ;;  %v2682_v40 = vadd.f32 %v2650_v5, %v10025_v31  ;;  %v10029_v48 = vld [vmem:[#allocation136_spill] sm:$0xff]  ;;  %v10031_v49 = vld [vmem:[#allocation138_spill] sm:$0xff] }
 0x209   : > { %2702 = vst [vmem:[%s8487_s26 + $0x48] sm:$0xff] %v2670_v22  ;;  %2703 = vst [vmem:[%s8487_s26 + $0x50] sm:$0xff] %v2671_v54  ;;  %v2683_v0 = vadd.f32 %v2651_v20, %v10026_v32  ;;  %v2684_v7 = vadd.f32 %v2652_v60, %v10027_v42  ;;  %v2685_v3 = vadd.f32 %v2653_v50, %v10028_v10  ;;  %v10032_v50 = vld [vmem:[#allocation139_spill] sm:$0xff] }
 0x20a   : > { %2704 = vst [vmem:[%s8487_s26 + $0x58] sm:$0xff] %v2672_v59  ;;  %2705 = vst [vmem:[%s8487_s26 + $0x60] sm:$0xff] %v2673_v53  ;;  %v2686_v45 = vadd.f32 %v2654_v18, %v10029_v48  ;;  %v2687_v24 = vadd.f32 %v2655_v17, %v10030_v1  ;;  %v2688_v9 = vadd.f32 %v2656_v56, %v10031_v49 }
 0x20b   : > { %2706 = vst [vmem:[%s8487_s26 + $0x68] sm:$0xff] %v2674_v41  ;;  %2707 = vst [vmem:[%s8487_s26 + $0x70] sm:$0xff] %v2675_v62  ;;  %v2689_v13 = vadd.f32 %v2657_v14, %v10032_v50  ;;  %v2690_v8 = vadd.f32 %v2658_v39, %v10033_v57  ;;  %v2691_v21 = vadd.f32 %v2659_v12, %v10034_v2 }
 0x20c   : > { %2708 = vst [vmem:[%s8487_s26 + $0x78] sm:$0xff] %v2676_v52  ;;  %2709 = vst [vmem:[%s8487_s26 + $0x80] sm:$0xff] %v2677_v61  ;;  %v2692_v29 = vadd.f32 %v2660_v55, %v10035_v6 }
 0x20d   : > { %2710 = vst [vmem:[%s8487_s26 + $0x88] sm:$0xff] %v2678_v11  ;;  %2711 = vst [vmem:[%s8487_s26 + $0x90] sm:$0xff] %v2679_v63 }
 0x20e   : > { %2712 = vst [vmem:[%s8487_s26 + $0x98] sm:$0xff] %v2680_v28  ;;  %2713 = vst [vmem:[%s8487_s26 + $0xa0] sm:$0xff] %v2681_v33 }
 0x20f   : > { %2714 = vst [vmem:[%s8487_s26 + $0xa8] sm:$0xff] %v2682_v40  ;;  %2715 = vst [vmem:[%s8487_s26 + $0xb0] sm:$0xff] %v2683_v0 }
 0x210   : > { %2716 = vst [vmem:[%s8487_s26 + $0xb8] sm:$0xff] %v2684_v7  ;;  %2717 = vst [vmem:[%s8487_s26 + $0xc0] sm:$0xff] %v2685_v3 }
 0x211   : > { %2718 = vst [vmem:[%s8487_s26 + $0xc8] sm:$0xff] %v2686_v45  ;;  %2719 = vst [vmem:[%s8487_s26 + $0xd0] sm:$0xff] %v2687_v24 }
 0x212   : > { %2720 = vst [vmem:[%s8487_s26 + $0xd8] sm:$0xff] %v2688_v9  ;;  %2721 = vst [vmem:[%s8487_s26 + $0xe0] sm:$0xff] %v2689_v13 }
 0x213   : > { %2722 = vst [vmem:[%s8487_s26 + $0xe8] sm:$0xff] %v2690_v8  ;;  %2723 = vst [vmem:[%s8487_s26 + $0xf0] sm:$0xff] %v2691_v21 }
 0x214   : > { %2724 = vst [vmem:[%s8487_s26 + $0xf8] sm:$0xff] %v2692_v29 }
 0x215   : > { %3560 = shalt.err (!%p3557_p5)
}
 0x216   : > { %s3561_s8 = scalar_lea.hbm %s8530_s30, 4096  ;;  %s3565_s18 = scalar_lea.hbm %s8600_s2, 8192 }
 0x217   : > { %p3562_p6 = scmp.ne.s32.totalorder %s8530_s30, %s3561_s8  ;;  %p3566_p10 = scmp.lt.u32.totalorder %s8530_s30, %s8600_s2 }
 0x218   : > { %p3567_p11 = scmp.lt.u32.totalorder %s3565_s18, %s3561_s8  ;;  %p3569_p13 = scmp.lt.u32.totalorder %s3561_s8, %s8530_s30 }
 0x219   : > { %p3563_p7 = pnand %p3562_p6, %p3685_p4 }
 0x21a   : > { %p3568_p12 = por %p3567_p11, %p3566_p10 }
 0x21b   : > { %p3564_p9 = pneg %p3563_p7 }
 0x21c   : > { %p3570_p0 = por %p3569_p13, %p3568_p12 }
 0x21e   : > { %p3571_p1 = pnand %p3570_p0, %p3564_p9 }
 0x220   : > { %3574 = shalt.err (!%p3571_p1)
}
 0x221   : > { %s3628_s24 = smov 128   ;;  %s3629_s25 = smov 8  }
 0x222   : > { %3488 = dma.vmem_to_hbm [thread:$0]  (%p3685_p4), %s8532_s28, 4096, %s8530_s30, %s8552_s3, %s3628_s24, %s3628_s24, %s3629_s25  }
 0x223 PF: > { %p3494_p2 = scmp.ge.s32.totalorder %s3625_s14, 2  ;;  %s2755_s26 = sand.u32 1, %s3605_s9  }
 0x224   : > { %s2756_s27 = scalar_lea.sflag [#allocation3], %s2755_s26 }
 0x225   : > { %p3491_p3 = pnand %p3494_p2, %p3692_p8 }
 0x227   : > { %3600 = dma.done.wait (!%p3491_p3), %s2756_s27, 4096  }
 0x228   : > { %3602 = vsyncadd (!%p3491_p3), %s2756_s27, 4294963200  ;;  %s15_s14 = sadd.s32 1, %s3625_s14   ;;  %s10036_s9 = smov %s3609_s10 }
 0x229   : > { %p12_p5 = scmp.ge.s32.totalorder %s15_s14, 4   ;;  %s10037_s10 = smov %s3613_s11 }
 0x22a   : > { %s10038_s11 = smov %s3698_s22  ;;  %s10039_s12 = smov %s3621_s13 }
 0x22b   : > { %s10040_s13 = smov %s10042_s17  ;;  %14 = sbr.rel (!%p12_p5) target bundleno = 4 (0x4), region = 70 }
 0x232   :  { %2761 = vsyncpa [#allocation3], 1 }
 0x233   :  { %2763 = vsyncpa [#allocation3 + $0x1], 1 }

</bundles_post_ra>
